<compile_context>
chip_gen: v7x
topology: tpu7x:2x2x1
jax: 0.10.0
libtpu: 0.0.40
codegen_flags: <defaults>
</compile_context>

<pallas_src>
import functools

import jax
import jax.numpy as jnp
from jax.experimental import pallas as pl
from jax.experimental.pallas import tpu as pltpu


# ----------------------------------------------------------------------------
# Fused kernel: grid over the 2N images (view-major), finalize on the last step
# ----------------------------------------------------------------------------
def kdcl_kernel(x_ref, mask_ref, cw_ref, cb_ref,
                on_w1, on_w2, on_v3, on_b2,
                tg_w1, tg_w2, tg_v3, tg_b2,
                hd_w1, hd_w2, hd_v3, hd_b2,
                loss_ref, gap_ref, *, n_per_view, wp, f_back):
    # x_ref   : (S_img, C) bf16  padded NHWC pixels of ONE image, row r = i*Wp + j
    # mask_ref: (H*Wp, 1) f32    1/(H*W) where j < W, else 0  (GAP mask over conv rows)
    # cw_ref  : (9, C, 2F) bf16  3x3 conv weights, online || target on output features
    # gap_ref : (2N, 2F) f32     resident GAP accumulator scratch
    step = pl.program_id(0)

    @pl.when(step == 0)
    def _init():
        gap_ref[...] = jnp.zeros_like(gap_ref)

    rv = mask_ref.shape[0]                      # = H * Wp  (rows holding valid outputs)

    # --- backbone: 3x3 / pad-1 conv via 9 shifted-slice matmuls (online || target) ----
    # conv_out[row r] = sum_t  x[r + ky*Wp + kx] @ w[ky, kx]   (exact, zero-padded input)
    acc = None
    for t in range(9):
        ky, kx = t // 3, t % 3
        shift = ky * wp + kx
        part = jnp.dot(x_ref[shift:shift + rv, :], cw_ref[t],
                       preferred_element_type=jnp.float32)
        acc = part if acc is None else acc + part
    y = jnp.maximum(acc + cb_ref[...], 0.0)                          # ReLU (f32)

    # global average pool: mask zeroes the pad columns and divides by H*W (sublane reduce)
    gap_row = jnp.sum(y * mask_ref[...], axis=0, keepdims=True)      # (1, 2F)

    # scatter this image's features into row `step` of the resident accumulator
    sel = jax.lax.broadcasted_iota(jnp.int32, (gap_ref.shape[0], 1), 0) == step
    gap_ref[...] += jnp.where(sel, gap_row, 0.0)

    # --- last grid step: neck / target / head / loss (tiny; all f32) ------------------
    @pl.when(step == pl.num_programs(0) - 1)
    def _finalize():
        n = n_per_view

        def mlp_bn(x, w1, w2, v3, b2):
            # Linear -> BatchNorm(train, *per-view* batch stats, biased var, eps=1e-5)
            #        -> ReLU -> Linear.   v3 rows = [bias1; gamma; beta]
            h = jnp.dot(x, w1[...], preferred_element_type=jnp.float32) + v3[0:1, :]

            def bn(hv):
                mu = jnp.mean(hv, axis=0, keepdims=True)
                c = hv - mu
                var = jnp.mean(c * c, axis=0, keepdims=True)
                return c * jax.lax.rsqrt(var + 1e-5)

            hn = jnp.concatenate([bn(h[:n]), bn(h[n:])], axis=0)     # per-view stats
            hn = jnp.maximum(hn * v3[1:2, :] + v3[2:3, :], 0.0)
            return jnp.dot(hn, w2[...], preferred_element_type=jnp.float32) + b2[...]

        def l2n(x):
            # F.normalize(x, p=2, dim=1, eps=1e-12) == x * rsqrt(max(||x||^2, 1e-24))
            ss = jnp.sum(x * x, axis=-1, keepdims=True)
            return x * jax.lax.rsqrt(jnp.maximum(ss, 1e-24))

        feat = gap_ref[...]                       # (2N, 2F), rows [view1 ; view2]
        feat_on = feat[:, :f_back]
        feat_tg = feat[:, f_back:]

        proj_on = mlp_bn(feat_on, on_w1, on_w2, on_v3, on_b2)
        # TODO(synk): target net is frozen by construction (forward-only kernel); add
        # stop_gradient / custom_vjp before wrapping this pallas_call for autodiff.
        tgt = l2n(mlp_bn(feat_tg, tg_w1, tg_w2, tg_v3, tg_b2))       # target 'embd'
        pred = l2n(mlp_bn(proj_on, hd_w1, hd_w2, hd_v3, hd_b2))      # predictor output

        # head(o_v1, t_v2) + head(o_v2, t_v1); each = -2 * sum(cos) / N
        cos = pred[:n] * tgt[n:] + pred[n:] * tgt[:n]
        loss_ref[0, 0] = (-2.0 / n) * jnp.sum(cos)


# ----------------------------------------------------------------------------
# Wrapper
# ----------------------------------------------------------------------------
@jax.jit
def kdcl_forward_train(img, params):
    """img: (N, 2, C, H, W) -- two concatenated views, NCHW per view (PyTorch layout)."""
    assert img.ndim == 5 and img.shape[1] == 2
    N, _, C, H, W = img.shape
    Hp, Wp = H + 2, W + 2
    f_back = params["online"]["conv_w"].shape[-1]

    # Padded NHWC pixels of both views, flattened to rows (pixel-major, channels = lanes),
    # with a fixed per-image stride that is (a) >= Hp*Wp + max tap shift and (b) a multiple
    # of 32 so bf16 blocks stay (16,128)-tile aligned.
    # TODO(synk): at real sizes accept NHWC at the API boundary to avoid these HBM copies.
    s_img = -(-(Hp * Wp + 2) // 32) * 32
    x = jnp.transpose(img, (1, 0, 2, 3, 4)).reshape(2 * N, C, H, W)   # view-major
    x = jnp.transpose(x, (0, 2, 3, 1))                                # NHWC
    x = jnp.pad(x, ((0, 0), (1, 1), (1, 1), (0, 0)))                  # (2N, Hp, Wp, C)
    x = x.reshape(2 * N, Hp * Wp, C)
    x = jnp.pad(x, ((0, 0), (0, s_img - Hp * Wp), (0, 0)))
    pixels = x.reshape(2 * N * s_img, C).astype(jnp.bfloat16)

    # GAP mask over conv-output rows (padded-row layout): 1/(H*W) where column < W.
    rv = H * Wp
    col = jnp.arange(rv, dtype=jnp.int32) % Wp
    mask = jnp.where(col < W, 1.0 / (H * W), 0.0).astype(jnp.float32).reshape(rv, 1)

    # Fused conv weights: online || target on the output-feature axis, bf16 for the MXU.
    cw = jnp.concatenate([params["online"]["conv_w"], params["target"]["conv_w"]], axis=-1)
    cw = cw.reshape(9, C, 2 * f_back).astype(jnp.bfloat16)
    cb = jnp.concatenate([params["online"]["conv_b"], params["target"]["conv_b"]], axis=-1)

    def mlp_args(p):                              # pack b1/gamma/beta into one operand
        v3 = jnp.concatenate([p["b1"], p["gamma"], p["beta"]], axis=0)  # (3, HID)
        return (p["w1"], p["w2"], v3, p["b2"])

    inputs = (pixels, mask, cw, cb) \
        + mlp_args(params["online"]["neck"]) \
        + mlp_args(params["target"]["neck"]) \
        + mlp_args(params["head"])

    def resident(a):                              # full-array block, fetched once
        nd = a.ndim
        return pl.BlockSpec(a.shape, lambda i: (0,) * nd)

    in_specs = [pl.BlockSpec((s_img, C), lambda i: (i, 0))] \
        + [resident(a) for a in inputs[1:]]

    loss = pl.pallas_call(
        functools.partial(kdcl_kernel, n_per_view=N, wp=Wp, f_back=f_back),
        out_shape=jax.ShapeDtypeStruct((1, 1), jnp.float32),
        grid_spec=pltpu.PrefetchScalarGridSpec(
            num_scalar_prefetch=0,
            grid=(2 * N,),
            in_specs=in_specs,
            out_specs=pl.BlockSpec(memory_space=pltpu.MemorySpace.SMEM),  # scalar loss
            scratch_shapes=[pltpu.VMEM((2 * N, 2 * f_back), jnp.float32)],
        ),
        compiler_params=pltpu.CompilerParams(
            # The image axis feeds a shared GAP accumulator and the final neck/head step,
            # so it is a reduction axis ("arbitrary").  A v7x 2-TC split would need a
            # separate finalize stage.
            dimension_semantics=("arbitrary",),
            vmem_limit_bytes=32 * 1024 * 1024,
        ),
    )(*inputs)
    return {"loss": loss[0, 0]}


# ----------------------------------------------------------------------------
# Deterministic parameter init
# ----------------------------------------------------------------------------
def make_mlp_params(key, fin, hid, fout, scale=0.1):
    k1, k2 = jax.random.split(key)
    return {
        "w1": scale * jax.random.normal(k1, (fin, hid), jnp.float32),
        "b1": jnp.zeros((1, hid), jnp.float32),
        "gamma": jnp.ones((1, hid), jnp.float32),
        "beta": jnp.zeros((1, hid), jnp.float32),
        "w2": scale * jax.random.normal(k2, (hid, fout), jnp.float32),
        "b2": jnp.zeros((1, fout), jnp.float32),
    }


def make_net_params(key, c_in, f_back, hid, d_proj):
    k1, k2 = jax.random.split(key)
    return {
        "conv_w": 0.1 * jax.random.normal(k1, (3, 3, c_in, f_back), jnp.float32),
        "conv_b": jnp.zeros((1, f_back), jnp.float32),
        "neck": make_mlp_params(k2, f_back, hid, d_proj),
    }


if __name__ == "__main__":
    N, C, H, W = 2, 4, 16, 16
    F_BACK, HID, D_PROJ, PRED_HID = 32, 64, 32, 64

    key = jax.random.PRNGKey(0)
    k_img, k_on, k_tg, k_hd = jax.random.split(key, 4)

    img = jax.random.normal(k_img, (N, 2, C, H, W), jnp.float32)
    params = {
        "online": make_net_params(k_on, C, F_BACK, HID, D_PROJ),
        "target": make_net_params(k_tg, C, F_BACK, HID, D_PROJ),
        "head": make_mlp_params(k_hd, D_PROJ, PRED_HID, D_PROJ),
    }

    out = kdcl_forward_train(img, params)
    jax.block_until_ready(out["loss"])
    print("KERNEL_OK")
</pallas_src>

<mosaic_0001>
module attributes {stable_mosaic.version = 11 : i64} {
  func.func @kdcl_kernel(%arg0: i32, %arg1: memref<352x4xbf16, #tpu.memory_space<vmem>>, %arg2: memref<288x1xf32, #tpu.memory_space<vmem>>, %arg3: memref<9x4x64xbf16, #tpu.memory_space<vmem>>, %arg4: memref<1x64xf32, #tpu.memory_space<vmem>>, %arg5: memref<32x64xf32, #tpu.memory_space<vmem>>, %arg6: memref<64x32xf32, #tpu.memory_space<vmem>>, %arg7: memref<3x64xf32, #tpu.memory_space<vmem>>, %arg8: memref<1x32xf32, #tpu.memory_space<vmem>>, %arg9: memref<32x64xf32, #tpu.memory_space<vmem>>, %arg10: memref<64x32xf32, #tpu.memory_space<vmem>>, %arg11: memref<3x64xf32, #tpu.memory_space<vmem>>, %arg12: memref<1x32xf32, #tpu.memory_space<vmem>>, %arg13: memref<32x64xf32, #tpu.memory_space<vmem>>, %arg14: memref<64x32xf32, #tpu.memory_space<vmem>>, %arg15: memref<3x64xf32, #tpu.memory_space<vmem>>, %arg16: memref<1x32xf32, #tpu.memory_space<vmem>>, %arg17: memref<1x1xf32, #tpu.memory_space<smem>>, %arg18: memref<4x64xf32, #tpu.memory_space<vmem>>) attributes {dimension_semantics = [#tpu.dimension_semantics<arbitrary>], iteration_bounds = array<i64: 4>, scalar_prefetch = 0 : i64, scratch_operands = 1 : i64, tpu.core_type = #tpu.core_type<tc>, window_params = [{transform_indices = @transform_0, window_bounds = array<i64: 352, 4>}, {pipeline_mode = #tpu.pipeline_mode<synchronous>, transform_indices = @transform_1, window_bounds = array<i64: 288, 1>}, {pipeline_mode = #tpu.pipeline_mode<synchronous>, transform_indices = @transform_2, window_bounds = array<i64: 9, 4, 64>}, {pipeline_mode = #tpu.pipeline_mode<synchronous>, transform_indices = @transform_3, window_bounds = array<i64: 1, 64>}, {pipeline_mode = #tpu.pipeline_mode<synchronous>, transform_indices = @transform_4, window_bounds = array<i64: 32, 64>}, {pipeline_mode = #tpu.pipeline_mode<synchronous>, transform_indices = @transform_5, window_bounds = array<i64: 64, 32>}, {pipeline_mode = #tpu.pipeline_mode<synchronous>, transform_indices = @transform_6, window_bounds = array<i64: 3, 64>}, {pipeline_mode = #tpu.pipeline_mode<synchronous>, transform_indices = @transform_7, window_bounds = array<i64: 1, 32>}, {pipeline_mode = #tpu.pipeline_mode<synchronous>, transform_indices = @transform_8, window_bounds = array<i64: 32, 64>}, {pipeline_mode = #tpu.pipeline_mode<synchronous>, transform_indices = @transform_9, window_bounds = array<i64: 64, 32>}, {pipeline_mode = #tpu.pipeline_mode<synchronous>, transform_indices = @transform_10, window_bounds = array<i64: 3, 64>}, {pipeline_mode = #tpu.pipeline_mode<synchronous>, transform_indices = @transform_11, window_bounds = array<i64: 1, 32>}, {pipeline_mode = #tpu.pipeline_mode<synchronous>, transform_indices = @transform_12, window_bounds = array<i64: 32, 64>}, {pipeline_mode = #tpu.pipeline_mode<synchronous>, transform_indices = @transform_13, window_bounds = array<i64: 64, 32>}, {pipeline_mode = #tpu.pipeline_mode<synchronous>, transform_indices = @transform_14, window_bounds = array<i64: 3, 64>}, {pipeline_mode = #tpu.pipeline_mode<synchronous>, transform_indices = @transform_15, window_bounds = array<i64: 1, 32>}, {transform_indices = @transform_16, window_bounds = array<i64: 1, 1>}]} {
    %c0_i32 = arith.constant 0 : i32
    %0 = arith.cmpi eq, %arg0, %c0_i32 : i32
    %1 = arith.extui %0 : i1 to i32
    %c0_i32_0 = arith.constant 0 : i32
    %2 = arith.cmpi ne, %1, %c0_i32_0 : i32
    scf.if %2 {
      %cst_51 = arith.constant 0.000000e+00 : f32
      %72 = vector.broadcast %cst_51 : f32 to vector<4x64xf32>
      %c0_52 = arith.constant 0 : index
      %c0_53 = arith.constant 0 : index
      %73 = vector.load %arg18[%c0_52, %c0_53] : memref<4x64xf32, #tpu.memory_space<vmem>>, vector<4x64xf32>
      tpu.vector_store %arg18[%c0_52, %c0_53], %72 {strides = array<i32>} : memref<4x64xf32, #tpu.memory_space<vmem>>, vector<4x64xf32>,
    } else {
    }
    %c0 = arith.constant 0 : index
    %c0_1 = arith.constant 0 : index
    %3 = vector.load %arg1[%c0, %c0_1] : memref<352x4xbf16, #tpu.memory_space<vmem>>, vector<288x4xbf16>
    %c0_2 = arith.constant 0 : index
    %c0_3 = arith.constant 0 : index
    %c0_4 = arith.constant 0 : index
    %4 = vector.load %arg3[%c0_2, %c0_3, %c0_4] : memref<9x4x64xbf16, #tpu.memory_space<vmem>>, vector<1x4x64xbf16>
    %5 = vector.shape_cast %4 : vector<1x4x64xbf16> to vector<4x64xbf16>
    %cst = arith.constant dense<0.000000e+00> : vector<288x64xf32>
    %6 = tpu.matmul %3, %5, %cst {dimension_numbers = #tpu.dot_dimension_numbers<[1], [0], [0], [1], [0, 0, 1, 1], [], []>} : vector<288x4xbf16>, vector<4x64xbf16>, vector<288x64xf32> -> vector<288x64xf32>
    %c1 = arith.constant 1 : index
    %c0_5 = arith.constant 0 : index
    %7 = vector.load %arg1[%c1, %c0_5] : memref<352x4xbf16, #tpu.memory_space<vmem>>, vector<288x4xbf16>
    %c1_6 = arith.constant 1 : index
    %c0_7 = arith.constant 0 : index
    %c0_8 = arith.constant 0 : index
    %8 = vector.load %arg3[%c1_6, %c0_7, %c0_8] : memref<9x4x64xbf16, #tpu.memory_space<vmem>>, vector<1x4x64xbf16>
    %9 = vector.shape_cast %8 : vector<1x4x64xbf16> to vector<4x64xbf16>
    %cst_9 = arith.constant dense<0.000000e+00> : vector<288x64xf32>
    %10 = tpu.matmul %7, %9, %cst_9 {dimension_numbers = #tpu.dot_dimension_numbers<[1], [0], [0], [1], [0, 0, 1, 1], [], []>} : vector<288x4xbf16>, vector<4x64xbf16>, vector<288x64xf32> -> vector<288x64xf32>
    %11 = arith.addf %6, %10 : vector<288x64xf32>
    %c2 = arith.constant 2 : index
    %c0_10 = arith.constant 0 : index
    %12 = vector.load %arg1[%c2, %c0_10] : memref<352x4xbf16, #tpu.memory_space<vmem>>, vector<288x4xbf16>
    %c2_11 = arith.constant 2 : index
    %c0_12 = arith.constant 0 : index
    %c0_13 = arith.constant 0 : index
    %13 = vector.load %arg3[%c2_11, %c0_12, %c0_13] : memref<9x4x64xbf16, #tpu.memory_space<vmem>>, vector<1x4x64xbf16>
    %14 = vector.shape_cast %13 : vector<1x4x64xbf16> to vector<4x64xbf16>
    %cst_14 = arith.constant dense<0.000000e+00> : vector<288x64xf32>
    %15 = tpu.matmul %12, %14, %cst_14 {dimension_numbers = #tpu.dot_dimension_numbers<[1], [0], [0], [1], [0, 0, 1, 1], [], []>} : vector<288x4xbf16>, vector<4x64xbf16>, vector<288x64xf32> -> vector<288x64xf32>
    %16 = arith.addf %11, %15 : vector<288x64xf32>
    %c18 = arith.constant 18 : index
    %c0_15 = arith.constant 0 : index
    %17 = vector.load %arg1[%c18, %c0_15] : memref<352x4xbf16, #tpu.memory_space<vmem>>, vector<288x4xbf16>
    %c3 = arith.constant 3 : index
    %c0_16 = arith.constant 0 : index
    %c0_17 = arith.constant 0 : index
    %18 = vector.load %arg3[%c3, %c0_16, %c0_17] : memref<9x4x64xbf16, #tpu.memory_space<vmem>>, vector<1x4x64xbf16>
    %19 = vector.shape_cast %18 : vector<1x4x64xbf16> to vector<4x64xbf16>
    %cst_18 = arith.constant dense<0.000000e+00> : vector<288x64xf32>
    %20 = tpu.matmul %17, %19, %cst_18 {dimension_numbers = #tpu.dot_dimension_numbers<[1], [0], [0], [1], [0, 0, 1, 1], [], []>} : vector<288x4xbf16>, vector<4x64xbf16>, vector<288x64xf32> -> vector<288x64xf32>
    %21 = arith.addf %16, %20 : vector<288x64xf32>
    %c19 = arith.constant 19 : index
    %c0_19 = arith.constant 0 : index
    %22 = vector.load %arg1[%c19, %c0_19] : memref<352x4xbf16, #tpu.memory_space<vmem>>, vector<288x4xbf16>
    %c4 = arith.constant 4 : index
    %c0_20 = arith.constant 0 : index
    %c0_21 = arith.constant 0 : index
    %23 = vector.load %arg3[%c4, %c0_20, %c0_21] : memref<9x4x64xbf16, #tpu.memory_space<vmem>>, vector<1x4x64xbf16>
    %24 = vector.shape_cast %23 : vector<1x4x64xbf16> to vector<4x64xbf16>
    %cst_22 = arith.constant dense<0.000000e+00> : vector<288x64xf32>
    %25 = tpu.matmul %22, %24, %cst_22 {dimension_numbers = #tpu.dot_dimension_numbers<[1], [0], [0], [1], [0, 0, 1, 1], [], []>} : vector<288x4xbf16>, vector<4x64xbf16>, vector<288x64xf32> -> vector<288x64xf32>
    %26 = arith.addf %21, %25 : vector<288x64xf32>
    %c20 = arith.constant 20 : index
    %c0_23 = arith.constant 0 : index
    %27 = vector.load %arg1[%c20, %c0_23] : memref<352x4xbf16, #tpu.memory_space<vmem>>, vector<288x4xbf16>
    %c5 = arith.constant 5 : index
    %c0_24 = arith.constant 0 : index
    %c0_25 = arith.constant 0 : index
    %28 = vector.load %arg3[%c5, %c0_24, %c0_25] : memref<9x4x64xbf16, #tpu.memory_space<vmem>>, vector<1x4x64xbf16>
    %29 = vector.shape_cast %28 : vector<1x4x64xbf16> to vector<4x64xbf16>
    %cst_26 = arith.constant dense<0.000000e+00> : vector<288x64xf32>
    %30 = tpu.matmul %27, %29, %cst_26 {dimension_numbers = #tpu.dot_dimension_numbers<[1], [0], [0], [1], [0, 0, 1, 1], [], []>} : vector<288x4xbf16>, vector<4x64xbf16>, vector<288x64xf32> -> vector<288x64xf32>
    %31 = arith.addf %26, %30 : vector<288x64xf32>
    %c36 = arith.constant 36 : index
    %c0_27 = arith.constant 0 : index
    %32 = vector.load %arg1[%c36, %c0_27] : memref<352x4xbf16, #tpu.memory_space<vmem>>, vector<288x4xbf16>
    %c6 = arith.constant 6 : index
    %c0_28 = arith.constant 0 : index
    %c0_29 = arith.constant 0 : index
    %33 = vector.load %arg3[%c6, %c0_28, %c0_29] : memref<9x4x64xbf16, #tpu.memory_space<vmem>>, vector<1x4x64xbf16>
    %34 = vector.shape_cast %33 : vector<1x4x64xbf16> to vector<4x64xbf16>
    %cst_30 = arith.constant dense<0.000000e+00> : vector<288x64xf32>
    %35 = tpu.matmul %32, %34, %cst_30 {dimension_numbers = #tpu.dot_dimension_numbers<[1], [0], [0], [1], [0, 0, 1, 1], [], []>} : vector<288x4xbf16>, vector<4x64xbf16>, vector<288x64xf32> -> vector<288x64xf32>
    %36 = arith.addf %31, %35 : vector<288x64xf32>
    %c37 = arith.constant 37 : index
    %c0_31 = arith.constant 0 : index
    %37 = vector.load %arg1[%c37, %c0_31] : memref<352x4xbf16, #tpu.memory_space<vmem>>, vector<288x4xbf16>
    %c7 = arith.constant 7 : index
    %c0_32 = arith.constant 0 : index
    %c0_33 = arith.constant 0 : index
    %38 = vector.load %arg3[%c7, %c0_32, %c0_33] : memref<9x4x64xbf16, #tpu.memory_space<vmem>>, vector<1x4x64xbf16>
    %39 = vector.shape_cast %38 : vector<1x4x64xbf16> to vector<4x64xbf16>
    %cst_34 = arith.constant dense<0.000000e+00> : vector<288x64xf32>
    %40 = tpu.matmul %37, %39, %cst_34 {dimension_numbers = #tpu.dot_dimension_numbers<[1], [0], [0], [1], [0, 0, 1, 1], [], []>} : vector<288x4xbf16>, vector<4x64xbf16>, vector<288x64xf32> -> vector<288x64xf32>
    %41 = arith.addf %36, %40 : vector<288x64xf32>
    %c38 = arith.constant 38 : index
    %c0_35 = arith.constant 0 : index
    %42 = vector.load %arg1[%c38, %c0_35] : memref<352x4xbf16, #tpu.memory_space<vmem>>, vector<288x4xbf16>
    %c8 = arith.constant 8 : index
    %c0_36 = arith.constant 0 : index
    %c0_37 = arith.constant 0 : index
    %43 = vector.load %arg3[%c8, %c0_36, %c0_37] : memref<9x4x64xbf16, #tpu.memory_space<vmem>>, vector<1x4x64xbf16>
    %44 = vector.shape_cast %43 : vector<1x4x64xbf16> to vector<4x64xbf16>
    %cst_38 = arith.constant dense<0.000000e+00> : vector<288x64xf32>
    %45 = tpu.matmul %42, %44, %cst_38 {dimension_numbers = #tpu.dot_dimension_numbers<[1], [0], [0], [1], [0, 0, 1, 1], [], []>} : vector<288x4xbf16>, vector<4x64xbf16>, vector<288x64xf32> -> vector<288x64xf32>
    %46 = arith.addf %41, %45 : vector<288x64xf32>
    %c0_39 = arith.constant 0 : index
    %c0_40 = arith.constant 0 : index
    %47 = vector.load %arg4[%c0_39, %c0_40] : memref<1x64xf32, #tpu.memory_space<vmem>>, vector<1x64xf32>
    %48 = vector.broadcast %47 : vector<1x64xf32> to vector<288x64xf32>
    %49 = arith.addf %46, %48 : vector<288x64xf32>
    %cst_41 = arith.constant 0.000000e+00 : f32
    %50 = vector.broadcast %cst_41 : f32 to vector<288x64xf32>
    %51 = arith.maximumf %49, %50 : vector<288x64xf32>
    %c0_42 = arith.constant 0 : index
    %c0_43 = arith.constant 0 : index
    %52 = vector.load %arg2[%c0_42, %c0_43] : memref<288x1xf32, #tpu.memory_space<vmem>>, vector<288x1xf32>
    %53 = vector.broadcast %52 : vector<288x1xf32> to vector<288x64xf32>
    %54 = arith.mulf %51, %53 : vector<288x64xf32>
    %cst_44 = arith.constant dense<0.000000e+00> : vector<64xf32>
    %55 = vector.multi_reduction <add>, %54, %cst_44 [0] : vector<288x64xf32> to vector<64xf32>
    %56 = vector.shape_cast %55 : vector<64xf32> to vector<1x64xf32>
    %57 = tpu.iota {dimensions = array<i32: 0>} : vector<4x1xi32>
    %58 = vector.broadcast %arg0 : i32 to vector<4x1xi32>
    %59 = arith.cmpi eq, %57, %58 : vector<4x1xi32>
    %c0_45 = arith.constant 0 : index
    %c0_46 = arith.constant 0 : index
    %60 = vector.load %arg18[%c0_45, %c0_46] : memref<4x64xf32, #tpu.memory_space<vmem>>, vector<4x64xf32>
    %cst_47 = arith.constant 0.000000e+00 : f32
    %61 = vector.shape_cast %59 : vector<4x1xi1> to vector<4x1xi1>
    %62 = vector.broadcast %61 : vector<4x1xi1> to vector<4x64xi1>
    %63 = vector.shape_cast %56 : vector<1x64xf32> to vector<1x64xf32>
    %64 = vector.broadcast %63 : vector<1x64xf32> to vector<4x64xf32>
    %65 = vector.broadcast %cst_47 : f32 to vector<4x64xf32>
    %66 = arith.select %62, %64, %65 : vector<4x64xi1>, vector<4x64xf32>
    %67 = arith.addf %60, %66 : vector<4x64xf32>
    %c0_48 = arith.constant 0 : index
    %c0_49 = arith.constant 0 : index
    %68 = vector.load %arg18[%c0_48, %c0_49] : memref<4x64xf32, #tpu.memory_space<vmem>>, vector<4x64xf32>
    tpu.vector_store %arg18[%c0_48, %c0_49], %67 {strides = array<i32>} : memref<4x64xf32, #tpu.memory_space<vmem>>, vector<4x64xf32>,
    %c3_i32 = arith.constant 3 : i32
    %69 = arith.cmpi eq, %arg0, %c3_i32 : i32
    %70 = arith.extui %69 : i1 to i32
    %c0_i32_50 = arith.constant 0 : i32
    %71 = arith.cmpi ne, %70, %c0_i32_50 : i32
    scf.if %71 {
      %c0_51 = arith.constant 0 : index
      %c0_52 = arith.constant 0 : index
      %72 = vector.load %arg18[%c0_51, %c0_52] : memref<4x64xf32, #tpu.memory_space<vmem>>, vector<4x64xf32>
      %73 = vector.extract_strided_slice %72 {offsets = [0, 0], sizes = [4, 32], strides = [1, 1]} : vector<4x64xf32> to vector<4x32xf32>
      %74 = vector.extract_strided_slice %72 {offsets = [0, 32], sizes = [4, 32], strides = [1, 1]} : vector<4x64xf32> to vector<4x32xf32>
      %c0_53 = arith.constant 0 : index
      %c0_54 = arith.constant 0 : index
      %75 = vector.load %arg5[%c0_53, %c0_54] : memref<32x64xf32, #tpu.memory_space<vmem>>, vector<32x64xf32>
      %cst_55 = arith.constant dense<0.000000e+00> : vector<4x64xf32>
      %76 = tpu.matmul %73, %75, %cst_55 {dimension_numbers = #tpu.dot_dimension_numbers<[1], [0], [0], [1], [0, 0, 1, 1], [], []>} : vector<4x32xf32>, vector<32x64xf32>, vector<4x64xf32> -> vector<4x64xf32>
      %c0_56 = arith.constant 0 : index
      %c0_57 = arith.constant 0 : index
      %77 = vector.load %arg7[%c0_56, %c0_57] : memref<3x64xf32, #tpu.memory_space<vmem>>, vector<1x64xf32>
      %78 = vector.broadcast %77 : vector<1x64xf32> to vector<4x64xf32>
      %79 = arith.addf %76, %78 : vector<4x64xf32>
      %80 = vector.extract_strided_slice %79 {offsets = [0, 0], sizes = [2, 64], strides = [1, 1]} : vector<4x64xf32> to vector<2x64xf32>
      %cst_58 = arith.constant dense<0.000000e+00> : vector<64xf32>
      %81 = vector.multi_reduction <add>, %80, %cst_58 [0] : vector<2x64xf32> to vector<64xf32>
      %82 = vector.shape_cast %81 : vector<64xf32> to vector<1x64xf32>
      %cst_59 = arith.constant 2.000000e+00 : f32
      %83 = vector.broadcast %cst_59 : f32 to vector<1x64xf32>
      %84 = arith.divf %82, %83 : vector<1x64xf32>
      %85 = vector.broadcast %84 : vector<1x64xf32> to vector<2x64xf32>
      %86 = arith.subf %80, %85 : vector<2x64xf32>
      %87 = arith.mulf %86, %86 : vector<2x64xf32>
      %cst_60 = arith.constant dense<0.000000e+00> : vector<64xf32>
      %88 = vector.multi_reduction <add>, %87, %cst_60 [0] : vector<2x64xf32> to vector<64xf32>
      %89 = vector.shape_cast %88 : vector<64xf32> to vector<1x64xf32>
      %cst_61 = arith.constant 2.000000e+00 : f32
      %90 = vector.broadcast %cst_61 : f32 to vector<1x64xf32>
      %91 = arith.divf %89, %90 : vector<1x64xf32>
      %cst_62 = arith.constant 9.99999974E-6 : f32
      %92 = vector.broadcast %cst_62 : f32 to vector<1x64xf32>
      %93 = arith.addf %91, %92 : vector<1x64xf32>
      %94 = math.rsqrt %93 : vector<1x64xf32>
      %95 = vector.broadcast %94 : vector<1x64xf32> to vector<2x64xf32>
      %96 = arith.mulf %86, %95 : vector<2x64xf32>
      %97 = vector.extract_strided_slice %79 {offsets = [2, 0], sizes = [2, 64], strides = [1, 1]} : vector<4x64xf32> to vector<2x64xf32>
      %cst_63 = arith.constant dense<0.000000e+00> : vector<64xf32>
      %98 = vector.multi_reduction <add>, %97, %cst_63 [0] : vector<2x64xf32> to vector<64xf32>
      %99 = vector.shape_cast %98 : vector<64xf32> to vector<1x64xf32>
      %cst_64 = arith.constant 2.000000e+00 : f32
      %100 = vector.broadcast %cst_64 : f32 to vector<1x64xf32>
      %101 = arith.divf %99, %100 : vector<1x64xf32>
      %102 = vector.broadcast %101 : vector<1x64xf32> to vector<2x64xf32>
      %103 = arith.subf %97, %102 : vector<2x64xf32>
      %104 = arith.mulf %103, %103 : vector<2x64xf32>
      %cst_65 = arith.constant dense<0.000000e+00> : vector<64xf32>
      %105 = vector.multi_reduction <add>, %104, %cst_65 [0] : vector<2x64xf32> to vector<64xf32>
      %106 = vector.shape_cast %105 : vector<64xf32> to vector<1x64xf32>
      %cst_66 = arith.constant 2.000000e+00 : f32
      %107 = vector.broadcast %cst_66 : f32 to vector<1x64xf32>
      %108 = arith.divf %106, %107 : vector<1x64xf32>
      %cst_67 = arith.constant 9.99999974E-6 : f32
      %109 = vector.broadcast %cst_67 : f32 to vector<1x64xf32>
      %110 = arith.addf %108, %109 : vector<1x64xf32>
      %111 = math.rsqrt %110 : vector<1x64xf32>
      %112 = vector.broadcast %111 : vector<1x64xf32> to vector<2x64xf32>
      %113 = arith.mulf %103, %112 : vector<2x64xf32>
      %114 = tpu.concatenate %96, %113 in 0 : vector<2x64xf32>, vector<2x64xf32> -> vector<4x64xf32>
      %c1_68 = arith.constant 1 : index
      %c0_69 = arith.constant 0 : index
      %115 = vector.load %arg7[%c1_68, %c0_69] : memref<3x64xf32, #tpu.memory_space<vmem>>, vector<1x64xf32>
      %116 = vector.broadcast %115 : vector<1x64xf32> to vector<4x64xf32>
      %117 = arith.mulf %114, %116 : vector<4x64xf32>
      %c2_70 = arith.constant 2 : index
      %c0_71 = arith.constant 0 : index
      %118 = vector.load %arg7[%c2_70, %c0_71] : memref<3x64xf32, #tpu.memory_space<vmem>>, vector<1x64xf32>
      %119 = vector.broadcast %118 : vector<1x64xf32> to vector<4x64xf32>
      %120 = arith.addf %117, %119 : vector<4x64xf32>
      %cst_72 = arith.constant 0.000000e+00 : f32
      %121 = vector.broadcast %cst_72 : f32 to vector<4x64xf32>
      %122 = arith.maximumf %120, %121 : vector<4x64xf32>
      %c0_73 = arith.constant 0 : index
      %c0_74 = arith.constant 0 : index
      %123 = vector.load %arg6[%c0_73, %c0_74] : memref<64x32xf32, #tpu.memory_space<vmem>>, vector<64x32xf32>
      %cst_75 = arith.constant dense<0.000000e+00> : vector<4x32xf32>
      %124 = tpu.matmul %122, %123, %cst_75 {dimension_numbers = #tpu.dot_dimension_numbers<[1], [0], [0], [1], [0, 0, 1, 1], [], []>} : vector<4x64xf32>, vector<64x32xf32>, vector<4x32xf32> -> vector<4x32xf32>
      %c0_76 = arith.constant 0 : index
      %c0_77 = arith.constant 0 : index
      %125 = vector.load %arg8[%c0_76, %c0_77] : memref<1x32xf32, #tpu.memory_space<vmem>>, vector<1x32xf32>
      %126 = vector.broadcast %125 : vector<1x32xf32> to vector<4x32xf32>
      %127 = arith.addf %124, %126 : vector<4x32xf32>
      %c0_78 = arith.constant 0 : index
      %c0_79 = arith.constant 0 : index
      %128 = vector.load %arg9[%c0_78, %c0_79] : memref<32x64xf32, #tpu.memory_space<vmem>>, vector<32x64xf32>
      %cst_80 = arith.constant dense<0.000000e+00> : vector<4x64xf32>
      %129 = tpu.matmul %74, %128, %cst_80 {dimension_numbers = #tpu.dot_dimension_numbers<[1], [0], [0], [1], [0, 0, 1, 1], [], []>} : vector<4x32xf32>, vector<32x64xf32>, vector<4x64xf32> -> vector<4x64xf32>
      %c0_81 = arith.constant 0 : index
      %c0_82 = arith.constant 0 : index
      %130 = vector.load %arg11[%c0_81, %c0_82] : memref<3x64xf32, #tpu.memory_space<vmem>>, vector<1x64xf32>
      %131 = vector.broadcast %130 : vector<1x64xf32> to vector<4x64xf32>
      %132 = arith.addf %129, %131 : vector<4x64xf32>
      %133 = vector.extract_strided_slice %132 {offsets = [0, 0], sizes = [2, 64], strides = [1, 1]} : vector<4x64xf32> to vector<2x64xf32>
      %cst_83 = arith.constant dense<0.000000e+00> : vector<64xf32>
      %134 = vector.multi_reduction <add>, %133, %cst_83 [0] : vector<2x64xf32> to vector<64xf32>
      %135 = vector.shape_cast %134 : vector<64xf32> to vector<1x64xf32>
      %cst_84 = arith.constant 2.000000e+00 : f32
      %136 = vector.broadcast %cst_84 : f32 to vector<1x64xf32>
      %137 = arith.divf %135, %136 : vector<1x64xf32>
      %138 = vector.broadcast %137 : vector<1x64xf32> to vector<2x64xf32>
      %139 = arith.subf %133, %138 : vector<2x64xf32>
      %140 = arith.mulf %139, %139 : vector<2x64xf32>
      %cst_85 = arith.constant dense<0.000000e+00> : vector<64xf32>
      %141 = vector.multi_reduction <add>, %140, %cst_85 [0] : vector<2x64xf32> to vector<64xf32>
      %142 = vector.shape_cast %141 : vector<64xf32> to vector<1x64xf32>
      %cst_86 = arith.constant 2.000000e+00 : f32
      %143 = vector.broadcast %cst_86 : f32 to vector<1x64xf32>
      %144 = arith.divf %142, %143 : vector<1x64xf32>
      %cst_87 = arith.constant 9.99999974E-6 : f32
      %145 = vector.broadcast %cst_87 : f32 to vector<1x64xf32>
      %146 = arith.addf %144, %145 : vector<1x64xf32>
      %147 = math.rsqrt %146 : vector<1x64xf32>
      %148 = vector.broadcast %147 : vector<1x64xf32> to vector<2x64xf32>
      %149 = arith.mulf %139, %148 : vector<2x64xf32>
      %150 = vector.extract_strided_slice %132 {offsets = [2, 0], sizes = [2, 64], strides = [1, 1]} : vector<4x64xf32> to vector<2x64xf32>
      %cst_88 = arith.constant dense<0.000000e+00> : vector<64xf32>
      %151 = vector.multi_reduction <add>, %150, %cst_88 [0] : vector<2x64xf32> to vector<64xf32>
      %152 = vector.shape_cast %151 : vector<64xf32> to vector<1x64xf32>
      %cst_89 = arith.constant 2.000000e+00 : f32
      %153 = vector.broadcast %cst_89 : f32 to vector<1x64xf32>
      %154 = arith.divf %152, %153 : vector<1x64xf32>
      %155 = vector.broadcast %154 : vector<1x64xf32> to vector<2x64xf32>
      %156 = arith.subf %150, %155 : vector<2x64xf32>
      %157 = arith.mulf %156, %156 : vector<2x64xf32>
      %cst_90 = arith.constant dense<0.000000e+00> : vector<64xf32>
      %158 = vector.multi_reduction <add>, %157, %cst_90 [0] : vector<2x64xf32> to vector<64xf32>
      %159 = vector.shape_cast %158 : vector<64xf32> to vector<1x64xf32>
      %cst_91 = arith.constant 2.000000e+00 : f32
      %160 = vector.broadcast %cst_91 : f32 to vector<1x64xf32>
      %161 = arith.divf %159, %160 : vector<1x64xf32>
      %cst_92 = arith.constant 9.99999974E-6 : f32
      %162 = vector.broadcast %cst_92 : f32 to vector<1x64xf32>
      %163 = arith.addf %161, %162 : vector<1x64xf32>
      %164 = math.rsqrt %163 : vector<1x64xf32>
      %165 = vector.broadcast %164 : vector<1x64xf32> to vector<2x64xf32>
      %166 = arith.mulf %156, %165 : vector<2x64xf32>
      %167 = tpu.concatenate %149, %166 in 0 : vector<2x64xf32>, vector<2x64xf32> -> vector<4x64xf32>
      %c1_93 = arith.constant 1 : index
      %c0_94 = arith.constant 0 : index
      %168 = vector.load %arg11[%c1_93, %c0_94] : memref<3x64xf32, #tpu.memory_space<vmem>>, vector<1x64xf32>
      %169 = vector.broadcast %168 : vector<1x64xf32> to vector<4x64xf32>
      %170 = arith.mulf %167, %169 : vector<4x64xf32>
      %c2_95 = arith.constant 2 : index
      %c0_96 = arith.constant 0 : index
      %171 = vector.load %arg11[%c2_95, %c0_96] : memref<3x64xf32, #tpu.memory_space<vmem>>, vector<1x64xf32>
      %172 = vector.broadcast %171 : vector<1x64xf32> to vector<4x64xf32>
      %173 = arith.addf %170, %172 : vector<4x64xf32>
      %cst_97 = arith.constant 0.000000e+00 : f32
      %174 = vector.broadcast %cst_97 : f32 to vector<4x64xf32>
      %175 = arith.maximumf %173, %174 : vector<4x64xf32>
      %c0_98 = arith.constant 0 : index
      %c0_99 = arith.constant 0 : index
      %176 = vector.load %arg10[%c0_98, %c0_99] : memref<64x32xf32, #tpu.memory_space<vmem>>, vector<64x32xf32>
      %cst_100 = arith.constant dense<0.000000e+00> : vector<4x32xf32>
      %177 = tpu.matmul %175, %176, %cst_100 {dimension_numbers = #tpu.dot_dimension_numbers<[1], [0], [0], [1], [0, 0, 1, 1], [], []>} : vector<4x64xf32>, vector<64x32xf32>, vector<4x32xf32> -> vector<4x32xf32>
      %c0_101 = arith.constant 0 : index
      %c0_102 = arith.constant 0 : index
      %178 = vector.load %arg12[%c0_101, %c0_102] : memref<1x32xf32, #tpu.memory_space<vmem>>, vector<1x32xf32>
      %179 = vector.broadcast %178 : vector<1x32xf32> to vector<4x32xf32>
      %180 = arith.addf %177, %179 : vector<4x32xf32>
      %181 = arith.mulf %180, %180 : vector<4x32xf32>
      %cst_103 = arith.constant dense<0.000000e+00> : vector<4xf32>
      %182 = vector.multi_reduction <add>, %181, %cst_103 [1] : vector<4x32xf32> to vector<4xf32>
      %183 = vector.shape_cast %182 : vector<4xf32> to vector<4x1xf32>
      %cst_104 = arith.constant 1.000000e-24 : f32
      %184 = vector.broadcast %cst_104 : f32 to vector<4x1xf32>
      %185 = arith.maximumf %183, %184 : vector<4x1xf32>
      %186 = math.rsqrt %185 : vector<4x1xf32>
      %187 = vector.broadcast %186 : vector<4x1xf32> to vector<4x32xf32>
      %188 = arith.mulf %180, %187 : vector<4x32xf32>
      %c0_105 = arith.constant 0 : index
      %c0_106 = arith.constant 0 : index
      %189 = vector.load %arg13[%c0_105, %c0_106] : memref<32x64xf32, #tpu.memory_space<vmem>>, vector<32x64xf32>
      %cst_107 = arith.constant dense<0.000000e+00> : vector<4x64xf32>
      %190 = tpu.matmul %127, %189, %cst_107 {dimension_numbers = #tpu.dot_dimension_numbers<[1], [0], [0], [1], [0, 0, 1, 1], [], []>} : vector<4x32xf32>, vector<32x64xf32>, vector<4x64xf32> -> vector<4x64xf32>
      %c0_108 = arith.constant 0 : index
      %c0_109 = arith.constant 0 : index
      %191 = vector.load %arg15[%c0_108, %c0_109] : memref<3x64xf32, #tpu.memory_space<vmem>>, vector<1x64xf32>
      %192 = vector.broadcast %191 : vector<1x64xf32> to vector<4x64xf32>
      %193 = arith.addf %190, %192 : vector<4x64xf32>
      %194 = vector.extract_strided_slice %193 {offsets = [0, 0], sizes = [2, 64], strides = [1, 1]} : vector<4x64xf32> to vector<2x64xf32>
      %cst_110 = arith.constant dense<0.000000e+00> : vector<64xf32>
      %195 = vector.multi_reduction <add>, %194, %cst_110 [0] : vector<2x64xf32> to vector<64xf32>
      %196 = vector.shape_cast %195 : vector<64xf32> to vector<1x64xf32>
      %cst_111 = arith.constant 2.000000e+00 : f32
      %197 = vector.broadcast %cst_111 : f32 to vector<1x64xf32>
      %198 = arith.divf %196, %197 : vector<1x64xf32>
      %199 = vector.broadcast %198 : vector<1x64xf32> to vector<2x64xf32>
      %200 = arith.subf %194, %199 : vector<2x64xf32>
      %201 = arith.mulf %200, %200 : vector<2x64xf32>
      %cst_112 = arith.constant dense<0.000000e+00> : vector<64xf32>
      %202 = vector.multi_reduction <add>, %201, %cst_112 [0] : vector<2x64xf32> to vector<64xf32>
      %203 = vector.shape_cast %202 : vector<64xf32> to vector<1x64xf32>
      %cst_113 = arith.constant 2.000000e+00 : f32
      %204 = vector.broadcast %cst_113 : f32 to vector<1x64xf32>
      %205 = arith.divf %203, %204 : vector<1x64xf32>
      %cst_114 = arith.constant 9.99999974E-6 : f32
      %206 = vector.broadcast %cst_114 : f32 to vector<1x64xf32>
      %207 = arith.addf %205, %206 : vector<1x64xf32>
      %208 = math.rsqrt %207 : vector<1x64xf32>
      %209 = vector.broadcast %208 : vector<1x64xf32> to vector<2x64xf32>
      %210 = arith.mulf %200, %209 : vector<2x64xf32>
      %211 = vector.extract_strided_slice %193 {offsets = [2, 0], sizes = [2, 64], strides = [1, 1]} : vector<4x64xf32> to vector<2x64xf32>
      %cst_115 = arith.constant dense<0.000000e+00> : vector<64xf32>
      %212 = vector.multi_reduction <add>, %211, %cst_115 [0] : vector<2x64xf32> to vector<64xf32>
      %213 = vector.shape_cast %212 : vector<64xf32> to vector<1x64xf32>
      %cst_116 = arith.constant 2.000000e+00 : f32
      %214 = vector.broadcast %cst_116 : f32 to vector<1x64xf32>
      %215 = arith.divf %213, %214 : vector<1x64xf32>
      %216 = vector.broadcast %215 : vector<1x64xf32> to vector<2x64xf32>
      %217 = arith.subf %211, %216 : vector<2x64xf32>
      %218 = arith.mulf %217, %217 : vector<2x64xf32>
      %cst_117 = arith.constant dense<0.000000e+00> : vector<64xf32>
      %219 = vector.multi_reduction <add>, %218, %cst_117 [0] : vector<2x64xf32> to vector<64xf32>
      %220 = vector.shape_cast %219 : vector<64xf32> to vector<1x64xf32>
      %cst_118 = arith.constant 2.000000e+00 : f32
      %221 = vector.broadcast %cst_118 : f32 to vector<1x64xf32>
      %222 = arith.divf %220, %221 : vector<1x64xf32>
      %cst_119 = arith.constant 9.99999974E-6 : f32
      %223 = vector.broadcast %cst_119 : f32 to vector<1x64xf32>
      %224 = arith.addf %222, %223 : vector<1x64xf32>
      %225 = math.rsqrt %224 : vector<1x64xf32>
      %226 = vector.broadcast %225 : vector<1x64xf32> to vector<2x64xf32>
      %227 = arith.mulf %217, %226 : vector<2x64xf32>
      %228 = tpu.concatenate %210, %227 in 0 : vector<2x64xf32>, vector<2x64xf32> -> vector<4x64xf32>
      %c1_120 = arith.constant 1 : index
      %c0_121 = arith.constant 0 : index
      %229 = vector.load %arg15[%c1_120, %c0_121] : memref<3x64xf32, #tpu.memory_space<vmem>>, vector<1x64xf32>
      %230 = vector.broadcast %229 : vector<1x64xf32> to vector<4x64xf32>
      %231 = arith.mulf %228, %230 : vector<4x64xf32>
      %c2_122 = arith.constant 2 : index
      %c0_123 = arith.constant 0 : index
      %232 = vector.load %arg15[%c2_122, %c0_123] : memref<3x64xf32, #tpu.memory_space<vmem>>, vector<1x64xf32>
      %233 = vector.broadcast %232 : vector<1x64xf32> to vector<4x64xf32>
      %234 = arith.addf %231, %233 : vector<4x64xf32>
      %cst_124 = arith.constant 0.000000e+00 : f32
      %235 = vector.broadcast %cst_124 : f32 to vector<4x64xf32>
      %236 = arith.maximumf %234, %235 : vector<4x64xf32>
      %c0_125 = arith.constant 0 : index
      %c0_126 = arith.constant 0 : index
      %237 = vector.load %arg14[%c0_125, %c0_126] : memref<64x32xf32, #tpu.memory_space<vmem>>, vector<64x32xf32>
      %cst_127 = arith.constant dense<0.000000e+00> : vector<4x32xf32>
      %238 = tpu.matmul %236, %237, %cst_127 {dimension_numbers = #tpu.dot_dimension_numbers<[1], [0], [0], [1], [0, 0, 1, 1], [], []>} : vector<4x64xf32>, vector<64x32xf32>, vector<4x32xf32> -> vector<4x32xf32>
      %c0_128 = arith.constant 0 : index
      %c0_129 = arith.constant 0 : index
      %239 = vector.load %arg16[%c0_128, %c0_129] : memref<1x32xf32, #tpu.memory_space<vmem>>, vector<1x32xf32>
      %240 = vector.broadcast %239 : vector<1x32xf32> to vector<4x32xf32>
      %241 = arith.addf %238, %240 : vector<4x32xf32>
      %242 = arith.mulf %241, %241 : vector<4x32xf32>
      %cst_130 = arith.constant dense<0.000000e+00> : vector<4xf32>
      %243 = vector.multi_reduction <add>, %242, %cst_130 [1] : vector<4x32xf32> to vector<4xf32>
      %244 = vector.shape_cast %243 : vector<4xf32> to vector<4x1xf32>
      %cst_131 = arith.constant 1.000000e-24 : f32
      %245 = vector.broadcast %cst_131 : f32 to vector<4x1xf32>
      %246 = arith.maximumf %244, %245 : vector<4x1xf32>
      %247 = math.rsqrt %246 : vector<4x1xf32>
      %248 = vector.broadcast %247 : vector<4x1xf32> to vector<4x32xf32>
      %249 = arith.mulf %241, %248 : vector<4x32xf32>
      %250 = vector.extract_strided_slice %249 {offsets = [0, 0], sizes = [2, 32], strides = [1, 1]} : vector<4x32xf32> to vector<2x32xf32>
      %251 = vector.extract_strided_slice %188 {offsets = [2, 0], sizes = [2, 32], strides = [1, 1]} : vector<4x32xf32> to vector<2x32xf32>
      %252 = arith.mulf %250, %251 : vector<2x32xf32>
      %253 = vector.extract_strided_slice %249 {offsets = [2, 0], sizes = [2, 32], strides = [1, 1]} : vector<4x32xf32> to vector<2x32xf32>
      %254 = vector.extract_strided_slice %188 {offsets = [0, 0], sizes = [2, 32], strides = [1, 1]} : vector<4x32xf32> to vector<2x32xf32>
      %255 = arith.mulf %253, %254 : vector<2x32xf32>
      %256 = arith.addf %252, %255 : vector<2x32xf32>
      %257 = vector.shape_cast %256 : vector<2x32xf32> to vector<1x2x32xf32>
      %cst_132 = arith.constant dense<0.000000e+00> : vector<1xf32>
      %258 = vector.multi_reduction <add>, %257, %cst_132 [1, 2] : vector<1x2x32xf32> to vector<1xf32>
      %259 = vector.shape_cast %258 : vector<1xf32> to vector<1x1x1xf32>
      %260 = vector.extract %259[0, 0, 0] : f32 from vector<1x1x1xf32>
      %cst_133 = arith.constant -1.000000e+00 : f32
      %261 = arith.mulf %cst_133, %260 : f32
      %c0_134 = arith.constant 0 : index
      %c0_135 = arith.constant 0 : index
      %262 = memref.load %arg17[%c0_134, %c0_135] : memref<1x1xf32, #tpu.memory_space<smem>>
      memref.store %261, %arg17[%c0_134, %c0_135] : memref<1x1xf32, #tpu.memory_space<smem>>
    } else {
    }
    return
  }
  func.func @transform_0(%arg0: i32) -> (i32, i32) {
    %c0_i32 = arith.constant 0 : i32
    %c0_i32_0 = arith.constant 0 : i32
    return %arg0, %c0_i32 : i32, i32
  }
  func.func @transform_1(%arg0: i32) -> (i32, i32) {
    %c0_i32 = arith.constant 0 : i32
    %c0_i32_0 = arith.constant 0 : i32
    %c0_i32_1 = arith.constant 0 : i32
    return %c0_i32, %c0_i32_0 : i32, i32
  }
  func.func @transform_2(%arg0: i32) -> (i32, i32, i32) {
    %c0_i32 = arith.constant 0 : i32
    %c0_i32_0 = arith.constant 0 : i32
    %c0_i32_1 = arith.constant 0 : i32
    %c0_i32_2 = arith.constant 0 : i32
    return %c0_i32, %c0_i32_0, %c0_i32_1 : i32, i32, i32
  }
  func.func @transform_3(%arg0: i32) -> (i32, i32) {
    %c0_i32 = arith.constant 0 : i32
    %c0_i32_0 = arith.constant 0 : i32
    %c0_i32_1 = arith.constant 0 : i32
    return %c0_i32, %c0_i32_0 : i32, i32
  }
  func.func @transform_4(%arg0: i32) -> (i32, i32) {
    %c0_i32 = arith.constant 0 : i32
    %c0_i32_0 = arith.constant 0 : i32
    %c0_i32_1 = arith.constant 0 : i32
    return %c0_i32, %c0_i32_0 : i32, i32
  }
  func.func @transform_5(%arg0: i32) -> (i32, i32) {
    %c0_i32 = arith.constant 0 : i32
    %c0_i32_0 = arith.constant 0 : i32
    %c0_i32_1 = arith.constant 0 : i32
    return %c0_i32, %c0_i32_0 : i32, i32
  }
  func.func @transform_6(%arg0: i32) -> (i32, i32) {
    %c0_i32 = arith.constant 0 : i32
    %c0_i32_0 = arith.constant 0 : i32
    %c0_i32_1 = arith.constant 0 : i32
    return %c0_i32, %c0_i32_0 : i32, i32
  }
  func.func @transform_7(%arg0: i32) -> (i32, i32) {
    %c0_i32 = arith.constant 0 : i32
    %c0_i32_0 = arith.constant 0 : i32
    %c0_i32_1 = arith.constant 0 : i32
    return %c0_i32, %c0_i32_0 : i32, i32
  }
  func.func @transform_8(%arg0: i32) -> (i32, i32) {
    %c0_i32 = arith.constant 0 : i32
    %c0_i32_0 = arith.constant 0 : i32
    %c0_i32_1 = arith.constant 0 : i32
    return %c0_i32, %c0_i32_0 : i32, i32
  }
  func.func @transform_9(%arg0: i32) -> (i32, i32) {
    %c0_i32 = arith.constant 0 : i32
    %c0_i32_0 = arith.constant 0 : i32
    %c0_i32_1 = arith.constant 0 : i32
    return %c0_i32, %c0_i32_0 : i32, i32
  }
  func.func @transform_10(%arg0: i32) -> (i32, i32) {
    %c0_i32 = arith.constant 0 : i32
    %c0_i32_0 = arith.constant 0 : i32
    %c0_i32_1 = arith.constant 0 : i32
    return %c0_i32, %c0_i32_0 : i32, i32
  }
  func.func @transform_11(%arg0: i32) -> (i32, i32) {
    %c0_i32 = arith.constant 0 : i32
    %c0_i32_0 = arith.constant 0 : i32
    %c0_i32_1 = arith.constant 0 : i32
    return %c0_i32, %c0_i32_0 : i32, i32
  }
  func.func @transform_12(%arg0: i32) -> (i32, i32) {
    %c0_i32 = arith.constant 0 : i32
    %c0_i32_0 = arith.constant 0 : i32
    %c0_i32_1 = arith.constant 0 : i32
    return %c0_i32, %c0_i32_0 : i32, i32
  }
  func.func @transform_13(%arg0: i32) -> (i32, i32) {
    %c0_i32 = arith.constant 0 : i32
    %c0_i32_0 = arith.constant 0 : i32
    %c0_i32_1 = arith.constant 0 : i32
    return %c0_i32, %c0_i32_0 : i32, i32
  }
  func.func @transform_14(%arg0: i32) -> (i32, i32) {
    %c0_i32 = arith.constant 0 : i32
    %c0_i32_0 = arith.constant 0 : i32
    %c0_i32_1 = arith.constant 0 : i32
    return %c0_i32, %c0_i32_0 : i32, i32
  }
  func.func @transform_15(%arg0: i32) -> (i32, i32) {
    %c0_i32 = arith.constant 0 : i32
    %c0_i32_0 = arith.constant 0 : i32
    %c0_i32_1 = arith.constant 0 : i32
    return %c0_i32, %c0_i32_0 : i32, i32
  }
  func.func @transform_16(%arg0: i32) -> (i32, i32) {
    %c0_i32 = arith.constant 0 : i32
    %c0_i32_0 = arith.constant 0 : i32
    %c0_i32_1 = arith.constant 0 : i32
    return %c0_i32, %c0_i32_0 : i32, i32
  }
}

</mosaic_0001>

<bundles_post_ra>
// kernel: kdcl_forward_train.1
= control target key start
LH: loop header
LB: loop body
LE: loop exit
PB: predicated region body
PF: predicated region fallthrough
CT: control target
= control target key end

     0   :  { %s7967_s0 = inlined_call_operand.vmem [shape: bf16[1408,4], index: 0, kind: input, shape index: {}]   ;;  %s7968_s1 = inlined_call_operand.vmem [shape: f32[288,1], index: 1, kind: input, shape index: {}]   ;;  %s7969_s2 = inlined_call_operand.vmem [shape: bf16[9,4,64], index: 2, kind: input, shape index: {}]   ;;  %s7970_s3 = inlined_call_operand.vmem [shape: f32[1,64], index: 3, kind: input, shape index: {}]   ;;  %s7971_s4 = inlined_call_operand.vmem [shape: f32[32,64], index: 4, kind: input, shape index: {}]   ;;  %s7972_s5 = inlined_call_operand.vmem [shape: f32[64,32], index: 5, kind: input, shape index: {}]   ;;  %s7973_s6 = inlined_call_operand.vmem [shape: f32[3,64], index: 6, kind: input, shape index: {}]   ;;  %s7974_s7 = inlined_call_operand.vmem [shape: f32[1,32], index: 7, kind: input, shape index: {}]   ;;  %s7975_s8 = inlined_call_operand.vmem [shape: f32[32,64], index: 8, kind: input, shape index: {}]   ;;  %s7976_s9 = inlined_call_operand.vmem [shape: f32[64,32], index: 9, kind: input, shape index: {}]   ;;  %s7977_s10 = inlined_call_operand.vmem [shape: f32[3,64], index: 10, kind: input, shape index: {}]   ;;  %s7978_s11 = inlined_call_operand.vmem [shape: f32[1,32], index: 11, kind: input, shape index: {}]   ;;  %s7979_s12 = inlined_call_operand.vmem [shape: f32[32,64], index: 12, kind: input, shape index: {}]   ;;  %s7980_s13 = inlined_call_operand.vmem [shape: f32[64,32], index: 13, kind: input, shape index: {}]   ;;  %s7981_s14 = inlined_call_operand.vmem [shape: f32[3,64], index: 14, kind: input, shape index: {}]   ;;  %s7982_s15 = inlined_call_operand.vmem [shape: f32[1,32], index: 15, kind: input, shape index: {}]   ;;  %s7983_s16 = inlined_call_operand.hbm [shape: f32[1,1], index: 16, kind: output, shape index: {}]  }
   0x1   :  { %7984 = sst [smem:[#allocation6_spill]] %s7967_s0 }
   0x2   :  { %21 = vsyncpa [#allocation4], 0  ;;  %s6665_s21 = smov 0  }
   0x3 LB: > { %s6671_s22 = sadd.s32 4294967295, %s6571_s21   ;;  %p5178_p0 = scmp.ge.s32.totalorder %s6571_s21, 1  ;;  %s6571_s21 = sphi %s6665_s21, %s27_s21  }
   0x4   : > { %p459_p1 = scmp.lt.s32.totalorder %s6571_s21, 5 }
   0x6   : > { %p460_p2 = pnand %p5178_p0, %p459_p1 }
   0x7   : > { %s504_s23 = smul.u32 (!%p460_p2), 44, %s6671_s22  ;;  %s7985_s27 = sld [smem:[#allocation6_spill]] (!%p460_p2) }
   0x8   : > { %463 = sbr.rel (%p460_p2) target bundleno = 1975 (0x7b7), region = 84  ;;  %p5180_p4 = scmp.ne.s32.totalorder (!%p460_p2), %s6671_s22, 0 }
   0x9   : > { %p505_p3 = scmp.lt.s32.totalorder (!%p460_p2), %s504_s23, 175 }
   0xf   : > { %s7987_s23 = smov (!%p505_p3, %s504_s23), 175  ;;  %514 = sbr.rel (%p5180_p4) target bundleno = 22 (0x16), region = 88 }
  0x10   : > { %s5179_s24 = sshll.u32 %s7987_s23, 2  ;;  %vm515_vm0 = vcmask (!%p5180_p4), 519168   ;;  %v6573_v0 = vmov (!%p5180_p4), 0.0  }
  0x11   : > { %s6679_s28 = scalar_lea.vmem %s7985_s27, %s5179_s24  ;;  %516 = vst.msk [vmem:[#allocation2] sm:$0xf] (!%p5180_p4), %vm515_vm0, %v6573_v0 }
  0x16 PF: > { %vm854_vm1 = vcmask 1041408   ;;  %v6685_v1 = vld [vmem:[%s7969_s2 + $0x8] sm:$0x3]  ;;  %v5181_v2 = vld [vmem:[%s7969_s2 + $0x2] sm:$0x3]  ;;  %vm799_vm3 = vcmask 31744  }
  0x17   : > { %v6691_v3 = vld [vmem:[%s6679_s28 + $0x8] sm:$0xff]   ;;  %6430 = vmatprep.subr.msk.bf16.mxu0 %vm854_vm1, %v6685_v1  ;;  %6426 = vmatprep.subr.msk.bf16.mxu1 %vm854_vm1, %v5181_v2  ;;  %v6698_v4 = vsel %vm854_vm1, %v6685_v1, 0  ;;  %v856_v5 = vsel %vm854_vm1, %v5181_v2, 0  ;;  %v517_v6 = vld [vmem:[%s6679_s28] sm:$0xf]  ;;  %v6713_v12 = vld [vmem:[%s6679_s28 + $0x10] sm:$0xff]  }
  0x18   : > { %v6703_v7 = vld [vmem:[%s6679_s28 + $0x4] sm:$0xf]  ;;  %5803 = vmatpush3.bf16.msra.mxu0 %v6698_v4  ;;  %5651 = vmatpush3.bf16.msra.mxu1 %v856_v5  ;;  %vm650_vm2 = vsmask.f32 7424  ;;  %v659_v9 = vshll.u32 %v6691_v3, 16  ;;  %v663_v10 = vshrl.u32 %v6691_v3, 16 }
  0x19   : > { %v6707_v8 = vcombine.low %v517_v6, %v6703_v7  ;;  %v1565_v11 = vld [vmem:[%s6679_s28 + $0x8] sm:$0xe]  ;;  %v6718_v15 = vld [vmem:[%s6679_s28 + $0xc] sm:$0xf]  ;;  %vm2010_vm4 = vsmask.f32 6400 }
  0x1a   : > { %v661_v16 = vrot.slane %v659_v9, 1  ;;  %v6721_v17 = vcombine.low %v1565_v11, %v6718_v15  ;;  %v2020_v18 = vshrl.u32 %v6713_v12, 16  ;;  %v2023_v20 = vshll.u32 %v6713_v12, 16  ;;  %v5315_v21 = vld [vmem:[%s7969_s2 + $0xa] sm:$0x3]  ;;  %v6732_v25 = vld [vmem:[%s6679_s28 + $0x10] sm:$0xff]  }
  0x1b   : > { %v652_v13 = vshrl.u32 %v6707_v8, 16  ;;  %v654_v14 = vshll.u32 %v6707_v8, 16  ;;  %6432 = vmatprep.subr.msk.bf16.mxu0 %vm854_vm1, %v5315_v21  ;;  %v6735_v29 = vld [vmem:[%s6679_s28 + $0x18] sm:$0xff]   ;;  %v667_v32 = vshll.u32 %v6732_v25, 16  ;;  %v2550_v33 = vsel %vm854_vm1, %v5315_v21, 0  ;;  %v6746_v39 = vld [vmem:[%s6679_s28 + $0x20] sm:$0xff]  }
  0x1c   : > { %v2012_v22 = vshrl.u32 %v6721_v17, 16  ;;  %v2015_v23 = vshll.u32 %v6721_v17, 16  ;;  %v2022_v24 = vrot.slane %v2020_v18, 1  ;;  %v665_v27 = vor.u32 %v663_v10, %v661_v16  ;;  %v6743_v38 = vld [vmem:[%s6679_s28 + $0x18] sm:$0xff]   ;;  %v553_v43 = vld [vmem:[%s7969_s2] sm:$0x3] }
  0x1d   : > { %v656_v19 = vrot.slane %v654_v14, 1  ;;  %v2025_v28 = vrot.slane %v2023_v20, 2  ;;  %v2029_v36 = vshrl.u32 %v6735_v29, 16  ;;  %v2032_v37 = vshll.u32 %v6735_v29, 16  ;;  %6427 = vmatprep.subr.msk.bf16.mxu1 %vm854_vm1, %v553_v43  ;;  %v6760_v52 = vld [vmem:[%s6679_s28 + $0x20] sm:$0xff]   ;;  %v6766_v57 = vld [vmem:[%s6679_s28 + $0x28] sm:$0xff]  }
  0x1e   : > { %v2014_v30 = vrot.slane %v2012_v22, 1  ;;  %v2017_v31 = vrot.slane %v2015_v23, 2  ;;  %v669_v41 = vrot.slane %v667_v32, 1  ;;  %v671_v42 = vshrl.u32 %v6732_v25, 16  ;;  %v6771_v61 = vld [vmem:[%s6679_s28 + $0x28] sm:$0xff]   ;;  %v6777_v5 = vld [vmem:[%s6679_s28 + $0x30] sm:$0xff]  }
  0x1f   : > { %v657_v26 = vor.u32 %v656_v19, %v652_v13  ;;  %v2026_v35 = vor.u32 %v2025_v28, %v2022_v24  ;;  %v2031_v44 = vrot.slane %v2029_v36, 1  ;;  %v2034_v45 = vrot.slane %v2032_v37, 2  ;;  %v6784_v13 = vld [vmem:[%s6679_s28 + $0x30] sm:$0xff]   ;;  %v6792_v24 = vld [vmem:[%s6679_s28 + $0x38] sm:$0xff]   ;;  %p5414_p5 = scmp.ne.s32.totalorder %s6671_s22, 3 }
  0x20   : > { %v2018_v40 = vor.u32 %v2017_v31, %v2014_v30  ;;  %v675_v46 = vshll.u32 %v6743_v38, 16  ;;  %v2038_v47 = vshrl.u32 %v6746_v39, 16  ;;  %v670_v49 = vsel %vm650_vm2, %v665_v27, %v669_v41  ;;  %s6578_s17 = smov (!%p5414_p5), 96  }
  0x21   : > { %v662_v34 = vsel %vm650_vm2, %v657_v26, %v661_v16  ;;  %v673_v50 = vor.u32 %v671_v42, %v669_v41  ;;  %v2041_v51 = vshll.u32 %v6746_v39, 16  ;;  %v2035_v53 = vor.u32 %v2034_v45, %v2031_v44  ;;  %v6806_v42 = vld [vmem:[%s6679_s28 + $0x40] sm:$0xff]  }
  0x22   : > { %5652 = vmatprep.mubr.msk.bf16.mxu1 %vm799_vm3, %v662_v34  ;;  %v2027_v48 = vsel %vm2010_vm4, %v2018_v40, %v2026_v35  ;;  %v677_v54 = vrot.slane %v675_v46, 1  ;;  %v2040_v55 = vrot.slane %v2038_v47, 1  ;;  %v679_v56 = vshrl.u32 %v6743_v38, 16  ;;  %v6811_v47 = vld [vmem:[%s6679_s28 + $0x40] sm:$0xff]  }
  0x23   : > { %5804 = vmatprep.mubr.msk.bf16.mxu0 %vm799_vm3, %v2027_v48  ;;  %5653 = vmatmul.mubr.msk.bf16.vlgmr.msra.gmra.mrb[0].mxu1 %vm799_vm3, %v670_v49  ;;  %v2043_v58 = vrot.slane %v2041_v51, 2  ;;  %v683_v59 = vshll.u32 %v6760_v52, 16  ;;  %v1072_v60 = vsel %vm854_vm1, %v553_v43, 0  ;;  %v2036_v62 = vsel %vm2010_vm4, %v2026_v35, %v2035_v53  ;;  %v6800_v35 = vld [vmem:[%s6679_s28 + $0x38] sm:$0xff]  }
  0x24   : > { %v678_v63 = vsel %vm650_vm2, %v673_v50, %v677_v54  ;;  %v681_v0 = vor.u32 %v679_v56, %v677_v54  ;;  %5689 = vmatpush3.bf16.msra.mxu1 %v1072_v60  ;;  %v2047_v2 = vshrl.u32 %v6766_v57, 16  ;;  %5805 = vmatmul.mubr.msk.bf16.vlgmr.msra.gmra.mrb[0].mxu0 %vm799_vm3, %v2036_v62  ;;  %v2050_v10 = vshll.u32 %v6766_v57, 16 }
  0x25   : > { %5656 = vmatprep.mubr.msk.bf16.mxu1 %vm799_vm3, %v678_v63  ;;  %v2044_v6 = vor.u32 %v2043_v58, %v2040_v55  ;;  %v685_v9 = vrot.slane %v683_v59, 1  ;;  %v687_v11 = vshrl.u32 %v6760_v52, 16  ;;  %5841 = vmatpush3.bf16.msra.mxu0 %v2550_v33  ;;  %v691_v16 = vshll.u32 %v6771_v61, 16  ;;  %v6823_v58 = vld [vmem:[%s6679_s28 + $0x48] sm:$0xff]  }
  0x26   : > { %v2049_v14 = vrot.slane %v2047_v2, 1  ;;  %v2056_v18 = vshrl.u32 %v6777_v5, 16  ;;  %v2059_v19 = vshll.u32 %v6777_v5, 16  ;;  %v2052_v22 = vrot.slane %v2050_v10, 2 }
  0x27   : > { %v2045_v20 = vsel %vm2010_vm4, %v2035_v53, %v2044_v6  ;;  %v686_v21 = vsel %vm650_vm2, %v681_v0, %v685_v9  ;;  %v689_v23 = vor.u32 %v687_v11, %v685_v9  ;;  %v693_v26 = vrot.slane %v691_v16, 1  ;;  %v6818_v53 = vld [vmem:[%s6679_s28 + $0x48] sm:$0xff]  }
  0x28   : > { %5808 = vmatprep.mubr.msk.bf16.mxu0 %vm799_vm3, %v2045_v20  ;;  %v2058_v27 = vrot.slane %v2056_v18, 1  ;;  %v2061_v28 = vrot.slane %v2059_v19, 2  ;;  %v695_v30 = vshrl.u32 %v6771_v61, 16  ;;  %v2053_v31 = vor.u32 %v2052_v22, %v2049_v14  ;;  %v6832_v14 = vld [vmem:[%s6679_s28 + $0x50] sm:$0xff]  }
  0x29   : > { %v699_v32 = vshll.u32 %v6784_v13, 16  ;;  %v2065_v33 = vshrl.u32 %v6792_v24, 16  ;;  %v2068_v34 = vshll.u32 %v6792_v24, 16  ;;  %v694_v36 = vsel %vm650_vm2, %v689_v23, %v693_v26 }
  0x2a   : > { %v2062_v37 = vor.u32 %v2061_v28, %v2058_v27  ;;  %v697_v40 = vor.u32 %v695_v30, %v693_v26  ;;  %v703_v41 = vshrl.u32 %v6784_v13, 16  ;;  %v2054_v43 = vsel %vm2010_vm4, %v2044_v6, %v2053_v31  ;;  %v6843_v30 = vld [vmem:[%s6679_s28 + $0x50] sm:$0xff]  }
  0x2b   : > { %5657 = vmatmul.mubr.msk.bf16.gmra.mrb[4].mxu1 %vm799_vm3, %v686_v21  ;;  %v701_v44 = vrot.slane %v699_v32, 1  ;;  %v2067_v45 = vrot.slane %v2065_v33, 1  ;;  %v2070_v46 = vrot.slane %v2068_v34, 2  ;;  %v707_v49 = vshll.u32 %v6800_v35, 16 }
  0x2c   : > { %5660 = vmatprep.mubr.msk.bf16.mxu1 %vm799_vm3, %v694_v36  ;;  %v2063_v48 = vsel %vm2010_vm4, %v2053_v31, %v2062_v37  ;;  %v2074_v50 = vshrl.u32 %v6806_v42, 16  ;;  %v2077_v51 = vshll.u32 %v6806_v42, 16  ;;  %5809 = vmatmul.mubr.msk.bf16.gmra.mrb[4].mxu0 %vm799_vm3, %v2054_v43  ;;  %v711_v56 = vshrl.u32 %v6800_v35, 16  ;;  %v6846_v31 = vld [vmem:[%s6679_s28 + $0x58] sm:$0xff]  }
  0x2d   : > { %v2071_v54 = vor.u32 %v2070_v46, %v2067_v45  ;;  %v705_v55 = vor.u32 %v703_v41, %v701_v44  ;;  %5812 = vmatprep.mubr.msk.bf16.mxu0 %vm799_vm3, %v2063_v48  ;;  %v709_v59 = vrot.slane %v707_v49, 1  ;;  %v715_v63 = vshll.u32 %v6811_v47, 16  ;;  %v6850_v36 = vld [vmem:[%s6679_s28 + $0x58] sm:$0xff]  }
  0x2e   : > { %v2076_v60 = vrot.slane %v2074_v50, 1  ;;  %v2079_v62 = vrot.slane %v2077_v51, 2  ;;  %v702_v0 = vsel %vm650_vm2, %v697_v40, %v701_v44  ;;  %v2083_v2 = vshrl.u32 %v6818_v53, 16  ;;  %v5335_v44 = vld [vmem:[%s7969_s2 + $0xc] sm:$0x3] }
  0x2f   : > { %v2086_v6 = vshll.u32 %v6818_v53, 16  ;;  %v710_v9 = vsel %vm650_vm2, %v705_v55, %v709_v59  ;;  %v717_v11 = vrot.slane %v715_v63, 1  ;;  %v719_v19 = vshrl.u32 %v6811_v47, 16  ;;  %6433 = vmatprep.subr.msk.bf16.mxu0 %vm854_vm1, %v5335_v44 }
  0x30   : > { %v2080_v10 = vor.u32 %v2079_v62, %v2076_v60  ;;  %v2085_v16 = vrot.slane %v2083_v2, 1  ;;  %v723_v20 = vshll.u32 %v6823_v58, 16  ;;  %v2072_v21 = vsel %vm2010_vm4, %v2062_v37, %v2071_v54  ;;  %v6869_v62 = vld [vmem:[%s6679_s28 + $0x60] sm:$0xff]  }
  0x31   : > { %v2088_v18 = vrot.slane %v2086_v6, 2  ;;  %v2092_v22 = vshrl.u32 %v6832_v14, 16  ;;  %v2095_v23 = vshll.u32 %v6832_v14, 16  ;;  %v713_v27 = vor.u32 %v711_v56, %v709_v59 }
  0x32   : > { %v2081_v26 = vsel %vm2010_vm4, %v2071_v54, %v2080_v10  ;;  %v725_v28 = vrot.slane %v723_v20, 1  ;;  %v721_v32 = vor.u32 %v719_v19, %v717_v11  ;;  %v731_v40 = vshll.u32 %v6843_v30, 16  ;;  %v2451_v54 = vld [vmem:[%s6679_s28 + $0x8] sm:$0xc] }
  0x33   : > { %5661 = vmatmul.mubr.msk.bf16.gmra.mrb[8].mxu1 %vm799_vm3, %v702_v0  ;;  %v2094_v33 = vrot.slane %v2092_v22, 1  ;;  %v2097_v34 = vrot.slane %v2095_v23, 2  ;;  %v2089_v37 = vor.u32 %v2088_v18, %v2085_v16  ;;  %v2101_v41 = vshrl.u32 %v6846_v31, 16 }
  0x34   : > { %5664 = vmatprep.mubr.msk.bf16.mxu1 %vm799_vm3, %v710_v9  ;;  %5813 = vmatmul.mubr.msk.bf16.gmra.mrb[8].mxu0 %vm799_vm3, %v2072_v21  ;;  %v2104_v43 = vshll.u32 %v6846_v31, 16  ;;  %v718_v45 = vsel %vm650_vm2, %v713_v27, %v717_v11  ;;  %v727_v48 = vshrl.u32 %v6823_v58, 16  ;;  %v726_v49 = vsel %vm650_vm2, %v721_v32, %v725_v28  ;;  %v6875_v11 = vld [vmem:[%s6679_s28 + $0x68] sm:$0xff]  }
  0x35   : > { %5816 = vmatprep.mubr.msk.bf16.mxu0 %vm799_vm3, %v2081_v26  ;;  %v2098_v46 = vor.u32 %v2097_v34, %v2094_v33  ;;  %v735_v50 = vshrl.u32 %v6843_v30, 16  ;;  %v739_v51 = vshll.u32 %v6850_v36, 16  ;;  %v2090_v55 = vsel %vm2010_vm4, %v2080_v10, %v2089_v37  ;;  %v6891_v26 = vld [vmem:[%s7969_s2 + $0x4] sm:$0x3] }
  0x36   : > { %v733_v56 = vrot.slane %v731_v40, 1  ;;  %v2103_v59 = vrot.slane %v2101_v41, 1  ;;  %v2106_v60 = vrot.slane %v2104_v43, 2  ;;  %v729_v0 = vor.u32 %v727_v48, %v725_v28  ;;  %v6897_v28 = vld [vmem:[%s6679_s28 + $0x70] sm:$0xff]   ;;  %6428 = vmatprep.subr.msk.bf16.mxu1 %vm854_vm1, %v6891_v26  ;;  %v6904_v40 = vld [vmem:[%s6679_s28 + $0x78] sm:$0xff]  }
  0x37   : > { %v2099_v63 = vsel %vm2010_vm4, %v2089_v37, %v2098_v46  ;;  %v5316_v2 = vcombine.low %v2451_v54, %v6718_v15  ;;  %v741_v9 = vrot.slane %v739_v51, 1  ;;  %v747_v16 = vshll.u32 %v6869_v62, 16 }
  0x38   : > { %v737_v6 = vor.u32 %v735_v50, %v733_v56  ;;  %v6879_v10 = vor.u32 %v2106_v60, %v2103_v59  ;;  %v734_v18 = vsel %vm650_vm2, %v729_v0, %v733_v56  ;;  %v2459_v20 = vrot.slane %v6713_v12, 2  ;;  %v6925_v0 = vld [vmem:[%s6679_s28 + $0x88] sm:$0xff]  }
  0x39   : > { %v2458_v19 = vrot.slane %v5316_v2, 2  ;;  %v743_v15 = vshrl.u32 %v6850_v36, 16  ;;  %vm2457_vm5 = vcmask 1045504   ;;  %v751_v22 = vshrl.u32 %v6869_v62, 16  ;;  %v6931_v2 = vld [vmem:[%s7969_s2 + $0xe] sm:$0x3] }
  0x3a   : > { %v742_v21 = vsel %vm650_vm2, %v737_v6, %v741_v9  ;;  %v755_v23 = vshll.u32 %v6875_v11, 16  ;;  %v2108_v12 = vsel %vm2010_vm4, %v2098_v46, %v6879_v10  ;;  %v749_v27 = vrot.slane %v747_v16, 1 }
  0x3b   : > { %5665 = vmatmul.mubr.msk.bf16.gmra.mrb[12].mxu1 %vm799_vm3, %v718_v45  ;;  %v2460_v32 = vsel %vm2457_vm5, %v2458_v19, %v2459_v20  ;;  %v745_v33 = vor.u32 %v743_v15, %v741_v9  ;;  %v2461_v41 = vrot.slane %v6735_v29, 2  ;;  %v763_v43 = vshll.u32 %v6897_v28, 16 }
  0x3c   : > { %5668 = vmatprep.mubr.msk.bf16.mxu1 %vm799_vm3, %v726_v49  ;;  %5817 = vmatmul.mubr.msk.bf16.gmra.mrb[12].mxu0 %vm799_vm3, %v2090_v55  ;;  %v753_v34 = vor.u32 %v751_v22, %v749_v27  ;;  %v757_v37 = vrot.slane %v755_v23, 1  ;;  %v2463_v46 = vrot.slane %v6746_v39, 2  ;;  %v759_v48 = vshrl.u32 %v6875_v11, 16  ;;  %v6919_v55 = vld [vmem:[%s6679_s28 + $0x80] sm:$0xff]  }
  0x3d   : > { %5820 = vmatprep.mubr.msk.bf16.mxu0 %vm799_vm3, %v2099_v63  ;;  %v750_v45 = vsel %vm650_vm2, %v745_v33, %v749_v27  ;;  %v767_v50 = vshrl.u32 %v6897_v28, 16  ;;  %v771_v51 = vshll.u32 %v6904_v40, 16  ;;  %v2462_v54 = vsel %vm2457_vm5, %v2459_v20, %v2461_v41 }
  0x3e   : > { %v758_v49 = vsel %vm650_vm2, %v753_v34, %v757_v37  ;;  %v765_v29 = vrot.slane %v763_v43, 1  ;;  %v2989_v56 = vsel %vm854_vm1, %v5335_v44, 0  ;;  %v2464_v39 = vsel %vm2457_vm5, %v2461_v41, %v2463_v46 }
  0x3f   : > { %v761_v59 = vor.u32 %v759_v48, %v757_v37  ;;  %v773_v63 = vrot.slane %v771_v51, 1  ;;  %v2465_v44 = vrot.slane %v6766_v57, 2  ;;  %v779_v6 = vshll.u32 %v6919_v55, 16 }
  0x40   : > { %v769_v60 = vor.u32 %v767_v50, %v765_v29  ;;  %v2467_v16 = vrot.slane %v6777_v5, 2  ;;  %v783_v20 = vshrl.u32 %v6919_v55, 16  ;;  %v787_v15 = vshll.u32 %v6925_v0, 16 }
  0x41   : > { %v766_v9 = vsel %vm650_vm2, %v761_v59, %v765_v29  ;;  %v2466_v57 = vsel %vm2457_vm5, %v2463_v46, %v2465_v44  ;;  %v781_v22 = vrot.slane %v779_v6, 1  ;;  %v2471_v34 = vrot.slane %v6806_v42, 2  ;;  %v6974_v29 = vld [vmem:[%s6679_s28 + $0x60] sm:$0xff]   ;;  %v6991_v59 = vld [vmem:[%s6679_s28 + $0x68] sm:$0xff]   ;;  %v7009_v6 = vld [vmem:[%s6679_s28 + $0x78] sm:$0xff]  }
  0x42   : > { %v774_v19 = vsel %vm650_vm2, %v769_v60, %v773_v63  ;;  %v2468_v5 = vsel %vm2457_vm5, %v2465_v44, %v2467_v16  ;;  %v789_v27 = vrot.slane %v787_v15, 1  ;;  %v791_v37 = vshrl.u32 %v6925_v0, 16  ;;  %v7025_v15 = vld [vmem:[%s6679_s28 + $0x88] sm:$0xff]  }
  0x43   : > { %5669 = vmatmul.mubr.msk.bf16.gmra.mrb[16].mxu1 %vm799_vm3, %v734_v18  ;;  %v775_v18 = vshrl.u32 %v6904_v40, 16  ;;  %v2473_v42 = vrot.slane %v6818_v53, 2  ;;  %v2475_v50 = vrot.slane %v6832_v14, 2  ;;  %v2477_v53 = vrot.slane %v6846_v31, 2 }
  0x44   : > { %5672 = vmatprep.mubr.msk.bf16.mxu1 %vm799_vm3, %v742_v21  ;;  %5821 = vmatmul.mubr.msk.bf16.gmra.mrb[16].mxu0 %vm799_vm3, %v2108_v12  ;;  %v6945_v21 = vld [vmem:[%s6679_s28 + $0x90] ss:$0 sps:$4 sm:$0x11]   ;;  %v785_v12 = vor.u32 %v783_v20, %v781_v22  ;;  %v2479_v14 = vrot.slane %v6974_v29, 2  ;;  %v2481_v60 = vrot.slane %v6991_v59, 2  ;;  %vm1257_vm6 = vcmask 1046528  }
  0x45   : > { %5842 = vmatprep.mubr.msk.bf16.mxu0 %vm799_vm3, %v2460_v32  ;;  %v777_v23 = vor.u32 %v775_v18, %v773_v63  ;;  %v2469_v32 = vrot.slane %v6792_v24, 2  ;;  %v795_v41 = vshll.u32 %v6945_v21, 16  ;;  %v793_v24 = vor.u32 %v791_v37, %v789_v27 }
  0x46   : > { %v790_v43 = vsel %vm650_vm2, %v785_v12, %v789_v27  ;;  %v2474_v51 = vsel %vm2457_vm5, %v2471_v34, %v2473_v42  ;;  %v2480_v31 = vsel %vm2457_vm5, %v2477_v53, %v2479_v14  ;;  %v2482_v44 = vsel %vm2457_vm5, %v2479_v14, %v2481_v60  ;;  %v2765_v12 = vld [vmem:[%s6679_s28 + $0x10] sm:$0xc]  ;;  %v7039_v27 = vld [vmem:[%s6679_s28 + $0x14] sm:$0xf] }
  0x47   : > { %v782_v33 = vsel %vm650_vm2, %v777_v23, %v781_v22  ;;  %v2472_v46 = vsel %vm2457_vm5, %v2469_v32, %v2471_v34  ;;  %v797_v48 = vrot.slane %v795_v41, 1  ;;  %v2485_v18 = vrot.slane %v7009_v6, 2  ;;  %v7031_v22 = vld [vmem:[%s6679_s28 + $0x90] sm:$0xff]   ;;  %v7054_v41 = vld [vmem:[%s6679_s28 + $0x18] sm:$0xff]  }
  0x48   : > { %v2491_v23 = vrot.slane %v7031_v22, 2  ;;  %v7051_v37 = vcombine.low %v2765_v12, %v7039_v27  ;;  %v3436_v14 = vsel %vm854_vm1, %v6931_v2, 0  ;;  %v7124_v12 = vld [vmem:[%s6679_s28 + $0x50] sm:$0xff]   ;;  %vm3210_vm7 = vsmask.f32 5376 }
  0x49   : > { %vm3657_vm8 = vcmask 1044480   ;;  %vm4296_vm9 = vcmask 523264   ;;  %vm4383_vm11 = vcmask 519168   ;;  %vm6576_vm12 = vmmov (!%p5414_p5), 0  }
  0x4a   : > { %vm4399_vm13 = vcmask (!%p5414_p5), 261120   ;;  %vm4473_vm14 = vcmask (!%p5414_p5), 517120   ;;  %vm4859_vm15 = vcmask (!%p5414_p5), 257024   ;;  %vm5116_vm0 = vcmask (!%p5414_p5), 254976  }
  0x4b   : > { %5673 = vmatmul.mubr.msk.bf16.gmra.mrb[20].mxu1 %vm799_vm3, %v750_v45  ;;  %v2470_v45 = vsel %vm2457_vm5, %v2467_v16, %v2469_v32  ;;  %v7015_v16 = vld [vmem:[%s6679_s28 + $0x80] sm:$0xff]  }
  0x4c   : > { %5676 = vmatprep.mubr.msk.bf16.mxu1 %vm799_vm3, %v758_v49  ;;  %5843 = vmatmul.mubr.msk.bf16.vlgmr.msra.gmra.mrb[0].mxu0 %vm799_vm3, %v2462_v54  ;;  %v798_v49 = vsel %vm650_vm2, %v793_v24, %v797_v48  ;;  %v2476_v54 = vsel %vm2457_vm5, %v2473_v42, %v2475_v50  ;;  %v7065_v48 = vld [vmem:[%s6679_s28 + $0x20] sm:$0xff]  }
  0x4d   : > { %5879 = vmatpush3.bf16.msra.mxu0 %v2989_v56  ;;  %5846 = vmatprep.mubr.msk.bf16.mxu0 %vm799_vm3, %v2464_v39  ;;  %v1350_v56 = vsel %vm854_vm1, %v6891_v26, 0  ;;  %v2478_v39 = vsel %vm2457_vm5, %v2475_v50, %v2477_v53  ;;  %v6997_v26 = vld [vmem:[%s6679_s28 + $0x70] sm:$0xff]   ;;  %v2900_v50 = vrot.slane %v7065_v48, 2 }
  0x4e   : > { %6434 = vmatprep.subr.msk.bf16.mxu0 %vm854_vm1, %v6931_v2  ;;  %v2483_v63 = vrot.slane %v6997_v26, 2  ;;  %v7081_v53 = vld [vmem:[%s6679_s28 + $0x30] sm:$0xff]  }
  0x4f   : > { %v2904_v2 = vrot.slane %v7081_v53, 2 }
  0x50   : > { %v2486_v20 = vsel %vm2457_vm5, %v2483_v63, %v2485_v18 }
  0x53   : > { %5677 = vmatmul.mubr.msk.bf16.gmra.mrb[24].mxu1 %vm799_vm3, %v766_v9  ;;  %v2484_v9 = vsel %vm2457_vm5, %v2481_v60, %v2483_v63 }
  0x54   : > { %5680 = vmatprep.mubr.msk.bf16.mxu1 %vm799_vm3, %v774_v19  ;;  %5847 = vmatmul.mubr.msk.bf16.gmra.mrb[4].mxu0 %vm799_vm3, %v2466_v57  ;;  %v2487_v19 = vrot.slane %v7015_v16, 2 }
  0x55   : > { %5850 = vmatprep.mubr.msk.bf16.mxu0 %vm799_vm3, %v2468_v5  ;;  %v2489_v5 = vrot.slane %v7025_v15, 2 }
  0x56   : > { %v2488_v57 = vsel %vm2457_vm5, %v2485_v18, %v2487_v19  ;;  %v7112_v18 = vld [vmem:[%s6679_s28 + $0x48] sm:$0xff]  }
  0x57   : > { %v2490_v32 = vsel %vm2457_vm5, %v2487_v19, %v2489_v5  ;;  %v2492_v34 = vsel %vm2457_vm5, %v2489_v5, %v2491_v23  ;;  %v1251_v19 = vld [vmem:[%s6679_s28] sm:$0xe] }
  0x58   : > { %v5238_v5 = vcombine.low %v1251_v19, %v6703_v7  ;;  %v2912_v7 = vrot.slane %v7124_v12, 2 }
  0x5b   : > { %5681 = vmatmul.mubr.msk.bf16.gmra.mrb[28].mxu1 %vm799_vm3, %v782_v33  ;;  %v7045_v33 = vld [vmem:[%s6679_s28 + $0x98] ss:$0 sps:$4 sm:$0x33]  }
  0x5c   : > { %5684 = vmatprep.mubr.msk.bf16.mxu1 %vm799_vm3, %v790_v43  ;;  %5851 = vmatmul.mubr.msk.bf16.gmra.mrb[8].mxu0 %vm799_vm3, %v2470_v45  ;;  %v2493_v43 = vrot.slane %v7045_v33, 2  ;;  %v2897_v45 = vrot.slane %v7051_v37, 2 }
  0x5d   : > { %5854 = vmatprep.mubr.msk.bf16.mxu0 %vm799_vm3, %v2472_v46  ;;  %v2898_v46 = vrot.slane %v7054_v41, 2 }
  0x5e   : > { %v2494_v24 = vsel %vm2457_vm5, %v2491_v23, %v2493_v43  ;;  %v1258_v43 = vrot.slane %v5238_v5, 1  ;;  %v1267_v5 = vrot.slane %v6771_v61, 1 }
  0x5f   : > { %v2899_v42 = vsel %vm2457_vm5, %v2897_v45, %v2898_v46  ;;  %v1259_v45 = vrot.slane %v6691_v3, 1 }
  0x63   : > { %5685 = vmatmul.mubr.msk.bf16.gmra.mrb[32].mxu1 %vm799_vm3, %v798_v49  ;;  %v7071_v49 = vld [vmem:[%s6679_s28 + $0x28] sm:$0xff]  }
  0x64   : > { %5690 = vmatprep.mubr.msk.bf16.mxu1 %vm799_vm3, %v6707_v8  ;;  %5855 = vmatmul.mubr.msk.bf16.gmra.mrb[12].mxu0 %vm799_vm3, %v2474_v51  ;;  %v6985_v8 = vld [vmem:[%s7969_s2 + $0x6] sm:$0x3]  ;;  %v2902_v51 = vrot.slane %v7071_v49, 2 }
  0x65   : > { %5858 = vmatprep.mubr.msk.bf16.mxu0 %vm799_vm3, %v2476_v54  ;;  %v2901_v54 = vsel %vm2457_vm5, %v2898_v46, %v2900_v50 }
  0x66   : > { %v2905_v63 = vsel %vm2457_vm5, %v2902_v51, %v2904_v2 }
  0x6b   : > { %5691 = vmatmul.mubr.msk.bf16.vlgmr.msra.gmra.mrb[0].mxu1 %vm799_vm3, %v6691_v3 }
  0x6c   : > { %5694 = vmatprep.mubr.msk.bf16.mxu1 %vm799_vm3, %v6732_v25  ;;  %5727 = vmatpush3.bf16.msra.mxu1 %v1350_v56  ;;  %v2903_v56 = vsel %vm2457_vm5, %v2900_v50, %v2902_v51  ;;  %v7142_v50 = vld [vmem:[%s6679_s28 + $0x60] sm:$0xff]   ;;  %v1261_v51 = vrot.slane %v6732_v25, 1  ;;  %v1789_v25 = vsel %vm854_vm1, %v6985_v8, 0 }
  0x6d   : > { %6429 = vmatprep.subr.msk.bf16.mxu1 %vm854_vm1, %v6985_v8  ;;  %5859 = vmatmul.mubr.msk.bf16.gmra.mrb[16].mxu0 %vm799_vm3, %v2478_v39  ;;  %v7089_v39 = vld [vmem:[%s6679_s28 + $0x38] sm:$0xff]   ;;  %v4044_v8 = vld [vmem:[%s7968_s1] sm:$0xff] }
  0x6e   : > { %5862 = vmatprep.mubr.msk.bf16.mxu0 %vm799_vm3, %v2480_v31  ;;  %v7094_v31 = vld [vmem:[%s7969_s2 + $0x10] sm:$0x3]  ;;  %v2906_v60 = vrot.slane %v7089_v39, 2 }
  0x73   : > { %5695 = vmatmul.mubr.msk.bf16.gmra.mrb[4].mxu1 %vm799_vm3, %v6743_v38 }
  0x74   : > { %5698 = vmatprep.mubr.msk.bf16.mxu1 %vm799_vm3, %v6760_v52 }
  0x75   : > { %5863 = vmatmul.mubr.msk.bf16.gmra.mrb[20].mxu0 %vm799_vm3, %v2482_v44  ;;  %v7106_v44 = vld [vmem:[%s6679_s28 + $0x40] sm:$0xff]  }
  0x76   : > { %5866 = vmatprep.mubr.msk.bf16.mxu0 %vm799_vm3, %v2484_v9  ;;  %v2907_v9 = vsel %vm2457_vm5, %v2904_v2, %v2906_v60  ;;  %v1262_v2 = vsel %vm1257_vm6, %v1259_v45, %v1261_v51 }
  0x7b   : > { %5699 = vmatmul.mubr.msk.bf16.gmra.mrb[8].mxu1 %vm799_vm3, %v6771_v61 }
  0x7c   : > { %5702 = vmatprep.mubr.msk.bf16.mxu1 %vm799_vm3, %v6784_v13 }
  0x7d   : > { %5867 = vmatmul.mubr.msk.bf16.gmra.mrb[24].mxu0 %vm799_vm3, %v2486_v20  ;;  %v2908_v20 = vrot.slane %v7106_v44, 2 }
  0x7e   : > { %5870 = vmatprep.mubr.msk.bf16.mxu0 %vm799_vm3, %v2488_v57  ;;  %v2910_v57 = vrot.slane %v7112_v18, 2 }
  0x7f   : > { %v2909_v23 = vsel %vm2457_vm5, %v2906_v60, %v2908_v20 }
  0x83   : > { %5703 = vmatmul.mubr.msk.bf16.gmra.mrb[12].mxu1 %vm799_vm3, %v6800_v35 }
  0x84   : > { %5706 = vmatprep.mubr.msk.bf16.mxu1 %vm799_vm3, %v6811_v47 }
  0x85   : > { %5871 = vmatmul.mubr.msk.bf16.gmra.mrb[28].mxu0 %vm799_vm3, %v2490_v32  ;;  %v2911_v32 = vsel %vm2457_vm5, %v2908_v20, %v2910_v57  ;;  %v1265_v20 = vrot.slane %v6760_v52, 1 }
  0x86   : > { %5874 = vmatprep.mubr.msk.bf16.mxu0 %vm799_vm3, %v2492_v34  ;;  %v7130_v34 = vld [vmem:[%s6679_s28 + $0x58] sm:$0xff]  }
  0x87   : > { %v2914_v46 = vrot.slane %v7130_v34, 2 }
  0x89   : > { %v2915_v3 = vsel %vm2457_vm5, %v2912_v7, %v2914_v46 }
  0x8b   : > { %5707 = vmatmul.mubr.msk.bf16.gmra.mrb[16].mxu1 %vm799_vm3, %v6823_v58 }
  0x8c   : > { %5710 = vmatprep.mubr.msk.bf16.mxu1 %vm799_vm3, %v6843_v30 }
  0x8d   : > { %5875 = vmatmul.mubr.msk.bf16.gmra.mrb[32].mxu0 %vm799_vm3, %v2494_v24  ;;  %v1260_v24 = vsel %vm1257_vm6, %v1258_v43, %v1259_v45  ;;  %v7185_v45 = vld [vmem:[%s6679_s28 + $0x80] sm:$0xff]  }
  0x8e   : > { %5880 = vmatprep.mubr.msk.bf16.mxu0 %vm799_vm3, %v2899_v42  ;;  %v2913_v42 = vsel %vm2457_vm5, %v2910_v57, %v2912_v7  ;;  %v7168_v57 = vld [vmem:[%s6679_s28 + $0x78] sm:$0xff]  }
  0x8f   : > { %v2922_v61 = vrot.slane %v7168_v57, 2 }
  0x93   : > { %5711 = vmatmul.mubr.msk.bf16.gmra.mrb[20].mxu1 %vm799_vm3, %v6850_v36 }
  0x94   : > { %5714 = vmatprep.mubr.msk.bf16.mxu1 %vm799_vm3, %v6869_v62 }
  0x95   : > { %5881 = vmatmul.mubr.msk.bf16.vlgmr.msra.gmra.mrb[0].mxu0 %vm799_vm3, %v2901_v54  ;;  %v7148_v54 = vld [vmem:[%s6679_s28 + $0x68] sm:$0xff]  }
  0x96   : > { %5917 = vmatpush3.bf16.msra.mxu0 %v3436_v14  ;;  %5884 = vmatprep.mubr.msk.bf16.mxu0 %vm799_vm3, %v2903_v56  ;;  %v1263_v14 = vrot.slane %v6743_v38, 1  ;;  %v2916_v56 = vrot.slane %v7142_v50, 2  ;;  %v2918_v60 = vrot.slane %v7148_v54, 2  ;;  %v7162_v38 = vld [vmem:[%s6679_s28 + $0x70] sm:$0xff]  }
  0x97   : > { %6435 = vmatprep.subr.msk.bf16.mxu0 %vm854_vm1, %v7094_v31  ;;  %v2920_v52 = vrot.slane %v7162_v38, 2 }
  0x98   : > { %v2919_v19 = vsel %vm2457_vm5, %v2916_v56, %v2918_v60 }
  0x99   : > { %v2921_v43 = vsel %vm2457_vm5, %v2918_v60, %v2920_v52  ;;  %v2923_v7 = vsel %vm2457_vm5, %v2920_v52, %v2922_v61  ;;  %v4048_v60 = vld [vmem:[%s7968_s1 + $0x20] sm:$0xff] }
  0x9b   : > { %5715 = vmatmul.mubr.msk.bf16.gmra.mrb[24].mxu1 %vm799_vm3, %v6875_v11 }
  0x9c   : > { %5718 = vmatprep.mubr.msk.bf16.mxu1 %vm799_vm3, %v6897_v28 }
  0x9d   : > { %5885 = vmatmul.mubr.msk.bf16.gmra.mrb[4].mxu0 %vm799_vm3, %v2905_v63  ;;  %v1264_v63 = vsel %vm1257_vm6, %v1261_v51, %v1263_v14  ;;  %v4045_v51 = vld [vmem:[%s7968_s1 + $0x8] sm:$0xff] }
  0x9e   : > { %5888 = vmatprep.mubr.msk.bf16.mxu0 %vm799_vm3, %v2907_v9  ;;  %v2917_v9 = vsel %vm2457_vm5, %v2914_v46, %v2916_v56  ;;  %v1269_v46 = vrot.slane %v6784_v13, 1  ;;  %v2924_v13 = vrot.slane %v7185_v45, 2  ;;  %v4047_v56 = vld [vmem:[%s7968_s1 + $0x18] sm:$0xff] }
  0xa3   : > { %5719 = vmatmul.mubr.msk.bf16.gmra.mrb[28].mxu1 %vm799_vm3, %v6904_v40 }
  0xa4   : > { %5722 = vmatprep.mubr.msk.bf16.mxu1 %vm799_vm3, %v6919_v55 }
  0xa5   : > { %5889 = vmatmul.mubr.msk.bf16.gmra.mrb[8].mxu0 %vm799_vm3, %v2909_v23  ;;  %v6574_v23 = vmov 0  }
  0xa6   : > { %5892 = vmatprep.mubr.msk.bf16.mxu0 %vm799_vm3, %v2911_v32  ;;  %6459 = vset.pattern.permute.xlu0 %v6574_v23  ;;  %v1266_v32 = vsel %vm1257_vm6, %v1263_v14, %v1265_v20  ;;  %v1270_v14 = vsel %vm1257_vm6, %v1267_v5, %v1269_v46 }
  0xa7   : > { %4082 = vperm.xlu0 %6459, %v4044_v8   ;;  %6460 = vset.pattern.permute.xlu1 %v6574_v23  ;;  %v4049_v8 = vld [vmem:[%s7968_s1 + $0x28] sm:$0xff] }
  0xab   : > { %5723 = vmatmul.mubr.msk.bf16.gmra.mrb[32].mxu1 %vm799_vm3, %v6925_v0  ;;  %4087 = vperm.xlu0 %6459, %v4045_v51   ;;  %v1277_v51 = vrot.slane %v6843_v30, 1  ;;  %v4054_v30 = vld [vmem:[%s7968_s1 + $0x50] sm:$0xff] }
  0xac   : > { %5728 = vmatprep.mubr.msk.bf16.mxu1 %vm799_vm3, %v1260_v24  ;;  %v7191_v24 = vld [vmem:[%s6679_s28 + $0x88] sm:$0xff]  }
  0xad   : > { %5893 = vmatmul.mubr.msk.bf16.gmra.mrb[12].mxu0 %vm799_vm3, %v2913_v42  ;;  %v1271_v42 = vrot.slane %v6800_v35, 1  ;;  %v2926_v35 = vrot.slane %v7191_v24, 2 }
  0xae   : > { %5896 = vmatprep.mubr.msk.bf16.mxu0 %vm799_vm3, %v2915_v3  ;;  %v4046_v3 = vld [vmem:[%s7968_s1 + $0x10] sm:$0xff] }
  0xaf   : > { %4092 = vperm.xlu1 %6460, %v4046_v3   ;;  %4102 = vperm.xlu0 %6459, %v4048_v60  }
  0xb3   : > { %5729 = vmatmul.mubr.msk.bf16.vlgmr.msra.gmra.mrb[0].mxu1 %vm799_vm3, %v1262_v2  ;;  %v1272_v2 = vsel %vm1257_vm6, %v1269_v46, %v1271_v42  ;;  %4097 = vperm.xlu1 %6460, %v4047_v56  }
  0xb4   : > { %5732 = vmatprep.mubr.msk.bf16.mxu1 %vm799_vm3, %v1264_v63  ;;  %5765 = vmatpush3.bf16.msra.mxu1 %v1789_v25  ;;  %v2925_v63 = vsel %vm2457_vm5, %v2922_v61, %v2924_v13  ;;  %v1273_v25 = vrot.slane %v6811_v47, 1  ;;  %v4050_v47 = vld [vmem:[%s7968_s1 + $0x30] sm:$0xff]  ;;  %v3215_v61 = vshll.u32 %v7051_v37, 16 }
  0xb5   : > { %6431 = vmatprep.subr.msk.bf16.mxu1 %vm854_vm1, %v6685_v1  ;;  %5897 = vmatmul.mubr.msk.bf16.gmra.mrb[16].mxu0 %vm799_vm3, %v2917_v9  ;;  %v1268_v1 = vsel %vm1257_vm6, %v1265_v20, %v1267_v5  ;;  %v7216_v9 = vld [vmem:[%s6679_s28 + $0x90] sm:$0xff]   ;;  %v2927_v20 = vsel %vm2457_vm5, %v2924_v13, %v2926_v35  ;;  %v1275_v5 = vrot.slane %v6823_v58, 1  ;;  %v3212_v58 = vshrl.u32 %v7051_v37, 16  ;;  %v6519_v13 = vld [vmem:[%s6679_s28 + $0xa0] ss:$0 sps:$4 sm:$0x33]  }
  0xb6   : > { %5900 = vmatprep.mubr.msk.bf16.mxu0 %vm799_vm3, %v2919_v19  ;;  %v7219_v19 = vld [vmem:[%s6679_s28 + $0x98] sm:$0xff]   ;;  %v1274_v52 = vsel %vm1257_vm6, %v1271_v42, %v1273_v25  ;;  %v2928_v23 = vrot.slane %v7216_v9, 2  ;;  %4112 = vperm.xlu0 %6459, %v4050_v47   ;;  %v4052_v42 = vld [vmem:[%s7968_s1 + $0x40] sm:$0xff]  ;;  %v3217_v56 = vrot.slane %v3215_v61, 3  ;;  %v3232_v47 = vshll.u32 %v7065_v48, 16 }
  0xb7   : > { %4107 = vperm.xlu1 %6460, %v4049_v8   ;;  %v1276_v46 = vsel %vm1257_vm6, %v1273_v25, %v1275_v5  ;;  %v1278_v25 = vsel %vm1257_vm6, %v1275_v5, %v1277_v51  ;;  %v3229_v8 = vshrl.u32 %v7065_v48, 16  ;;  %v4055_v61 = vld [vmem:[%s7968_s1 + $0x58] sm:$0xff]  ;;  %v4056_v5 = vld [vmem:[%s7968_s1 + $0x60] sm:$0xff] }
  0xb8   : > { %v2929_v3 = vsel %vm2457_vm5, %v2926_v35, %v2928_v23  ;;  %v4053_v35 = vld [vmem:[%s7968_s1 + $0x48] sm:$0xff] }
  0xba   : > { %4122 = vperm.xlu0 %6459, %v4052_v42  }
  0xbb   : > { %5733 = vmatmul.mubr.msk.bf16.gmra.mrb[4].mxu1 %vm799_vm3, %v1266_v32  ;;  %v2930_v32 = vrot.slane %v7219_v19, 2 }
  0xbc   : > { %5736 = vmatprep.mubr.msk.bf16.mxu1 %vm799_vm3, %v1268_v1  ;;  %v3220_v1 = vshrl.u32 %v7054_v41, 16 }
  0xbd   : > { %5901 = vmatmul.mubr.msk.bf16.gmra.mrb[20].mxu0 %vm799_vm3, %v2921_v43  ;;  %v3223_v43 = vshll.u32 %v7054_v41, 16  ;;  %v2931_v37 = vsel %vm2457_vm5, %v2928_v23, %v2930_v32  ;;  %v3238_v23 = vshrl.u32 %v7071_v49, 16 }
  0xbe   : > { %5904 = vmatprep.mubr.msk.bf16.mxu0 %vm799_vm3, %v2923_v7  ;;  %v4051_v7 = vld [vmem:[%s7968_s1 + $0x38] sm:$0xff]  ;;  %4132 = vperm.xlu0 %6459, %v4054_v30   ;;  %v3259_v30 = vshll.u32 %v7089_v39, 16 }
  0xbf   : > { %4117 = vperm.xlu1 %6460, %v4051_v7   ;;  %v3225_v60 = vrot.slane %v3223_v43, 3  ;;  %v3231_v7 = vrot.slane %v3229_v8, 2  ;;  %v4060_v8 = vld [vmem:[%s7968_s1 + $0x80] sm:$0xff] }
  0xc2   : > { %4142 = vperm.xlu0 %6459, %v4056_v5   ;;  %v3261_v5 = vrot.slane %v3259_v30, 3 }
  0xc3   : > { %5737 = vmatmul.mubr.msk.bf16.gmra.mrb[8].mxu1 %vm799_vm3, %v1270_v14  ;;  %v3214_v14 = vrot.slane %v3212_v58, 2  ;;  %4127 = vperm.xlu1 %6460, %v4053_v35   ;;  %v3241_v58 = vshll.u32 %v7071_v49, 16  ;;  %v3256_v35 = vshrl.u32 %v7089_v39, 16 }
  0xc4   : > { %5740 = vmatprep.mubr.msk.bf16.mxu1 %vm799_vm3, %v1272_v2  ;;  %v3222_v2 = vrot.slane %v3220_v1, 2 }
  0xc5   : > { %5905 = vmatmul.mubr.msk.bf16.gmra.mrb[24].mxu0 %vm799_vm3, %v2925_v63  ;;  %v1279_v63 = vrot.slane %v6850_v36, 1  ;;  %v3218_v36 = vor.u32 %v3217_v56, %v3214_v14  ;;  %v4058_v14 = vld [vmem:[%s7968_s1 + $0x70] sm:$0xff] }
  0xc6   : > { %5908 = vmatprep.mubr.msk.bf16.mxu0 %vm799_vm3, %v2927_v20  ;;  %v2932_v20 = vrot.slane %v6519_v13, 2  ;;  %v1283_v13 = vrot.slane %v6875_v11, 1  ;;  %4152 = vperm.xlu0 %6459, %v4058_v14   ;;  %v4064_v14 = vld [vmem:[%s7968_s1 + $0xa0] sm:$0xff] }
  0xc7   : > { %v1280_v1 = vsel %vm1257_vm6, %v1277_v51, %v1279_v63  ;;  %4137 = vperm.xlu1 %6460, %v4055_v61   ;;  %v3243_v51 = vrot.slane %v3241_v58, 3  ;;  %v1285_v61 = vrot.slane %v6897_v28, 1  ;;  %v3265_v28 = vshrl.u32 %v7106_v44, 16 }
  0xc8   : > { %v2933_v43 = vsel %vm2457_vm5, %v2930_v32, %v2932_v20  ;;  %v4057_v32 = vld [vmem:[%s7968_s1 + $0x68] sm:$0xff] }
  0xca   : > { %4162 = vperm.xlu0 %6459, %v4060_v8  }
  0xcb   : > { %5741 = vmatmul.mubr.msk.bf16.gmra.mrb[12].mxu1 %vm799_vm3, %v1274_v52  ;;  %v3226_v52 = vor.u32 %v3225_v60, %v3222_v2  ;;  %v3250_v2 = vshll.u32 %v7081_v53, 16  ;;  %4147 = vperm.xlu1 %6460, %v4057_v32   ;;  %v4063_v32 = vld [vmem:[%s7968_s1 + $0x98] sm:$0xff] }
  0xcc   : > { %5744 = vmatprep.mubr.msk.bf16.mxu1 %vm799_vm3, %v1276_v46  ;;  %v3234_v46 = vrot.slane %v3232_v47, 3  ;;  %v3750_v47 = vsel %vm854_vm1, %v7094_v31, 0  ;;  %v4061_v31 = vld [vmem:[%s7968_s1 + $0x88] sm:$0xff] }
  0xcd   : > { %5909 = vmatmul.mubr.msk.bf16.gmra.mrb[28].mxu0 %vm799_vm3, %v2929_v3  ;;  %v3227_v42 = vsel %vm3210_vm7, %v3218_v36, %v3226_v52  ;;  %v1281_v3 = vrot.slane %v6869_v62, 1  ;;  %v3247_v62 = vshrl.u32 %v7081_v53, 16 }
  0xce   : > { %5912 = vmatprep.mubr.msk.bf16.mxu0 %vm799_vm3, %v2931_v37  ;;  %v3240_v37 = vrot.slane %v3238_v23, 2  ;;  %v3235_v56 = vor.u32 %v3234_v46, %v3231_v7  ;;  %v3252_v23 = vrot.slane %v3250_v2, 3  ;;  %v3268_v46 = vshll.u32 %v7106_v44, 16 }
  0xcf   : > { %v1282_v11 = vsel %vm1257_vm6, %v1279_v63, %v1281_v3  ;;  %v1284_v20 = vsel %vm1257_vm6, %v1281_v3, %v1283_v13  ;;  %v3249_v36 = vrot.slane %v3247_v62, 2  ;;  %v3274_v3 = vshrl.u32 %v7112_v18, 16 }
  0xd0   : > { %v3244_v60 = vor.u32 %v3243_v51, %v3240_v37  ;;  %v3236_v63 = vsel %vm3210_vm7, %v3226_v52, %v3235_v56  ;;  %v4062_v52 = vld [vmem:[%s7968_s1 + $0x90] sm:$0xff]  ;;  %v3277_v37 = vshll.u32 %v7112_v18, 16  ;;  %v3270_v62 = vrot.slane %v3268_v46, 3 }
  0xd1   : > { %v3253_v7 = vor.u32 %v3252_v23, %v3249_v36  ;;  %4172 = vperm.xlu0 %6459, %v4062_v52   ;;  %v3292_v36 = vshrl.u32 %v7130_v34, 16  ;;  %v3295_v23 = vshll.u32 %v7130_v34, 16 }
  0xd2   : > { %v3245_v58 = vsel %vm3210_vm7, %v3235_v56, %v3244_v60  ;;  %v3267_v56 = vrot.slane %v3265_v28, 2  ;;  %v3279_v30 = vrot.slane %v3277_v37, 3 }
  0xd3   : > { %5745 = vmatmul.mubr.msk.bf16.gmra.mrb[16].mxu1 %vm799_vm3, %v1278_v25  ;;  %v4059_v25 = vld [vmem:[%s7968_s1 + $0x78] sm:$0xff]  ;;  %v3294_v28 = vrot.slane %v3292_v36, 2  ;;  %v3297_v46 = vrot.slane %v3295_v23, 3  ;;  %v6525_v36 = vld [vmem:[%s6679_s28 + $0x20] sm:$0xff]  }
  0xd4   : > { %5748 = vmatprep.mubr.msk.bf16.mxu1 %vm799_vm3, %v1280_v1  ;;  %4157 = vperm.xlu1 %6460, %v4059_v25   ;;  %v3258_v1 = vrot.slane %v3256_v35, 2  ;;  %v3276_v35 = vrot.slane %v3274_v3, 2  ;;  %v1291_v25 = vrot.slane %v6925_v0, 1  ;;  %v3271_v8 = vor.u32 %v3270_v62, %v3267_v56  ;;  %v6523_v3 = vld [vmem:[%s6679_s28 + $0x10] sm:$0xff]  }
  0xd5   : > { %5913 = vmatmul.mubr.msk.bf16.gmra.mrb[32].mxu0 %vm799_vm3, %v2933_v43  ;;  %v1287_v43 = vrot.slane %v6904_v40, 1  ;;  %v1286_v40 = vsel %vm1257_vm6, %v1283_v13, %v1285_v61  ;;  %v3254_v13 = vsel %vm3210_vm7, %v3244_v60, %v3253_v7  ;;  %4182 = vperm.xlu0 %6459, %v4064_v14   ;;  %v4065_v60 = vld [vmem:[%s7968_s1 + $0xa8] sm:$0xff]  ;;  %v1698_v37 = vrot.slane %v6523_v3, 1 }
  0xd6   : > { %5918 = vmatprep.mubr.msk.bf16.mxu0 %vm799_vm3, %v3227_v42  ;;  %v3262_v42 = vor.u32 %v3261_v5, %v3258_v1  ;;  %v4068_v1 = vld [vmem:[%s7968_s1 + $0xc0] sm:$0xff]  ;;  %v3310_v56 = vshrl.u32 %v7148_v54, 16  ;;  %v3313_v62 = vshll.u32 %v7148_v54, 16  ;;  %v1702_v23 = vrot.slane %v6525_v36, 1 }
  0xd7   : > { %v1288_v51 = vsel %vm1257_vm6, %v1285_v61, %v1287_v43  ;;  %v4067_v61 = vld [vmem:[%s7968_s1 + $0xb8] sm:$0xff] }
  0xd8   : > { %4167 = vperm.xlu1 %6460, %v4061_v31   ;;  %v3263_v2 = vsel %vm3210_vm7, %v3253_v7, %v3262_v42  ;;  %v3272_v5 = vsel %vm3210_vm7, %v3262_v42, %v3271_v8  ;;  %v1293_v7 = vrot.slane %v6945_v21, 1  ;;  %v4069_v42 = vld [vmem:[%s7968_s1 + $0xc8] sm:$0xff] }
  0xda   : > { %v1294_v14 = vsel %vm1257_vm6, %v1291_v25, %v1293_v7  ;;  %v3331_v7 = vshll.u32 %v7168_v57, 16 }
  0xdb   : > { %5749 = vmatmul.mubr.msk.bf16.gmra.mrb[20].mxu1 %vm799_vm3, %v1282_v11  ;;  %v1289_v11 = vrot.slane %v6919_v55, 1  ;;  %v3283_v55 = vshrl.u32 %v7124_v12, 16 }
  0xdc   : > { %5752 = vmatprep.mubr.msk.bf16.mxu1 %vm799_vm3, %v1284_v20  ;;  %4177 = vperm.xlu1 %6460, %v4063_v32   ;;  %v4066_v20 = vld [vmem:[%s7968_s1 + $0xb0] sm:$0xff]  ;;  %v3301_v32 = vshrl.u32 %v7142_v50, 16 }
  0xdd   : > { %5919 = vmatmul.mubr.msk.bf16.vlgmr.msra.gmra.mrb[0].mxu0 %vm799_vm3, %v3236_v63  ;;  %v3286_v63 = vshll.u32 %v7124_v12, 16  ;;  %v1290_v0 = vsel %vm1257_vm6, %v1287_v43, %v1289_v11  ;;  %4192 = vperm.xlu0 %6459, %v4066_v20   ;;  %v3285_v43 = vrot.slane %v3283_v55, 2 }
  0xde   : > { %5955 = vmatpush3.bf16.msra.mxu0 %v3750_v47  ;;  %5922 = vmatprep.mubr.msk.bf16.mxu0 %vm799_vm3, %v3245_v58  ;;  %v3280_v47 = vor.u32 %v3279_v30, %v3276_v35  ;;  %v1292_v58 = vsel %vm1257_vm6, %v1289_v11, %v1291_v25  ;;  %v4071_v11 = vld [vmem:[%s7968_s1 + $0xd8] sm:$0xff]  ;;  %v4072_v35 = vld [vmem:[%s7968_s1 + $0xe0] sm:$0xff]  ;;  %v3303_v25 = vrot.slane %v3301_v32, 2 }
  0xdf   : > { %v3288_v31 = vrot.slane %v3286_v63, 3  ;;  %v3312_v63 = vrot.slane %v3310_v56, 2  ;;  %v6527_v56 = vld [vmem:[%s6679_s28 + $0x30] sm:$0xff]  }
  0xe0   : > { %4187 = vperm.xlu1 %6460, %v4065_v60   ;;  %v3281_v52 = vsel %vm3210_vm7, %v3271_v8, %v3280_v47  ;;  %v6524_v8 = vld [vmem:[%s6679_s28 + $0x18] sm:$0xff]  }
  0xe1   : > { %4202 = vperm.xlu0 %6459, %v4068_v1   ;;  %v3289_v21 = vor.u32 %v3288_v31, %v3285_v43  ;;  %v1700_v55 = vrot.slane %v6524_v8, 1  ;;  %v3319_v1 = vshrl.u32 %v7162_v38, 16 }
  0xe3   : > { %5753 = vmatmul.mubr.msk.bf16.gmra.mrb[24].mxu1 %vm799_vm3, %v1286_v40  ;;  %v1697_v40 = vrot.slane %v6721_v17, 1  ;;  %v3304_v17 = vshll.u32 %v7142_v50, 16  ;;  %v3290_v30 = vsel %vm3210_vm7, %v3280_v47, %v3289_v21  ;;  %v4074_v47 = vld [vmem:[%s7968_s1 + $0xf0] sm:$0xff]  ;;  %v1701_v43 = vsel %vm1257_vm6, %v1698_v37, %v1700_v55 }
  0xe4   : > { %5756 = vmatprep.mubr.msk.bf16.mxu1 %vm799_vm3, %v1288_v51  ;;  %4197 = vperm.xlu1 %6460, %v4067_v61   ;;  %v4070_v51 = vld [vmem:[%s7968_s1 + $0xd0] sm:$0xff] }
  0xe5   : > { %5923 = vmatmul.mubr.msk.bf16.gmra.mrb[4].mxu0 %vm799_vm3, %v3254_v13  ;;  %v3298_v13 = vor.u32 %v3297_v46, %v3294_v28  ;;  %4212 = vperm.xlu0 %6459, %v4070_v51   ;;  %v3306_v60 = vrot.slane %v3304_v17, 3  ;;  %v1703_v28 = vsel %vm1257_vm6, %v1700_v55, %v1702_v23  ;;  %v4075_v46 = vld [vmem:[%s7968_s1 + $0xf8] sm:$0xff] }
  0xe6   : > { %5926 = vmatprep.mubr.msk.bf16.mxu0 %vm799_vm3, %v3263_v2  ;;  %v1699_v2 = vsel %vm1257_vm6, %v1697_v40, %v1698_v37  ;;  %v4076_v40 = vld [vmem:[%s7968_s1 + $0x100] sm:$0xff]  ;;  %v3321_v37 = vrot.slane %v3319_v1, 2  ;;  %v4079_v55 = vld [vmem:[%s7968_s1 + $0x118] sm:$0xff] }
  0xe7   : > { %v3299_v20 = vsel %vm3210_vm7, %v3289_v21, %v3298_v13  ;;  %v3307_v61 = vor.u32 %v3306_v60, %v3303_v25  ;;  %v6526_v21 = vld [vmem:[%s6679_s28 + $0x28] sm:$0xff]   ;;  %v3346_v60 = vshrl.u32 %v7191_v24, 16 }
  0xe8   : > { %4207 = vperm.xlu1 %6460, %v4069_v42   ;;  %v1704_v32 = vrot.slane %v6526_v21, 1 }
  0xe9   : > { %4222 = vperm.xlu0 %6459, %v4072_v35   ;;  %v3308_v3 = vsel %vm3210_vm7, %v3298_v13, %v3307_v61  ;;  %v4077_v13 = vld [vmem:[%s7968_s1 + $0x108] sm:$0xff]  ;;  %v3340_v35 = vshll.u32 %v7185_v45, 16 }
  0xeb   : > { %5757 = vmatmul.mubr.msk.bf16.gmra.mrb[28].mxu1 %vm799_vm3, %v1290_v0  ;;  %v3315_v0 = vrot.slane %v3313_v62, 3  ;;  %v1706_v62 = vrot.slane %v6527_v56, 1  ;;  %v3342_v36 = vrot.slane %v3340_v35, 3 }
  0xec   : > { %5760 = vmatprep.mubr.msk.bf16.mxu1 %vm799_vm3, %v1292_v58  ;;  %4217 = vperm.xlu1 %6460, %v4071_v11   ;;  %v4073_v58 = vld [vmem:[%s7968_s1 + $0xe8] sm:$0xff] }
  0xed   : > { %5927 = vmatmul.mubr.msk.bf16.gmra.mrb[8].mxu0 %vm799_vm3, %v3272_v5  ;;  %v3322_v5 = vshll.u32 %v7162_v38, 16  ;;  %v3316_v31 = vor.u32 %v3315_v0, %v3312_v63  ;;  %4232 = vperm.xlu0 %6459, %v4074_v47   ;;  %v1707_v8 = vsel %vm1257_vm6, %v1704_v32, %v1706_v62 }
  0xee   : > { %5930 = vmatprep.mubr.msk.bf16.mxu0 %vm799_vm3, %v3281_v52  ;;  %v3328_v52 = vshrl.u32 %v7168_v57, 16 }
  0xef   : > { %v3324_v42 = vrot.slane %v3322_v5, 3  ;;  %v3317_v51 = vsel %vm3210_vm7, %v3307_v61, %v3316_v31  ;;  %v3348_v61 = vrot.slane %v3346_v60, 2  ;;  %v6529_v5 = vld [vmem:[%s6679_s28 + $0x40] sm:$0xff]  }
  0xf0   : > { %4227 = vperm.xlu1 %6460, %v4073_v58   ;;  %v3330_v17 = vrot.slane %v3328_v52, 2  ;;  %v6528_v58 = vld [vmem:[%s6679_s28 + $0x38] sm:$0xff]   ;;  %v3355_v52 = vshrl.u32 %v7216_v9, 16 }
  0xf1   : > { %4242 = vperm.xlu0 %6459, %v4076_v40   ;;  %v3325_v11 = vor.u32 %v3324_v42, %v3321_v37  ;;  %v1708_v47 = vrot.slane %v6528_v58, 1  ;;  %v3364_v40 = vshrl.u32 %v7219_v19, 16 }
  0xf3   : > { %5761 = vmatmul.mubr.msk.bf16.gmra.mrb[32].mxu1 %vm799_vm3, %v1294_v14  ;;  %v3333_v14 = vrot.slane %v3331_v7, 3  ;;  %v3326_v63 = vsel %vm3210_vm7, %v3316_v31, %v3325_v11  ;;  %v3358_v7 = vshll.u32 %v7216_v9, 16 }
  0xf4   : > { %5766 = vmatprep.mubr.msk.bf16.mxu1 %vm799_vm3, %v1699_v2  ;;  %4237 = vperm.xlu1 %6460, %v4075_v46   ;;  %v4078_v2 = vld [vmem:[%s7968_s1 + $0x110] sm:$0xff] }
  0xf5   : > { %5931 = vmatmul.mubr.msk.bf16.gmra.mrb[12].mxu0 %vm799_vm3, %v3290_v30  ;;  %v1705_v30 = vsel %vm1257_vm6, %v1702_v23, %v1704_v32  ;;  %v3334_v25 = vor.u32 %v3333_v14, %v3330_v17  ;;  %4252 = vperm.xlu0 %6459, %v4078_v2   ;;  %v3360_v21 = vrot.slane %v3358_v7, 3  ;;  %v7447_v32 = vld [vmem:[%s6679_s28 + $0xa0] ss:$0 sps:$4 sm:$0x77]   ;;  %v6530_v14 = vld [vmem:[%s6679_s28 + $0x48] sm:$0xff]   ;;  %v6531_v2 = vld [vmem:[%s6679_s28 + $0x50] sm:$0xff]  }
  0xf6   : > { %5934 = vmatprep.mubr.msk.bf16.mxu0 %vm799_vm3, %v3299_v20  ;;  %v3349_v20 = vshll.u32 %v7191_v24, 16  ;;  %v1712_v56 = vrot.slane %v6530_v14, 1  ;;  %v3373_v35 = vshrl.u32 %v7447_v32, 16  ;;  %v3667_v14 = vrot.slane %v7089_v39, 3 }
  0xf7   : > { %v3335_v23 = vsel %vm3210_vm7, %v3325_v11, %v3334_v25  ;;  %v1714_v11 = vrot.slane %v6531_v2, 1  ;;  %v1728_v2 = vrot.slane %v7025_v15, 1  ;;  %v3669_v39 = vrot.slane %v7106_v44, 3 }
  0xf8   : > { %4247 = vperm.xlu1 %6460, %v4077_v13   ;;  %v3351_v1 = vrot.slane %v3349_v20, 3  ;;  %v2119_v44 = vshrl.u32 %v6991_v59, 16 }
  0xf9   : > { %v1715_v20 = vsel %vm1257_vm6, %v1712_v56, %v1714_v11 }
  0xfa   : > { %v3352_v46 = vor.u32 %v3351_v1, %v3348_v61  ;;  %v1718_v61 = vrot.slane %v6974_v29, 1 }
  0xfb   : > { %5767 = vmatmul.mubr.msk.bf16.vlgmr.msra.gmra.mrb[0].mxu1 %vm799_vm3, %v1701_v43  ;;  %v1710_v43 = vrot.slane %v6529_v5, 1 }
  0xfc   : > { %5770 = vmatprep.mubr.msk.bf16.mxu1 %vm799_vm3, %v1703_v28  ;;  %6137 = vmatpush3.bf16.msra.mxu1 %v6698_v4  ;;  %v3337_v4 = vshrl.u32 %v7185_v45, 16  ;;  %v1709_v28 = vsel %vm1257_vm6, %v1706_v62, %v1708_v47  ;;  %v3366_v62 = vrot.slane %v3364_v40, 2 }
  0xfd   : > { %5935 = vmatmul.mubr.msk.bf16.gmra.mrb[16].mxu0 %vm799_vm3, %v3308_v3  ;;  %4257 = vperm.xlu1 %6460, %v4079_v55   ;;  %v3367_v3 = vshll.u32 %v7219_v19, 16  ;;  %v1711_v37 = vsel %vm1257_vm6, %v1708_v47, %v1710_v43 }
  0xfe   : > { %5938 = vmatprep.mubr.msk.bf16.mxu0 %vm799_vm3, %v3317_v51  ;;  %v3339_v0 = vrot.slane %v3337_v4, 2  ;;  %v3357_v51 = vrot.slane %v3355_v52, 2 }
  0xff   : > { %v3369_v13 = vrot.slane %v3367_v3, 3  ;;  %v3663_v3 = vrot.slane %v7071_v49, 3 }
 0x100   : > { %v3343_v31 = vor.u32 %v3342_v36, %v3339_v0  ;;  %v3361_v4 = vor.u32 %v3360_v21, %v3357_v51  ;;  %v1724_v21 = vrot.slane %v7009_v6, 1 }
 0x101   : > { %v3370_v60 = vor.u32 %v3369_v13, %v3366_v62 }
 0x102   : > { %v3344_v42 = vsel %vm3210_vm7, %v3334_v25, %v3343_v31  ;;  %v3353_v17 = vsel %vm3210_vm7, %v3343_v31, %v3352_v46  ;;  %v1713_v25 = vsel %vm1257_vm6, %v1710_v43, %v1712_v56  ;;  %v3362_v55 = vsel %vm3210_vm7, %v3352_v46, %v3361_v4 }
 0x103   : > { %5771 = vmatmul.mubr.msk.bf16.gmra.mrb[4].mxu1 %vm799_vm3, %v1705_v30  ;;  %v3376_v30 = vshll.u32 %v7447_v32, 16  ;;  %v3371_v36 = vsel %vm3210_vm7, %v3361_v4, %v3370_v60  ;;  %v3659_v31 = vrot.slane %v7054_v41, 3  ;;  %v1722_v46 = vrot.slane %v6997_v26, 1 }
 0x104   : > { %5774 = vmatprep.mubr.msk.bf16.mxu1 %vm799_vm3, %v1707_v8  ;;  %v3651_v8 = vld [vmem:[%s6679_s28 + $0x10] sm:$0x8]  ;;  %v3661_v41 = vrot.slane %v7065_v48, 3  ;;  %v3665_v48 = vrot.slane %v7081_v53, 3  ;;  %v2110_v53 = vshrl.u32 %v6974_v29, 16  ;;  %v2113_v4 = vshll.u32 %v6974_v29, 16 }
 0x105   : > { %5939 = vmatmul.mubr.msk.bf16.gmra.mrb[20].mxu0 %vm799_vm3, %v3326_v63  ;;  %v3375_v63 = vrot.slane %v3373_v35, 2  ;;  %v3378_v0 = vrot.slane %v3376_v30, 3  ;;  %v5394_v47 = vcombine.low %v3651_v8, %v7039_v27  ;;  %v1725_v49 = vsel %vm1257_vm6, %v1722_v46, %v1724_v21 }
 0x106   : > { %5942 = vmatprep.mubr.msk.bf16.mxu0 %vm799_vm3, %v3335_v23  ;;  %v6532_v23 = vld [vmem:[%s6679_s28 + $0x58] sm:$0xff]   ;;  %v3664_v51 = vsel %vm3657_vm8, %v3661_v41, %v3663_v3  ;;  %v3666_v62 = vsel %vm3657_vm8, %v3663_v3, %v3665_v48  ;;  %v3668_v13 = vsel %vm3657_vm8, %v3665_v48, %v3667_v14  ;;  %v3671_v30 = vrot.slane %v7112_v18, 3 }
 0x107   : > { %v1716_v58 = vrot.slane %v6532_v23, 1  ;;  %v3379_v1 = vor.u32 %v3378_v0, %v3375_v63  ;;  %v3658_v43 = vrot.slane %v5394_v47, 3  ;;  %v2115_v8 = vrot.slane %v2113_v4, 2 }
 0x108   : > { %v3672_v29 = vsel %vm3657_vm8, %v3669_v39, %v3671_v30  ;;  %v2122_v0 = vshll.u32 %v6991_v59, 16  ;;  %v2128_v18 = vshrl.u32 %v6997_v26, 16  ;;  %v2131_v23 = vshll.u32 %v6997_v26, 16 }
 0x109   : > { %v1717_v5 = vsel %vm1257_vm6, %v1714_v11, %v1716_v58  ;;  %v1719_v52 = vsel %vm1257_vm6, %v1716_v58, %v1718_v61  ;;  %v3380_v7 = vsel %vm3210_vm7, %v3370_v60, %v3379_v1  ;;  %v3660_v27 = vsel %vm3657_vm8, %v3658_v43, %v3659_v31 }
 0x10a   : > { %v1730_v11 = vrot.slane %v7031_v22, 1  ;;  %v3673_v58 = vrot.slane %v7124_v12, 3  ;;  %v2121_v1 = vrot.slane %v2119_v44, 1  ;;  %v2130_v43 = vrot.slane %v2128_v18, 1 }
 0x10b   : > { %5775 = vmatmul.mubr.msk.bf16.gmra.mrb[8].mxu1 %vm799_vm3, %v1709_v28  ;;  %v1720_v28 = vrot.slane %v6991_v59, 1  ;;  %v2158_v48 = vshll.u32 %v7025_v15, 16 }
 0x10c   : > { %5778 = vmatprep.mubr.msk.bf16.mxu1 %vm799_vm3, %v1711_v37  ;;  %v1731_v60 = vsel %vm1257_vm6, %v1728_v2, %v1730_v11  ;;  %v3674_v26 = vsel %vm3657_vm8, %v3671_v30, %v3673_v58  ;;  %v2176_v30 = vshll.u32 %v7045_v33, 16 }
 0x10d   : > { %5943 = vmatmul.mubr.msk.bf16.gmra.mrb[24].mxu0 %vm799_vm3, %v3344_v42  ;;  %v1721_v40 = vsel %vm1257_vm6, %v1718_v61, %v1720_v28  ;;  %v1723_v37 = vsel %vm1257_vm6, %v1720_v28, %v1722_v46  ;;  %v3662_v42 = vsel %vm3657_vm8, %v3659_v31, %v3661_v41  ;;  %v3675_v61 = vrot.slane %v7130_v34, 3 }
 0x10e   : > { %5946 = vmatprep.mubr.msk.bf16.mxu0 %vm799_vm3, %v3353_v17  ;;  %v1726_v17 = vrot.slane %v7015_v16, 1  ;;  %v2133_v31 = vrot.slane %v2131_v23, 2  ;;  %v2140_v34 = vshll.u32 %v7009_v6, 16  ;;  %v2146_v28 = vshrl.u32 %v7015_v16, 16 }
 0x10f   : > { %v3677_v46 = vrot.slane %v7142_v50, 3  ;;  %v2155_v50 = vshrl.u32 %v7025_v15, 16  ;;  %v3693_v23 = vrot.slane %v7447_v32, 3 }
 0x110   : > { %v1727_v56 = vsel %vm1257_vm6, %v1724_v21, %v1726_v17  ;;  %v1729_v35 = vsel %vm1257_vm6, %v1726_v17, %v1728_v2 }
 0x111   : > { %v2157_v2 = vrot.slane %v2155_v50, 1 }
 0x113   : > { %5779 = vmatmul.mubr.msk.bf16.gmra.mrb[12].mxu1 %vm799_vm3, %v1713_v25  ;;  %v6522_v25 = vld [vmem:[%s6679_s28 + $0x98] ss:$0 sps:$4 sm:$0x11]  }
 0x114   : > { %5782 = vmatprep.mubr.msk.bf16.mxu1 %vm799_vm3, %v1715_v20  ;;  %v2112_v20 = vrot.slane %v2110_v53, 1  ;;  %v1732_v63 = vrot.slane %v6522_v25, 1  ;;  %v3685_v25 = vrot.slane %v7185_v45, 3  ;;  %v3689_v45 = vrot.slane %v7216_v9, 3 }
 0x115   : > { %5947 = vmatmul.mubr.msk.bf16.gmra.mrb[28].mxu0 %vm799_vm3, %v3362_v55  ;;  %v3670_v55 = vsel %vm3657_vm8, %v3667_v14, %v3669_v39  ;;  %v2167_v14 = vshll.u32 %v7031_v22, 16 }
 0x116   : > { %5950 = vmatprep.mubr.msk.bf16.mxu0 %vm799_vm3, %v3371_v36  ;;  %v2116_v36 = vor.u32 %v2115_v8, %v2112_v20  ;;  %v1733_v47 = vsel %vm1257_vm6, %v1730_v11, %v1732_v63  ;;  %v2160_v11 = vrot.slane %v2158_v48, 2  ;;  %v3687_v20 = vrot.slane %v7191_v24, 3 }
 0x117   : > { %v2169_v4 = vrot.slane %v2167_v14, 2 }
 0x118   : > { %v2117_v59 = vsel %vm2010_vm4, %v6879_v10, %v2116_v36  ;;  %v2149_v10 = vshll.u32 %v7015_v16, 16  ;;  %v3678_v16 = vsel %vm3657_vm8, %v3675_v61, %v3677_v46 }
 0x11b   : > { %5783 = vmatmul.mubr.msk.bf16.gmra.mrb[16].mxu1 %vm799_vm3, %v1717_v5  ;;  %v2124_v5 = vrot.slane %v2122_v0, 2  ;;  %v3691_v0 = vrot.slane %v7219_v19, 3 }
 0x11c   : > { %5786 = vmatprep.mubr.msk.bf16.mxu1 %vm799_vm3, %v1719_v52  ;;  %v3676_v52 = vsel %vm3657_vm8, %v3673_v58, %v3675_v61 }
 0x11d   : > { %5951 = vmatmul.mubr.msk.bf16.gmra.mrb[32].mxu0 %vm799_vm3, %v3380_v7  ;;  %v2125_v12 = vor.u32 %v2124_v5, %v2121_v1  ;;  %v2137_v7 = vshrl.u32 %v7009_v6, 16  ;;  %v2148_v6 = vrot.slane %v2146_v28, 1  ;;  %v3692_v18 = vsel %vm3657_vm8, %v3689_v45, %v3691_v0 }
 0x11e   : > { %5956 = vmatprep.mubr.msk.bf16.mxu0 %vm799_vm3, %v3660_v27  ;;  %v2134_v27 = vor.u32 %v2133_v31, %v2130_v43  ;;  %v3694_v58 = vsel %vm3657_vm8, %v3691_v0, %v3693_v23 }
 0x11f   : > { %v2126_v41 = vsel %vm2010_vm4, %v2116_v36, %v2125_v12  ;;  %v2139_v3 = vrot.slane %v2137_v7, 1  ;;  %v3690_v36 = vsel %vm3657_vm8, %v3687_v20, %v3689_v45 }
 0x123   : > { %5787 = vmatmul.mubr.msk.bf16.gmra.mrb[20].mxu1 %vm799_vm3, %v1721_v40  ;;  %v3679_v40 = vrot.slane %v7148_v54, 3 }
 0x124   : > { %5790 = vmatprep.mubr.msk.bf16.mxu1 %vm799_vm3, %v1723_v37  ;;  %v2142_v37 = vrot.slane %v2140_v34, 2 }
 0x125   : > { %5957 = vmatmul.mubr.msk.bf16.vlgmr.msra.gmra.mrb[0].mxu0 %vm799_vm3, %v3662_v42  ;;  %v2135_v42 = vsel %vm2010_vm4, %v2125_v12, %v2134_v27  ;;  %v3680_v21 = vsel %vm3657_vm8, %v3677_v46, %v3679_v40 }
 0x126   : > { %5960 = vmatprep.mubr.msk.bf16.mxu0 %vm799_vm3, %v3664_v51  ;;  %v2151_v51 = vrot.slane %v2149_v10, 2  ;;  %v2143_v17 = vor.u32 %v2142_v37, %v2139_v3  ;;  %v4083_v31 = vpop.permute.xlu0 %4082 }
 0x128   : > { %v2152_v54 = vor.u32 %v2151_v51, %v2148_v6 }
 0x12a   : > { %v2153_v53 = vsel %vm2010_vm4, %v2143_v17, %v2152_v54  ;;  %v4088_v34 = vpop.permute.xlu0 %4087 }
 0x12b   : > { %5791 = vmatmul.mubr.msk.bf16.gmra.mrb[24].mxu1 %vm799_vm3, %v1725_v49  ;;  %v2164_v49 = vshrl.u32 %v7031_v22, 16 }
 0x12c   : > { %5794 = vmatprep.mubr.msk.bf16.mxu1 %vm799_vm3, %v1727_v56  ;;  %v3681_v56 = vrot.slane %v7162_v38, 3  ;;  %v2173_v38 = vshrl.u32 %v7045_v33, 16  ;;  %v3688_v33 = vsel %vm3657_vm8, %v3685_v25, %v3687_v20 }
 0x12d   : > { %5961 = vmatmul.mubr.msk.bf16.gmra.mrb[4].mxu0 %vm799_vm3, %v3666_v62  ;;  %v2144_v62 = vsel %vm2010_vm4, %v2134_v27, %v2143_v17  ;;  %v2166_v15 = vrot.slane %v2164_v49, 1 }
 0x12e   : > { %5964 = vmatprep.mubr.msk.bf16.mxu0 %vm799_vm3, %v3668_v13  ;;  %v3683_v13 = vrot.slane %v7168_v57, 3  ;;  %v3682_v22 = vsel %vm3657_vm8, %v3679_v40, %v3681_v56  ;;  %v2175_v8 = vrot.slane %v2173_v38, 1  ;;  %v4103_v46 = vpop.permute.xlu0 %4102 }
 0x12f   : > { %v2170_v57 = vor.u32 %v2169_v4, %v2166_v15 }
 0x130   : > { %v3684_v39 = vsel %vm3657_vm8, %v3681_v56, %v3683_v13  ;;  %v3686_v63 = vsel %vm3657_vm8, %v3683_v13, %v3685_v25 }
 0x133   : > { %5795 = vmatmul.mubr.msk.bf16.gmra.mrb[28].mxu1 %vm799_vm3, %v1729_v35  ;;  %v2161_v35 = vor.u32 %v2160_v11, %v2157_v2 }
 0x134   : > { %5798 = vmatprep.mubr.msk.bf16.mxu1 %vm799_vm3, %v1731_v60 }
 0x135   : > { %5965 = vmatmul.mubr.msk.bf16.gmra.mrb[8].mxu0 %vm799_vm3, %v3670_v55  ;;  %v2162_v60 = vsel %vm2010_vm4, %v2152_v54, %v2161_v35  ;;  %v2178_v55 = vrot.slane %v2176_v30, 2  ;;  %v7601_v37 = vpop.permute.xlu0 %4112  ;;  %v7620_v54 = vld [vmem:[%s7970_s3] ss:$0 sm:$0xff] }
 0x136   : > { %5968 = vmatprep.mubr.msk.bf16.mxu0 %vm799_vm3, %v3672_v29  ;;  %v2171_v29 = vsel %vm2010_vm4, %v2161_v35, %v2170_v57 }
 0x137   : > { %v2179_v44 = vor.u32 %v2178_v55, %v2175_v8 }
 0x139   : > { %v2180_v24 = vsel %vm2010_vm4, %v2170_v57, %v2179_v44  ;;  %v7613_v17 = vpop.permute.xlu0 %4122 }
 0x13b   : > { %5799 = vmatmul.mubr.msk.bf16.gmra.mrb[32].mxu1 %vm799_vm3, %v1733_v47 }
 0x13c   : > { %5824 = vmatprep.mubr.msk.bf16.mxu1 %vm799_vm3, %v2117_v59 }
 0x13d   : > { %5969 = vmatmul.mubr.msk.bf16.gmra.mrb[12].mxu0 %vm799_vm3, %v3674_v26  ;;  %v4093_v26 = vpop.permute.xlu1 %4092  ;;  %v7622_v49 = vpop.permute.xlu0 %4132 }
 0x13e   : > { %5972 = vmatprep.mubr.msk.bf16.mxu0 %vm799_vm3, %v3676_v52 }
 0x141   : > { %v4098_v27 = vpop.permute.xlu1 %4097  ;;  %v7630_v57 = vpop.permute.xlu0 %4142 }
 0x143   : > { %5825 = vmatmul.mubr.msk.bf16.vlgmr.msra.gmra.mrb[20].mxu1 %vm799_vm3, %v2126_v41 }
 0x144   : > { %5828 = vmatprep.mubr.msk.bf16.mxu1 %vm799_vm3, %v2135_v42 }
 0x145   : > { %5973 = vmatmul.mubr.msk.bf16.gmra.mrb[16].mxu0 %vm799_vm3, %v3678_v16  ;;  %v7599_v3 = vpop.permute.xlu1 %4107 }
 0x146   : > { %5976 = vmatprep.mubr.msk.bf16.mxu0 %vm799_vm3, %v3680_v21 }
 0x149   : > { %v7607_v51 = vpop.permute.xlu1 %4117 }
 0x14b   : > { %5829 = vmatmul.mubr.msk.bf16.gmra.mrb[24].mxu1 %vm799_vm3, %v2144_v62 }
 0x14c   : > { %5832 = vmatprep.mubr.msk.bf16.mxu1 %vm799_vm3, %v2153_v53 }
 0x14d   : > { %5977 = vmatmul.mubr.msk.bf16.gmra.mrb[20].mxu0 %vm799_vm3, %v3682_v22  ;;  %v7615_v50 = vpop.permute.xlu1 %4127 }
 0x14e   : > { %5980 = vmatprep.mubr.msk.bf16.mxu0 %vm799_vm3, %v3684_v39 }
 0x151   : > { %v7624_v2 = vpop.permute.xlu1 %4137 }
 0x153   : > { %5833 = vmatmul.mubr.msk.bf16.gmra.mrb[28].mxu1 %vm799_vm3, %v2162_v60 }
 0x154   : > { %5836 = vmatprep.mubr.msk.bf16.mxu1 %vm799_vm3, %v2171_v29 }
 0x155   : > { %5981 = vmatmul.mubr.msk.bf16.gmra.mrb[24].mxu0 %vm799_vm3, %v3686_v63  ;;  %v7632_v55 = vpop.permute.xlu1 %4147 }
 0x156   : > { %5984 = vmatprep.mubr.msk.bf16.mxu0 %vm799_vm3, %v3688_v33 }
 0x15b   : > { %5837 = vmatmul.mubr.msk.bf16.gmra.mrb[32].mxu1 %vm799_vm3, %v2180_v24 }
 0x15d   : > { %5985 = vmatmul.mubr.msk.bf16.gmra.mrb[28].mxu0 %vm799_vm3, %v3690_v36 }
 0x15e   : > { %5988 = vmatprep.mubr.msk.bf16.mxu0 %vm799_vm3, %v3692_v18 }
 0x165   : > { %5989 = vmatmul.mubr.msk.bf16.gmra.mrb[32].mxu0 %vm799_vm3, %v3694_v58 }
 0x1ce   : > { %v5768_v9 = vpop.f32.mrb[0].mxu1 }
 0x1cf   : > { %v1825_v47 = vpop.f32.mrb[1].mxu1 }
 0x1d0   : > { %v5769_v61 = vpop.f32.mrb[2].mxu1 }
 0x1d1   : > { %v1828_v19 = vpop.f32.mrb[3].mxu1 }
 0x1d6   : > { %v5772_v1 = vpop.f32.mrb[4].mxu1 }
 0x1d7   : > { %v1841_v5 = vpop.f32.mrb[5].mxu1 }
 0x1d8   : > { %v5773_v59 = vpop.f32.mrb[6].mxu1 }
 0x1d9   : > { %v1844_v43 = vpop.f32.mrb[7].mxu1 }
 0x1de   : > { %v7583_v52 = vpop.f32.mrb[8].mxu1 }
 0x1df   : > { %v7585_v12 = vpop.f32.mrb[9].mxu1 }
 0x1e0   : > { %v7587_v7 = vpop.f32.mrb[10].mxu1 }
 0x1e1   : > { %v7589_v32 = vpop.f32.mrb[11].mxu1 }
 0x1e6   : > { %v7591_v28 = vpop.f32.mrb[12].mxu1 }
 0x1e7   : > { %v7593_v10 = vpop.f32.mrb[13].mxu1 }
 0x1e8   : > { %v7595_v41 = vpop.f32.mrb[14].mxu1 }
 0x1e9   : > { %v7597_v40 = vpop.f32.mrb[15].mxu1 }
 0x1ee   : > { %v7603_v42 = vpop.f32.mrb[16].mxu1 }
 0x1ef   : > { %v7605_v6 = vpop.f32.mrb[17].mxu1 }
 0x1f0   : > { %v7609_v16 = vpop.f32.mrb[18].mxu1 }
 0x1f1   : > { %v7611_v21 = vpop.f32.mrb[19].mxu1 }
 0x1f8   : > { %v5958_v48 = vpop.f32.mrb[0].mxu0 }
 0x1f9   : > { %v6138_v14 = vadd.f32 %v5958_v48, %v5768_v9  ;;  %v3786_v56 = vpop.f32.mrb[1].mxu0 }
 0x1fa   : > { %v6139_v62 = vadd.f32 %v3786_v56, %v1825_v47  ;;  %v5959_v13 = vpop.f32.mrb[2].mxu0 }
 0x1fb   : > { %v3974_v11 = vadd.f32 %v6138_v14, %v7620_v54  ;;  %v6140_v53 = vadd.f32 %v5959_v13, %v5769_v61  ;;  %v3789_v15 = vpop.f32.mrb[3].mxu0 }
 0x1fc   : > { %v3972_v4 = vadd.f32 %v6139_v62, %v7620_v54  ;;  %v6141_v22 = vadd.f32 %v3789_v15, %v1828_v19  ;;  %v7638_v19 = vpop.permute.xlu0 %4152 }
 0x1fd   : > { %v3975_v39 = vadd.f32 %v6140_v53, %v7620_v54  ;;  %v4010_v35 = vmax.f32 %v3974_v11, 0.0 }
 0x1fe   : > { %v4008_v38 = vmax.f32 %v3972_v4, 0.0  ;;  %v3973_v30 = vadd.f32 %v6141_v22, %v7620_v54 }
 0x1ff   : > { %v4011_v25 = vmax.f32 %v3975_v39, 0.0  ;;  %v4262_v33 = vmul.f32 %v4093_v26, %v4010_v35 }
 0x200   : > { %v4260_v60 = vmul.f32 %v4083_v31, %v4008_v38  ;;  %v4009_v20 = vmax.f32 %v3973_v30, 0.0  ;;  %v5962_v8 = vpop.f32.mrb[4].mxu0  ;;  %v7651_v30 = vpop.permute.xlu0 %4162 }
 0x201   : > { %v6142_v29 = vadd.f32 %v5962_v8, %v5772_v1  ;;  %v3802_v63 = vpop.f32.mrb[5].mxu0  ;;  %v4263_v0 = vmul.f32 %v4098_v27, %v4011_v25 }
 0x202   : > { %v4261_v44 = vmul.f32 %v4088_v34, %v4009_v20  ;;  %v6143_v45 = vadd.f32 %v3802_v63, %v1841_v5  ;;  %v5963_v24 = vpop.f32.mrb[6].mxu0  ;;  %v4297_v58 = vsel %vm4296_vm9, %v4260_v60, 0.0  ;;  %v4300_v5 = vsel %vm4296_vm9, %v4262_v33, 0.0 }
 0x203   : > { %v3978_v36 = vadd.f32 %v6142_v29, %v7620_v54  ;;  %v6144_v18 = vadd.f32 %v5963_v24, %v5773_v59  ;;  %v3805_v23 = vpop.f32.mrb[7].mxu0  ;;  %v7643_v59 = vpop.permute.xlu1 %4157  ;;  %v4302_v14 = vsel %vm4296_vm9, %v4263_v0, 0.0 }
 0x204   : > { %v4298_v9 = vsel %vm4296_vm9, %v4261_v44, 0.0  ;;  %v3976_v47 = vadd.f32 %v6143_v45, %v7620_v54  ;;  %v6145_v61 = vadd.f32 %v3805_v23, %v1844_v43 }
 0x205   : > { %v4299_v1 = vadd.f32 %v4298_v9, %v4297_v58  ;;  %v3979_v31 = vadd.f32 %v6144_v18, %v7620_v54  ;;  %v4014_v26 = vmax.f32 %v3978_v36, 0.0 }
 0x206   : > { %v4012_v34 = vmax.f32 %v3976_v47, 0.0  ;;  %v3977_v27 = vadd.f32 %v6145_v61, %v7620_v54 }
 0x207   : > { %v4301_v48 = vadd.f32 %v4300_v5, %v4299_v1  ;;  %v4015_v62 = vmax.f32 %v3979_v31, 0.0  ;;  %v4266_v4 = vmul.f32 %v7601_v37, %v4014_v26 }
 0x208   : > { %v4264_v56 = vmul.f32 %v4103_v46, %v4012_v34  ;;  %v4013_v13 = vmax.f32 %v3977_v27, 0.0  ;;  %v5966_v43 = vpop.f32.mrb[8].mxu0 }
 0x209   : > { %v4303_v11 = vadd.f32 %v4302_v14, %v4301_v48  ;;  %v6146_v53 = vadd.f32 %v5966_v43, %v7583_v52  ;;  %v3818_v15 = vpop.f32.mrb[9].mxu0  ;;  %v4267_v52 = vmul.f32 %v7607_v51, %v4015_v62  ;;  %v4308_v33 = vsel %vm4296_vm9, %v4266_v4, 0.0 }
 0x20a   : > { %v4304_v22 = vsel %vm4296_vm9, %v4264_v56, 0.0  ;;  %v4265_v39 = vmul.f32 %v7599_v3, %v4013_v13  ;;  %v6147_v35 = vadd.f32 %v3818_v15, %v7585_v12  ;;  %v5967_v38 = vpop.f32.mrb[10].mxu0  ;;  %v7659_v3 = vpop.permute.xlu1 %4167 }
 0x20b   : > { %v4305_v25 = vadd.f32 %v4304_v22, %v4303_v11  ;;  %v3982_v46 = vadd.f32 %v6146_v53, %v7620_v54  ;;  %v6148_v60 = vadd.f32 %v5967_v38, %v7587_v7  ;;  %v3821_v20 = vpop.f32.mrb[11].mxu0  ;;  %v4310_v51 = vsel %vm4296_vm9, %v4267_v52, 0.0 }
 0x20c   : > { %v4306_v8 = vsel %vm4296_vm9, %v4265_v39, 0.0  ;;  %v3980_v37 = vadd.f32 %v6147_v35, %v7620_v54  ;;  %v6149_v29 = vadd.f32 %v3821_v20, %v7589_v32  ;;  %v7666_v32 = vpop.permute.xlu0 %4172 }
 0x20d   : > { %v4307_v12 = vadd.f32 %v4306_v8, %v4305_v25  ;;  %v3983_v63 = vadd.f32 %v6148_v60, %v7620_v54  ;;  %v4018_v44 = vmax.f32 %v3982_v46, 0.0 }
 0x20e   : > { %v4016_v45 = vmax.f32 %v3980_v37, 0.0  ;;  %v3981_v7 = vadd.f32 %v6149_v29, %v7620_v54  ;;  %v7673_v34 = vpop.permute.xlu1 %4177 }
 0x20f   : > { %v4309_v24 = vadd.f32 %v4308_v33, %v4307_v12  ;;  %v4019_v36 = vmax.f32 %v3983_v63, 0.0  ;;  %v4270_v61 = vmul.f32 %v7622_v49, %v4018_v44 }
 0x210   : > { %v4268_v0 = vmul.f32 %v7613_v17, %v4016_v45  ;;  %v4017_v18 = vmax.f32 %v3981_v7, 0.0  ;;  %v5970_v23 = vpop.f32.mrb[12].mxu0  ;;  %v7684_v4 = vpop.permute.xlu0 %4182 }
 0x211   : > { %v4311_v58 = vadd.f32 %v4310_v51, %v4309_v24  ;;  %v6150_v9 = vadd.f32 %v5970_v23, %v7591_v28  ;;  %v3834_v47 = vpop.f32.mrb[13].mxu0  ;;  %v4271_v28 = vmul.f32 %v7624_v2, %v4019_v36  ;;  %v4316_v43 = vsel %vm4296_vm9, %v4270_v61, 0.0 }
 0x212   : > { %v4312_v1 = vsel %vm4296_vm9, %v4268_v0, 0.0  ;;  %v4269_v31 = vmul.f32 %v7615_v50, %v4017_v18  ;;  %v6151_v5 = vadd.f32 %v3834_v47, %v7593_v10  ;;  %v5971_v26 = vpop.f32.mrb[14].mxu0  ;;  %v7688_v60 = vpop.permute.xlu1 %4187 }
 0x213   : > { %v4313_v17 = vadd.f32 %v4312_v1, %v4311_v58  ;;  %v3986_v27 = vadd.f32 %v6150_v9, %v7620_v54  ;;  %v6152_v48 = vadd.f32 %v5971_v26, %v7595_v41  ;;  %v3837_v14 = vpop.f32.mrb[15].mxu0  ;;  %v4318_v39 = vsel %vm4296_vm9, %v4271_v28, 0.0 }
 0x214   : > { %v4314_v56 = vsel %vm4296_vm9, %v4269_v31, 0.0  ;;  %v3984_v49 = vadd.f32 %v6151_v5, %v7620_v54  ;;  %v6153_v62 = vadd.f32 %v3837_v14, %v7597_v40  ;;  %v4193_v0 = vpop.permute.xlu0 %4192 }
 0x215   : > { %v4315_v50 = vadd.f32 %v4314_v56, %v4313_v17  ;;  %v3987_v10 = vadd.f32 %v6152_v48, %v7620_v54  ;;  %v4022_v11 = vmax.f32 %v3986_v27, 0.0 }
 0x216   : > { %v5826_v13 = vpop.f32.mrb[20].mxu1  ;;  %v4020_v53 = vmax.f32 %v3984_v49, 0.0  ;;  %v3985_v15 = vadd.f32 %v6153_v62, %v7620_v54  ;;  %v4198_v47 = vpop.permute.xlu1 %4197 }
 0x217   : > { %v2352_v41 = vpop.f32.mrb[21].mxu1  ;;  %v4317_v2 = vadd.f32 %v4316_v43, %v4315_v50  ;;  %v4023_v40 = vmax.f32 %v3987_v10, 0.0  ;;  %v4274_v37 = vmul.f32 %v7638_v19, %v4022_v11 }
 0x218   : > { %v5827_v22 = vpop.f32.mrb[22].mxu1  ;;  %v4272_v35 = vmul.f32 %v7630_v57, %v4020_v53  ;;  %v4021_v38 = vmax.f32 %v3985_v15, 0.0  ;;  %v5974_v25 = vpop.f32.mrb[16].mxu0 }
 0x219   : > { %v2355_v46 = vpop.f32.mrb[23].mxu1  ;;  %v4319_v20 = vadd.f32 %v4318_v39, %v4317_v2  ;;  %v6154_v52 = vadd.f32 %v5974_v25, %v7603_v42  ;;  %v3850_v8 = vpop.f32.mrb[17].mxu0  ;;  %v4275_v24 = vmul.f32 %v7643_v59, %v4023_v40  ;;  %v4324_v18 = vsel %vm4296_vm9, %v4274_v37, 0.0 }
 0x21a   : > { %v4320_v29 = vsel %vm4296_vm9, %v4272_v35, 0.0  ;;  %v4273_v12 = vmul.f32 %v7632_v55, %v4021_v38  ;;  %v6155_v63 = vadd.f32 %v3850_v8, %v7605_v6  ;;  %v5975_v33 = vpop.f32.mrb[18].mxu0  ;;  %v4203_v10 = vpop.permute.xlu0 %4202 }
 0x21b   : > { %v4321_v57 = vadd.f32 %v4320_v29, %v4319_v20  ;;  %v3990_v44 = vadd.f32 %v6154_v52, %v7620_v54  ;;  %v6156_v45 = vadd.f32 %v5975_v33, %v7609_v16  ;;  %v3853_v7 = vpop.f32.mrb[19].mxu0  ;;  %v4326_v1 = vsel %vm4296_vm9, %v4275_v24, 0.0 }
 0x21c   : > { %v4322_v42 = vsel %vm4296_vm9, %v4273_v12, 0.0  ;;  %v3988_v51 = vadd.f32 %v6155_v63, %v7620_v54  ;;  %v6157_v19 = vadd.f32 %v3853_v7, %v7611_v21 }
 0x21d   : > { %v4323_v36 = vadd.f32 %v4322_v42, %v4321_v57  ;;  %v3991_v55 = vadd.f32 %v6156_v45, %v7620_v54  ;;  %v4026_v23 = vmax.f32 %v3990_v44, 0.0 }
 0x21e   : > { %v5830_v6 = vpop.f32.mrb[24].mxu1  ;;  %v4024_v58 = vmax.f32 %v3988_v51, 0.0  ;;  %v3989_v16 = vadd.f32 %v6157_v19, %v7620_v54  ;;  %v4213_v33 = vpop.permute.xlu0 %4212 }
 0x21f   : > { %v2368_v9 = vpop.f32.mrb[25].mxu1  ;;  %v4325_v59 = vadd.f32 %v4324_v18, %v4323_v36  ;;  %v4027_v21 = vmax.f32 %v3991_v55, 0.0  ;;  %v4278_v28 = vmul.f32 %v7666_v32, %v4026_v23  ;;  %v4208_v32 = vpop.permute.xlu1 %4207 }
 0x220   : > { %v5831_v61 = vpop.f32.mrb[26].mxu1  ;;  %v4276_v31 = vmul.f32 %v7651_v30, %v4024_v58  ;;  %v4025_v5 = vmax.f32 %v3989_v16, 0.0  ;;  %v5978_v26 = vpop.f32.mrb[20].mxu0 }
 0x221   : > { %v2371_v17 = vpop.f32.mrb[27].mxu1  ;;  %v4327_v27 = vadd.f32 %v4326_v1, %v4325_v59  ;;  %v6158_v48 = vadd.f32 %v5978_v26, %v5826_v13  ;;  %v3866_v14 = vpop.f32.mrb[21].mxu0  ;;  %v4279_v15 = vmul.f32 %v7673_v34, %v4027_v21 }
 0x222   : > { %v4328_v56 = vsel %vm4296_vm9, %v4276_v31, 0.0  ;;  %v4277_v49 = vmul.f32 %v7659_v3, %v4025_v5  ;;  %v6159_v62 = vadd.f32 %v3866_v14, %v2352_v41  ;;  %v5979_v50 = vpop.f32.mrb[22].mxu0  ;;  %v4332_v41 = vsel %vm4296_vm9, %v4278_v28, 0.0 }
 0x223   : > { %v4329_v43 = vadd.f32 %v4328_v56, %v4327_v27  ;;  %v3994_v11 = vadd.f32 %v6158_v48, %v7620_v54  ;;  %v6160_v30 = vadd.f32 %v5979_v50, %v5827_v22  ;;  %v3869_v53 = vpop.f32.mrb[23].mxu0  ;;  %v4334_v34 = vsel %vm4296_vm9, %v4279_v15, 0.0  ;;  %v4218_v36 = vpop.permute.xlu1 %4217 }
 0x224   : > { %v4330_v2 = vsel %vm4296_vm9, %v4277_v49, 0.0  ;;  %v3992_v13 = vadd.f32 %v6159_v62, %v7620_v54  ;;  %v6161_v39 = vadd.f32 %v3869_v53, %v2355_v46  ;;  %v4223_v27 = vpop.permute.xlu0 %4222 }
 0x225   : > { %v4331_v35 = vadd.f32 %v4330_v2, %v4329_v43  ;;  %v3995_v40 = vadd.f32 %v6160_v30, %v7620_v54  ;;  %v4030_v38 = vmax.f32 %v3994_v11, 0.0 }
 0x226   : > { %v5834_v3 = vpop.f32.mrb[28].mxu1  ;;  %v4028_v25 = vmax.f32 %v3992_v13, 0.0  ;;  %v3993_v20 = vadd.f32 %v6161_v39, %v7620_v54 }
 0x227   : > { %v2384_v22 = vpop.f32.mrb[29].mxu1  ;;  %v4333_v52 = vadd.f32 %v4332_v41, %v4331_v35  ;;  %v4031_v29 = vmax.f32 %v3995_v40, 0.0  ;;  %v4282_v7 = vmul.f32 %v4193_v0, %v4030_v38  ;;  %v4228_v62 = vpop.permute.xlu1 %4227 }
 0x228   : > { %v5835_v8 = vpop.f32.mrb[30].mxu1  ;;  %v4280_v37 = vmul.f32 %v7684_v4, %v4028_v25  ;;  %v4029_v46 = vmax.f32 %v3993_v20, 0.0  ;;  %v5982_v12 = vpop.f32.mrb[24].mxu0 }
 0x229   : > { %v2387_v63 = vpop.f32.mrb[31].mxu1  ;;  %v4335_v57 = vadd.f32 %v4334_v34, %v4333_v52  ;;  %v6162_v44 = vadd.f32 %v5982_v12, %v5830_v6  ;;  %v3882_v45 = vpop.f32.mrb[25].mxu0  ;;  %v4283_v58 = vmul.f32 %v4198_v47, %v4031_v29 }
 0x22a   : > { %v4336_v24 = vsel %vm4296_vm9, %v4280_v37, 0.0  ;;  %v4281_v42 = vmul.f32 %v7688_v60, %v4029_v46  ;;  %v6163_v51 = vadd.f32 %v3882_v45, %v2368_v9  ;;  %v5983_v19 = vpop.f32.mrb[26].mxu0  ;;  %v4340_v60 = vsel %vm4296_vm9, %v4282_v7, 0.0  ;;  %v4233_v52 = vpop.permute.xlu0 %4232 }
 0x22b   : > { %v4337_v55 = vadd.f32 %v4336_v24, %v4335_v57  ;;  %v3998_v18 = vadd.f32 %v6162_v44, %v7620_v54  ;;  %v6164_v4 = vadd.f32 %v5983_v19, %v5831_v61  ;;  %v3885_v23 = vpop.f32.mrb[27].mxu0  ;;  %v4342_v47 = vsel %vm4296_vm9, %v4283_v58, 0.0  ;;  %v4238_v46 = vpop.permute.xlu1 %4237 }
 0x22c   : > { %v4338_v16 = vsel %vm4296_vm9, %v4281_v42, 0.0  ;;  %v3996_v59 = vadd.f32 %v6163_v51, %v7620_v54  ;;  %v6165_v6 = vadd.f32 %v3885_v23, %v2371_v17 }
 0x22d   : > { %v4339_v1 = vadd.f32 %v4338_v16, %v4337_v55  ;;  %v3999_v0 = vadd.f32 %v6164_v4, %v7620_v54  ;;  %v4034_v9 = vmax.f32 %v3998_v18, 0.0 }
 0x22e   : > { %v5838_v31 = vpop.f32.mrb[32].mxu1  ;;  %v4032_v21 = vmax.f32 %v3996_v59, 0.0  ;;  %v3997_v5 = vadd.f32 %v6165_v6, %v7620_v54  ;;  %v4243_v18 = vpop.permute.xlu0 %4242 }
 0x22f   : > { %v2400_v26 = vpop.f32.mrb[33].mxu1  ;;  %v4341_v61 = vadd.f32 %v4340_v60, %v4339_v1  ;;  %v4035_v28 = vmax.f32 %v3999_v0, 0.0  ;;  %v4286_v30 = vmul.f32 %v4213_v33, %v4034_v9 }
 0x230   : > { %v5839_v48 = vpop.f32.mrb[34].mxu1  ;;  %v4284_v14 = vmul.f32 %v4203_v10, %v4032_v21  ;;  %v4033_v56 = vmax.f32 %v3997_v5, 0.0  ;;  %v5986_v17 = vpop.f32.mrb[28].mxu0 }
 0x231   : > { %v2403_v49 = vpop.f32.mrb[35].mxu1  ;;  %v4343_v50 = vadd.f32 %v4342_v47, %v4341_v61  ;;  %v6166_v43 = vadd.f32 %v5986_v17, %v5834_v3  ;;  %v3898_v11 = vpop.f32.mrb[29].mxu0  ;;  %v4287_v10 = vmul.f32 %v4218_v36, %v4035_v28  ;;  %v4348_v37 = vsel %vm4296_vm9, %v4286_v30, 0.0 }
 0x232   : > { %v4344_v53 = vsel %vm4296_vm9, %v4284_v14, 0.0  ;;  %v4285_v15 = vmul.f32 %v4208_v32, %v4033_v56  ;;  %v6167_v2 = vadd.f32 %v3898_v11, %v2384_v22  ;;  %v5987_v13 = vpop.f32.mrb[30].mxu0  ;;  %v4253_v56 = vpop.permute.xlu0 %4252 }
 0x233   : > { %v4345_v39 = vadd.f32 %v4344_v53, %v4343_v50  ;;  %v4002_v35 = vadd.f32 %v6166_v43, %v7620_v54  ;;  %v6168_v40 = vadd.f32 %v5987_v13, %v5835_v8  ;;  %v3901_v41 = vpop.f32.mrb[31].mxu0  ;;  %v4350_v8 = vsel %vm4296_vm9, %v4287_v10, 0.0 }
 0x234   : > { %v4346_v38 = vsel %vm4296_vm9, %v4285_v15, 0.0  ;;  %v4000_v25 = vadd.f32 %v6167_v2, %v7620_v54  ;;  %v6169_v20 = vadd.f32 %v3901_v41, %v2387_v63 }
 0x235   : > { %v4347_v3 = vadd.f32 %v4346_v38, %v4345_v39  ;;  %v4003_v34 = vadd.f32 %v6168_v40, %v7620_v54  ;;  %v4038_v32 = vmax.f32 %v4002_v35, 0.0  ;;  %v4374_v40 = vlaneseq }
 0x236   : > { %v4036_v22 = vmax.f32 %v4000_v25, 0.0  ;;  %v4001_v29 = vadd.f32 %v6169_v20, %v7620_v54  ;;  %v4376_v20 = vstv %s6671_s22 }
 0x237   : > { %v4349_v12 = vadd.f32 %v4348_v37, %v4347_v3  ;;  %v4039_v57 = vmax.f32 %v4003_v34, 0.0  ;;  %v4290_v42 = vmul.f32 %v4233_v52, %v4038_v32  ;;  %v4375_v38 = vshrl.u32 %v4374_v40, 7  ;;  %v4378_v34 = vld [vmem:[#allocation2] sm:$0xf] }
 0x238   : > { %v4288_v33 = vmul.f32 %v4223_v27, %v4036_v22  ;;  %v4037_v44 = vmax.f32 %v4001_v29, 0.0  ;;  %v5990_v45 = vpop.f32.mrb[32].mxu0  ;;  %v4390_v22 = vld [vmem:[%s7971_s4] sm:$0xff] (!%p5414_p5)  ;;  %v4391_v29 = vld [vmem:[%s7971_s4 + $0x8] sm:$0xff] (!%p5414_p5) }
 0x239   : > { %v4351_v7 = vadd.f32 %v4350_v8, %v4349_v12  ;;  %v6170_v63 = vadd.f32 %v5990_v45, %v5838_v31  ;;  %v3914_v24 = vpop.f32.mrb[33].mxu0  ;;  %v4291_v59 = vmul.f32 %v4238_v46, %v4039_v57  ;;  %v4248_v31 = vpop.permute.xlu1 %4247  ;;  %v4356_v21 = vsel %vm4296_vm9, %v4290_v42, 0.0  ;;  %v4392_v46 = vld [vmem:[%s7971_s4 + $0x10] sm:$0xff] (!%p5414_p5) }
 0x23a   : > { %v4352_v51 = vsel %vm4296_vm9, %v4288_v33, 0.0  ;;  %v4289_v19 = vmul.f32 %v4228_v62, %v4037_v44  ;;  %v6171_v36 = vadd.f32 %v3914_v24, %v2400_v26  ;;  %v5991_v55 = vpop.f32.mrb[34].mxu0  ;;  %vm4377_vm10 = vcmp.eq.s32.totalorder %v4375_v38, %v4376_v20  ;;  %v4393_v33 = vld [vmem:[%s7971_s4 + $0x18] sm:$0xff] (!%p5414_p5)  ;;  %v4539_v24 = vld [vmem:[%s7972_s5 + $0x10] sm:$0xff] (!%p5414_p5) }
 0x23b   : > { %v4353_v4 = vadd.f32 %v4352_v51, %v4351_v7  ;;  %v4006_v23 = vadd.f32 %v6170_v63, %v7620_v54  ;;  %v6172_v58 = vadd.f32 %v5991_v55, %v5839_v48  ;;  %v3917_v16 = vpop.f32.mrb[35].mxu0  ;;  %v4358_v48 = vsel %vm4296_vm9, %v4291_v59, 0.0  ;;  %v4537_v7 = vld [vmem:[%s7972_s5] sm:$0xff] (!%p5414_p5)  ;;  %v4538_v63 = vld [vmem:[%s7972_s5 + $0x8] sm:$0xff] (!%p5414_p5)  ;;  %v4540_v51 = vld [vmem:[%s7972_s5 + $0x18] sm:$0xff] (!%p5414_p5) }
 0x23c   : > { %v4354_v6 = vsel %vm4296_vm9, %v4289_v19, 0.0  ;;  %v4004_v1 = vadd.f32 %v6171_v36, %v7620_v54  ;;  %v6173_v0 = vadd.f32 %v3917_v16, %v2403_v49  ;;  %v6575_v12 = vmov (!%p5414_p5), 0.0|0.0   ;;  %v4625_v19 = vld [vmem:[%s7975_s8] sm:$0xff] (!%p5414_p5)  ;;  %v4626_v55 = vld [vmem:[%s7975_s8 + $0x8] sm:$0xff] (!%p5414_p5)  ;;  %v4543_v16 = vld [vmem:[%s7972_s5 + $0x30] sm:$0xff] (!%p5414_p5) }
 0x23d   : > { %v4355_v60 = vadd.f32 %v4354_v6, %v4353_v4  ;;  %v4007_v9 = vadd.f32 %v6172_v58, %v7620_v54  ;;  %v4042_v5 = vmax.f32 %v4006_v23, 0.0  ;;  %v4258_v43 = vpop.permute.xlu1 %4257  ;;  %6082 = vmatprep.subr.bf16.mxu0 (!%p5414_p5), %v6575_v12  ;;  %v6083_v8 = vpack.c.bf16 (!%p5414_p5), %v4391_v29, %v4390_v22  ;;  %6088 = vmatprep.subr.bf16.mxu1 (!%p5414_p5), %v6575_v12  ;;  %v4542_v4 = vld [vmem:[%s7972_s5 + $0x28] sm:$0xff] (!%p5414_p5)  ;;  %v4544_v59 = vld [vmem:[%s7972_s5 + $0x38] sm:$0xff] (!%p5414_p5) }
 0x23e   : > { %v4040_v26 = vmax.f32 %v4004_v1, 0.0  ;;  %v4005_v27 = vadd.f32 %v6173_v0, %v7620_v54  ;;  %v6577_v57 = vmov (!%p5414_p5), 0.0   ;;  %v6086_v45 = vpack.c.bf16 (!%p5414_p5), %v4393_v33, %v4392_v46  ;;  %v4627_v1 = vld [vmem:[%s7975_s8 + $0x10] sm:$0xff] (!%p5414_p5)  ;;  %v4628_v0 = vld [vmem:[%s7975_s8 + $0x18] sm:$0xff] (!%p5414_p5) }
 0x23f   : > { %v4357_v61 = vadd.f32 %v4356_v21, %v4355_v60  ;;  %v4043_v14 = vmax.f32 %v4007_v9, 0.0  ;;  %v4294_v62 = vmul.f32 %v4253_v56, %v4042_v5  ;;  %6000 = vmatprep.mubr.msk.f32.mxu0 (!%p5414_p5), %vm6576_vm12, %v6577_v57  ;;  %6084 = vmatpush3.bf16.msra.mxu0 (!%p5414_p5), %v6083_v8  ;;  %v6089_v42 = vpack.c.bf16 (!%p5414_p5), %v4538_v63, %v4537_v7  ;;  %v5415_v9 = vld [vmem:[%s7973_s6] ss:$0 sm:$0xff] (!%p5414_p5) }
 0x240   : > { %v4292_v47 = vmul.f32 %v4243_v18, %v4040_v26  ;;  %v4041_v28 = vmax.f32 %v4005_v27, 0.0  ;;  %6019 = vmatprep.mubr.msk.f32.mxu1 (!%p5414_p5), %vm6576_vm12, %v6577_v57  ;;  %6085 = vmatprep.subr.bf16.mxu0 (!%p5414_p5), %v6575_v12  ;;  %v6092_v36 = vpack.c.bf16 (!%p5414_p5), %v4540_v51, %v4539_v24  ;;  %v4541_v18 = vld [vmem:[%s7972_s5 + $0x20] sm:$0xff] (!%p5414_p5)  ;;  %v6101_v23 = vpack.c.bf16 (!%p5414_p5), %v4626_v55, %v4625_v19 }
 0x241   : > { %v4359_v17 = vadd.f32 %v4358_v48, %v4357_v61  ;;  %v4295_v30 = vmul.f32 %v4258_v43, %v4043_v14  ;;  %v4364_v54 = vsel %vm4296_vm9, %v4294_v62, 0.0  ;;  %6090 = vmatpush3.bf16.msra.mxu1 (!%p5414_p5), %v6089_v42  ;;  %v6095_v58 = vpack.c.bf16 (!%p5414_p5), %v4542_v4, %v4541_v18  ;;  %v5417_v19 = vld [vmem:[%s7973_s6 + $0x1] ss:$0 sm:$0xff] (!%p5414_p5)  ;;  %v5418_v55 = vld [vmem:[%s7973_s6 + $0x2] ss:$0 sm:$0xff] (!%p5414_p5) }
 0x242   : > { %v4360_v49 = vsel %vm4296_vm9, %v4292_v47, 0.0  ;;  %v4293_v50 = vmul.f32 %v4248_v31, %v4041_v28  ;;  %6091 = vmatprep.subr.bf16.mxu1 (!%p5414_p5), %v6575_v12  ;;  %v6098_v6 = vpack.c.bf16 (!%p5414_p5), %v4544_v59, %v4543_v16  ;;  %v6104_v31 = vpack.c.bf16 (!%p5414_p5), %v4628_v0, %v4627_v1  ;;  %v4866_v4 = vld [vmem:[%s7979_s12] sm:$0xff] (!%p5414_p5)  ;;  %v4869_v1 = vld [vmem:[%s7979_s12 + $0x18] sm:$0xff] (!%p5414_p5) }
 0x243   : > { %v4361_v11 = vadd.f32 %v4360_v49, %v4359_v17  ;;  %v4366_v13 = vsel %vm4296_vm9, %v4295_v30, 0.0  ;;  %6087 = vmatpush3.bf16.msra.mxu0 (!%p5414_p5), %v6086_v45 }
 0x244   : > { %v4362_v53 = vsel %vm4296_vm9, %v4293_v50, 0.0  ;;  %6100 = vmatprep.subr.bf16.mxu0 (!%p5414_p5), %v6575_v12 }
 0x245   : > { %v4363_v15 = vadd.f32 %v4362_v53, %v4361_v11  ;;  %6093 = vmatpush3.bf16.msra.mxu1 (!%p5414_p5), %v6092_v36 }
 0x246   : > { %6094 = vmatprep.subr.bf16.mxu1 (!%p5414_p5), %v6575_v12 }
 0x247   : > { %v4365_v2 = vadd.f32 %v4364_v54, %v4363_v15 }
 0x249   : > { %v4367_v39 = vadd.f32 %v4366_v13, %v4365_v2  ;;  %6096 = vmatpush3.bf16.msra.mxu1 (!%p5414_p5), %v6095_v58 }
 0x24a   : > { %6097 = vmatprep.subr.bf16.mxu1 (!%p5414_p5), %v6575_v12 }
 0x24b   : > { %v4368_v35 = vrot.slane %v4367_v39, 4 }
 0x24d   : > { %v4369_v41 = vadd.f32 %v4368_v35, %v4367_v39  ;;  %6099 = vmatpush3.bf16.msra.mxu1 (!%p5414_p5), %v6098_v6  ;;  %v4868_v6 = vld [vmem:[%s7979_s12 + $0x10] sm:$0xff] (!%p5414_p5) }
 0x24e   : > { %6118 = vmatprep.subr.bf16.mxu1 (!%p5414_p5), %v6575_v12  ;;  %v6122_v0 = vpack.c.bf16 (!%p5414_p5), %v4869_v1, %v4868_v6  ;;  %v5423_v1 = vld [vmem:[%s7977_s10 + $0x1] ss:$0 sm:$0xff] (!%p5414_p5) }
 0x24f   : > { %v4370_v10 = vrot.slane %v4369_v41, 2 }
 0x251   : > { %v4371_v25 = vadd.f32 %v4370_v10, %v4369_v41 }
 0x253   : > { %v4372_v52 = vrot.slane %v4371_v25, 1 }
 0x254   : > { %4388 = sbr.rel (%p5414_p5) target bundleno = 1960 (0x7a8), region = 92 }
 0x255   : > { %v4373_v3 = vadd.f32 %v4372_v52, %v4371_v25 }
 0x257   : > { %v4381_v37 = vsel %vm4377_vm10, %v4373_v3, 0.0 }
 0x258   : > { %v4382_v32 = vadd.f32 %v4381_v37, %v4378_v34 }
 0x25a   : > { %4384 = vst.msk [vmem:[#allocation2] sm:$0xf] %vm4383_vm11, %v4382_v32 }
 0x261   : > { %v4389_v44 = vld [vmem:[#allocation2] sm:$0xf] }
 0x262   : > { %4634 = vrot.lane.b32.xlu0 %v4389_v44, %s6578_s17  ;;  %6001 = vmatmul.mubr.msk.f32.vlgmr.msra.gmra.mrb[0].mxu0 %vm4399_vm13, %v4389_v44 }
 0x263   : > { %6030 = vmatprep.mubr.msk.f32.mxu0 %vm6576_vm12, %v6577_v57  ;;  %6102 = vmatpush3.bf16.msra.mxu0 %v6101_v23  ;;  %v4867_v23 = vld [vmem:[%s7979_s12 + $0x8] sm:$0xff] }
 0x264   : > { %6103 = vmatprep.subr.bf16.mxu0 %v6575_v12  ;;  %v6119_v16 = vpack.c.bf16 %v4867_v23, %v4866_v4 }
 0x267   : > { %6105 = vmatpush3.bf16.msra.mxu0 %v6104_v31  ;;  %v5421_v31 = vld [vmem:[%s7977_s10] ss:$0 sm:$0xff] }
 0x268   : > { %6106 = vmatprep.subr.bf16.mxu0 %v6575_v12 }
 0x2d4   : > { %v4635_v60 = vpop.permute.xlu0 %4634 }
 0x2d5   : > { %6031 = vmatmul.mubr.msk.f32.vlgmr.msra.gmra.mrb[2].mxu0 %vm4399_vm13, %v4635_v60  ;;  %v4770_v60 = vld [vmem:[%s7976_s9] sm:$0xff] }
 0x2d6   : > { %6049 = vmatprep.mubr.msk.f32.mxu0 %vm6576_vm12, %v6577_v57 }
 0x335   : > { %v4469_v21 = vpop.f32.mrb[0].mxu0 }
 0x336   : > { %v4470_v5 = vadd.f32 %v5415_v9, %v4469_v21  ;;  %v6002_v26 = vpop.f32.mrb[1].mxu0  ;;  %v4771_v9 = vld [vmem:[%s7976_s9 + $0x8] sm:$0xff] }
 0x337   : > { %v6107_v21 = vpack.c.bf16 %v4771_v9, %v4770_v60  ;;  %v4773_v26 = vld [vmem:[%s7976_s9 + $0x18] sm:$0xff] }
 0x338   : > { %v4474_v27 = vsel %vm4473_vm14, %v4470_v5, 0.0  ;;  %v4497_v61 = vrot.slane %v4470_v5, 2 }
 0x339   : > { %v4475_v48 = vrot.slane %v4474_v27, 4  ;;  %6108 = vmatpush3.bf16.msra.mxu0 %v6107_v21 }
 0x33a   : > { %v4499_v47 = vsel %vm4473_vm14, %v4497_v61, 0.0  ;;  %6109 = vmatprep.subr.bf16.mxu0 %v6575_v12 }
 0x33b   : > { %v4476_v14 = vadd.f32 %v4475_v48, %v4474_v27  ;;  %v4500_v28 = vrot.slane %v4499_v47, 4 }
 0x33d   : > { %v4477_v56 = vrot.slane %v4476_v14, 2  ;;  %v4501_v17 = vadd.f32 %v4500_v28, %v4499_v47  ;;  %v4775_v28 = vld [vmem:[%s7976_s9 + $0x28] sm:$0xff] }
 0x33f   : > { %v4478_v62 = vadd.f32 %v4477_v56, %v4476_v14  ;;  %v4502_v49 = vrot.slane %v4501_v17, 2  ;;  %v4774_v14 = vld [vmem:[%s7976_s9 + $0x20] sm:$0xff] }
 0x341   : > { %v4479_v50 = vrot.slane %v4478_v62, 1  ;;  %v4503_v43 = vadd.f32 %v4502_v49, %v4501_v17 }
 0x343   : > { %v4480_v11 = vadd.f32 %v4479_v50, %v4478_v62  ;;  %v4504_v30 = vrot.slane %v4503_v43, 1  ;;  %v6113_v50 = vpack.c.bf16 %v4775_v28, %v4774_v14  ;;  %v5012_v28 = vld [vmem:[%s7980_s13 + $0x10] sm:$0xff] }
 0x345   : > { %v4482_v53 = vmul.f32 0.5, %v4480_v11  ;;  %v4505_v15 = vadd.f32 %v4504_v30, %v4503_v43  ;;  %v4776_v30 = vld [vmem:[%s7976_s9 + $0x30] sm:$0xff] }
 0x347   : > { %v4483_v54 = vsub.f32 %v4470_v5, %v4482_v53  ;;  %v4506_v2 = vmul.f32 0.5, %v4505_v15  ;;  %v4777_v53 = vld [vmem:[%s7976_s9 + $0x38] sm:$0xff] }
 0x349   : > { %v4484_v13 = vmul.f32 %v4483_v54, %v4483_v54  ;;  %v4507_v39 = vsub.f32 %v4470_v5, %v4506_v2  ;;  %v4772_v5 = vld [vmem:[%s7976_s9 + $0x10] sm:$0xff]  ;;  %v6116_v2 = vpack.c.bf16 %v4777_v53, %v4776_v30  ;;  %v5425_v30 = vld [vmem:[%s7978_s11] ss:$0 sm:$0xff] }
 0x34a   : > { %v6110_v48 = vpack.c.bf16 %v4773_v26, %v4772_v5  ;;  %v5419_v5 = vld [vmem:[%s7974_s7] ss:$0 sm:$0xff] }
 0x34b   : > { %v4485_v35 = vsel %vm4473_vm14, %v4484_v13, 0.0  ;;  %v4508_v40 = vmul.f32 %v4507_v39, %v4507_v39 }
 0x34c   : > { %v4486_v41 = vrot.slane %v4485_v35, 4  ;;  %6111 = vmatpush3.bf16.msra.mxu0 %v6110_v48  ;;  %v5010_v48 = vld [vmem:[%s7980_s13] sm:$0xff] }
 0x34d   : > { %v4510_v10 = vrot.slane %v4508_v40, 2  ;;  %6112 = vmatprep.subr.bf16.mxu0 %v6575_v12 }
 0x34e   : > { %v4487_v38 = vadd.f32 %v4486_v41, %v4485_v35 }
 0x34f   : > { %v4512_v25 = vsel %vm4473_vm14, %v4510_v10, 0.0 }
 0x350   : > { %v4488_v20 = vrot.slane %v4487_v38, 2  ;;  %v4513_v52 = vrot.slane %v4512_v25, 4  ;;  %6114 = vmatpush3.bf16.msra.mxu0 %v6113_v50  ;;  %v5016_v50 = vld [vmem:[%s7980_s13 + $0x30] sm:$0xff] }
 0x351   : > { %6115 = vmatprep.subr.bf16.mxu0 %v6575_v12 }
 0x352   : > { %v4489_v3 = vadd.f32 %v4488_v20, %v4487_v38  ;;  %v4514_v34 = vadd.f32 %v4513_v52, %v4512_v25 }
 0x354   : > { %v4490_v37 = vrot.slane %v4489_v3, 1  ;;  %v4515_v32 = vrot.slane %v4514_v34, 2  ;;  %6117 = vmatpush3.bf16.msra.mxu0 %v6116_v2 }
 0x356   : > { %v4491_v22 = vadd.f32 %v4490_v37, %v4489_v3  ;;  %v4516_v29 = vadd.f32 %v4515_v32, %v4514_v34 }
 0x358   : > { %v4492_v46 = vmul.f32 0.5, %v4491_v22  ;;  %v4517_v8 = vrot.slane %v4516_v29, 1 }
 0x35a   : > { %v4493_v33 = vadd.f32 1e-05, %v4492_v46  ;;  %v4518_v44 = vadd.f32 %v4517_v8, %v4516_v29 }
 0x35c   : > { %v4519_v45 = vmul.f32 0.5, %v4518_v44  ;;  %6533 = vrsqrt.f32 %v4493_v33 }
 0x35e   : > { %v4520_v7 = vadd.f32 1e-05, %v4519_v45 }
 0x360   : > { %6535 = vrsqrt.f32 %v4520_v7 }
 0x366   : > { %v6534_v63 = vpop.eup %6533 }
 0x367   : > { %v4495_v42 = vmul.f32 %v6534_v63, %v4483_v54 }
 0x36a   : > { %v6536_v24 = vpop.eup %6535 }
 0x36b   : > { %v4522_v51 = vmul.f32 %v6536_v24, %v4507_v39 }
 0x36d   : > { %v4523_v36 = vsel %vm854_vm1, %v4495_v42, %v4522_v51 }
 0x36e   : > { %v4529_v18 = vmul.f32 %v5417_v19, %v4523_v36 }
 0x370   : > { %v4535_v58 = vadd.f32 %v5418_v55, %v4529_v18 }
 0x372   : > { %v4536_v59 = vmax.f32 %v4535_v58, 0.0 }
 0x374   : > { %6020 = vmatmul.mubr.msk.f32.vlgmr.msra.gmra.mrb[0].mxu1 %vm4296_vm9, %v4536_v59 }
 0x375   : > { %6120 = vmatpush3.bf16.msra.mxu1 %v6119_v16  ;;  %6060 = vmatprep.mubr.msk.f32.mxu1 %vm6576_vm12, %v6577_v57 }
 0x376   : > { %6121 = vmatprep.subr.bf16.mxu1 %v6575_v12 }
 0x379   : > { %6123 = vmatpush3.bf16.msra.mxu1 %v6122_v0 }
 0x37a   : > { %6124 = vmatprep.subr.bf16.mxu1 %v6575_v12 }
 0x3a8   : > { %v4704_v27 = vpop.f32.mrb[2].mxu0 }
 0x3a9   : > { %v4705_v61 = vadd.f32 %v5421_v31, %v4704_v27  ;;  %v6032_v47 = vpop.f32.mrb[3].mxu0  ;;  %v5424_v31 = vld [vmem:[%s7977_s10 + $0x2] ss:$0 sm:$0xff] }
 0x3aa   : > { %v5011_v47 = vld [vmem:[%s7980_s13 + $0x8] sm:$0xff] }
 0x3ab   : > { %v4708_v56 = vsel %vm4473_vm14, %v4705_v61, 0.0  ;;  %v4730_v17 = vrot.slane %v4705_v61, 2  ;;  %v6125_v14 = vpack.c.bf16 %v5011_v47, %v5010_v48 }
 0x3ac   : > { %v4709_v62 = vrot.slane %v4708_v56, 4 }
 0x3ad   : > { %v4732_v49 = vsel %vm4473_vm14, %v4730_v17, 0.0  ;;  %v5014_v17 = vld [vmem:[%s7980_s13 + $0x20] sm:$0xff] }
 0x3ae   : > { %v4710_v43 = vadd.f32 %v4709_v62, %v4708_v56  ;;  %v4733_v11 = vrot.slane %v4732_v49, 4  ;;  %v5015_v62 = vld [vmem:[%s7980_s13 + $0x28] sm:$0xff] }
 0x3b0   : > { %v4711_v15 = vrot.slane %v4710_v43, 2  ;;  %v4734_v54 = vadd.f32 %v4733_v11, %v4732_v49  ;;  %v6131_v49 = vpack.c.bf16 %v5015_v62, %v5014_v17 }
 0x3b2   : > { %v4712_v13 = vadd.f32 %v4711_v15, %v4710_v43  ;;  %v4735_v39 = vrot.slane %v4734_v54, 2  ;;  %v5017_v43 = vld [vmem:[%s7980_s13 + $0x38] sm:$0xff] }
 0x3b3   : > { %v6134_v11 = vpack.c.bf16 %v5017_v43, %v5016_v50 }
 0x3b4   : > { %v4713_v35 = vrot.slane %v4712_v13, 1  ;;  %v4736_v40 = vadd.f32 %v4735_v39, %v4734_v54 }
 0x3b6   : > { %v4714_v41 = vadd.f32 %v4713_v35, %v4712_v13  ;;  %v4737_v10 = vrot.slane %v4736_v40, 1 }
 0x3b8   : > { %v4715_v38 = vmul.f32 0.5, %v4714_v41  ;;  %v4738_v25 = vadd.f32 %v4737_v10, %v4736_v40 }
 0x3ba   : > { %v4716_v20 = vsub.f32 %v4705_v61, %v4715_v38  ;;  %v4739_v52 = vmul.f32 0.5, %v4738_v25 }
 0x3bc   : > { %v4717_v3 = vmul.f32 %v4716_v20, %v4716_v20  ;;  %v4740_v34 = vsub.f32 %v4705_v61, %v4739_v52 }
 0x3be   : > { %v4718_v37 = vsel %vm4473_vm14, %v4717_v3, 0.0  ;;  %v4741_v32 = vmul.f32 %v4740_v34, %v4740_v34 }
 0x3bf   : > { %v4719_v22 = vrot.slane %v4718_v37, 4 }
 0x3c0   : > { %v4743_v29 = vrot.slane %v4741_v32, 2 }
 0x3c1   : > { %v4720_v46 = vadd.f32 %v4719_v22, %v4718_v37 }
 0x3c2   : > { %v4745_v8 = vsel %vm4473_vm14, %v4743_v29, 0.0 }
 0x3c3   : > { %v4721_v33 = vrot.slane %v4720_v46, 2  ;;  %v4746_v44 = vrot.slane %v4745_v8, 4 }
 0x3c5   : > { %v4722_v45 = vadd.f32 %v4721_v33, %v4720_v46  ;;  %v4747_v7 = vadd.f32 %v4746_v44, %v4745_v8 }
 0x3c7   : > { %v4723_v63 = vrot.slane %v4722_v45, 1  ;;  %v4748_v24 = vrot.slane %v4747_v7, 2 }
 0x3c9   : > { %v4724_v42 = vadd.f32 %v4723_v63, %v4722_v45  ;;  %v4749_v51 = vadd.f32 %v4748_v24, %v4747_v7 }
 0x3cb   : > { %v4725_v19 = vmul.f32 0.5, %v4724_v42  ;;  %v4750_v36 = vrot.slane %v4749_v51, 1 }
 0x3cd   : > { %v4726_v55 = vadd.f32 1e-05, %v4725_v19  ;;  %v4751_v18 = vadd.f32 %v4750_v36, %v4749_v51 }
 0x3cf   : > { %6537 = vrsqrt.f32 %v4726_v55  ;;  %v4752_v4 = vmul.f32 0.5, %v4751_v18 }
 0x3d1   : > { %v4753_v23 = vadd.f32 1e-05, %v4752_v4 }
 0x3d3   : > { %6539 = vrsqrt.f32 %v4753_v23 }
 0x3d9   : > { %v6538_v58 = vpop.eup %6537 }
 0x3da   : > { %v4728_v16 = vmul.f32 %v6538_v58, %v4716_v20 }
 0x3dd   : > { %v6540_v59 = vpop.eup %6539 }
 0x3de   : > { %v4755_v6 = vmul.f32 %v6540_v59, %v4740_v34 }
 0x3e0   : > { %v4756_v0 = vsel %vm854_vm1, %v4728_v16, %v4755_v6 }
 0x3e1   : > { %v4762_v60 = vmul.f32 %v5423_v1, %v4756_v0 }
 0x3e3   : > { %v4768_v9 = vadd.f32 %v5424_v31, %v4762_v60 }
 0x3e5   : > { %v4769_v21 = vmax.f32 %v4768_v9, 0.0 }
 0x3e7   : > { %6050 = vmatmul.mubr.msk.f32.vlgmr.msra.gmra.mrb[4].mxu0 %vm4296_vm9, %v4769_v21 }
 0x447   : > { %v4621_v26 = vpop.f32.mrb[0].mxu1 }
 0x448   : > { %v4622_v27 = vadd.f32 %v5419_v5, %v4621_v26  ;;  %v6021_v61 = vpop.f32.mrb[1].mxu1 }
 0x44a   : > { %6061 = vmatmul.mubr.msk.f32.vlgmr.msra.gmra.mrb[2].mxu1 %vm4399_vm13, %v4622_v27 }
 0x44b   : > { %6079 = vmatprep.mubr.msk.f32.mxu1 %vm6576_vm12, %v6577_v57  ;;  %6126 = vmatpush3.bf16.msra.mxu1 %v6125_v14  ;;  %v5013_v57 = vld [vmem:[%s7980_s13 + $0x18] sm:$0xff]  ;;  %v5429_v14 = vld [vmem:[%s7981_s14 + $0x1] ss:$0 sm:$0xff] }
 0x44c   : > { %6127 = vmatprep.subr.bf16.mxu1 %v6575_v12  ;;  %v6128_v56 = vpack.c.bf16 %v5013_v57, %v5012_v28  ;;  %v5430_v57 = vld [vmem:[%s7981_s14 + $0x2] ss:$0 sm:$0xff] }
 0x44f   : > { %6129 = vmatpush3.bf16.msra.mxu1 %v6128_v56 }
 0x450   : > { %6130 = vmatprep.subr.bf16.mxu1 %v6575_v12 }
 0x453   : > { %6132 = vmatpush3.bf16.msra.mxu1 %v6131_v49  ;;  %v5431_v49 = vld [vmem:[%s7982_s15] ss:$0 sm:$0xff] }
 0x454   : > { %6133 = vmatprep.subr.bf16.mxu1 %v6575_v12  ;;  %v5427_v12 = vld [vmem:[%s7981_s14] ss:$0 sm:$0xff] }
 0x457   : > { %6135 = vmatpush3.bf16.msra.mxu1 %v6134_v11 }
 0x4ba   : > { %v4854_v53 = vpop.f32.mrb[4].mxu0 }
 0x4bb   : > { %v7926_v15 = vadd.f32 %v5425_v30, %v4854_v53  ;;  %v6051_v54 = vpop.f32.mrb[5].mxu0 }
 0x4bd   : > { %v4858_v2 = vmul.f32 %v7926_v15, %v7926_v15 }
 0x4bf   : > { %v4860_v13 = vsel %vm4859_vm15, %v4858_v2, 0.0 }
 0x4c0   : > { %4861 = vadd.xlane.f32.xlu0 %v4860_v13 }
 0x51d   : > { %v4944_v39 = vpop.f32.mrb[2].mxu1 }
 0x51e   : > { %v4945_v35 = vadd.f32 %v5427_v12, %v4944_v39  ;;  %v6062_v40 = vpop.f32.mrb[3].mxu1 }
 0x520   : > { %v4948_v41 = vsel %vm4473_vm14, %v4945_v35, 0.0  ;;  %v4970_v10 = vrot.slane %v4945_v35, 2 }
 0x521   : > { %v4949_v38 = vrot.slane %v4948_v41, 4 }
 0x522   : > { %v4972_v25 = vsel %vm4473_vm14, %v4970_v10, 0.0 }
 0x523   : > { %v4950_v20 = vadd.f32 %v4949_v38, %v4948_v41  ;;  %v4973_v52 = vrot.slane %v4972_v25, 4 }
 0x525   : > { %v4951_v3 = vrot.slane %v4950_v20, 2  ;;  %v4974_v34 = vadd.f32 %v4973_v52, %v4972_v25 }
 0x527   : > { %v4952_v37 = vadd.f32 %v4951_v3, %v4950_v20  ;;  %v4975_v32 = vrot.slane %v4974_v34, 2 }
 0x529   : > { %v4953_v22 = vrot.slane %v4952_v37, 1  ;;  %v4976_v29 = vadd.f32 %v4975_v32, %v4974_v34 }
 0x52b   : > { %v4954_v46 = vadd.f32 %v4953_v22, %v4952_v37  ;;  %v4977_v8 = vrot.slane %v4976_v29, 1 }
 0x52d   : > { %v4955_v33 = vmul.f32 0.5, %v4954_v46  ;;  %v4978_v44 = vadd.f32 %v4977_v8, %v4976_v29 }
 0x52f   : > { %v4956_v45 = vsub.f32 %v4945_v35, %v4955_v33  ;;  %v4979_v7 = vmul.f32 0.5, %v4978_v44 }
 0x531   : > { %v4957_v63 = vmul.f32 %v4956_v45, %v4956_v45  ;;  %v4980_v24 = vsub.f32 %v4945_v35, %v4979_v7 }
 0x533   : > { %v4958_v42 = vsel %vm4473_vm14, %v4957_v63, 0.0  ;;  %v4981_v51 = vmul.f32 %v4980_v24, %v4980_v24 }
 0x534   : > { %v4959_v19 = vrot.slane %v4958_v42, 4 }
 0x535   : > { %v4983_v36 = vrot.slane %v4981_v51, 2 }
 0x536   : > { %v4960_v55 = vadd.f32 %v4959_v19, %v4958_v42 }
 0x537   : > { %v4985_v18 = vsel %vm4473_vm14, %v4983_v36, 0.0 }
 0x538   : > { %v4961_v4 = vrot.slane %v4960_v55, 2  ;;  %v4986_v23 = vrot.slane %v4985_v18, 4 }
 0x53a   : > { %v4962_v58 = vadd.f32 %v4961_v4, %v4960_v55  ;;  %v4987_v16 = vadd.f32 %v4986_v23, %v4985_v18 }
 0x53c   : > { %v4963_v59 = vrot.slane %v4962_v58, 1  ;;  %v4988_v6 = vrot.slane %v4987_v16, 2 }
 0x53e   : > { %v4964_v1 = vadd.f32 %v4963_v59, %v4962_v58  ;;  %v4989_v0 = vadd.f32 %v4988_v6, %v4987_v16 }
 0x540   : > { %v4965_v31 = vmul.f32 0.5, %v4964_v1  ;;  %v4990_v60 = vrot.slane %v4989_v0, 1 }
 0x542   : > { %v4966_v9 = vadd.f32 1e-05, %v4965_v31  ;;  %v4991_v21 = vadd.f32 %v4990_v60, %v4989_v0 }
 0x544   : > { %v4992_v5 = vmul.f32 0.5, %v4991_v21  ;;  %6541 = vrsqrt.f32 %v4966_v9 }
 0x546   : > { %v4993_v26 = vadd.f32 1e-05, %v4992_v5 }
 0x548   : > { %6543 = vrsqrt.f32 %v4993_v26 }
 0x54d   : > { %v4862_v54 = vpop.xlane.xlu0 %4861 }
 0x54e   : > { %v6542_v27 = vpop.eup %6541  ;;  %v4863_v2 = vmax.f32 %v4862_v54, 1e-24 }
 0x54f   : > { %v4968_v48 = vmul.f32 %v6542_v27, %v4956_v45 }
 0x550   : > { %6545 = vrsqrt.f32 %v4863_v2 }
 0x552   : > { %v6544_v61 = vpop.eup %6543 }
 0x553   : > { %v4995_v47 = vmul.f32 %v6544_v61, %v4980_v24 }
 0x555   : > { %v4996_v28 = vsel %vm854_vm1, %v4968_v48, %v4995_v47 }
 0x556   : > { %v5002_v56 = vmul.f32 %v5429_v14, %v4996_v28 }
 0x558   : > { %v5008_v17 = vadd.f32 %v5430_v57, %v5002_v56 }
 0x55a   : > { %v5009_v62 = vmax.f32 %v5008_v17, 0.0  ;;  %v6546_v39 = vpop.eup %6545 }
 0x55b   : > { %v4865_v35 = vmul.f32 %v6546_v39, %v7926_v15 }
 0x55c   : > { %6080 = vmatmul.mubr.msk.f32.vlgmr.msra.gmra.mrb[4].mxu1 %vm4296_vm9, %v5009_v62 }
 0x55d   : > { %v5109_v10 = vrot.slane %v4865_v35, 6  ;;  %v5106_v38 = vrot.slane %v4865_v35, 2 }
 0x62f   : > { %v5094_v50 = vpop.f32.mrb[4].mxu1 }
 0x630   : > { %v5095_v43 = vadd.f32 %v5431_v49, %v5094_v50  ;;  %v6081_v11 = vpop.f32.mrb[5].mxu1 }
 0x632   : > { %v5098_v30 = vmul.f32 %v5095_v43, %v5095_v43 }
 0x634   : > { %v5099_v53 = vsel %vm4859_vm15, %v5098_v30, 0.0 }
 0x635   : > { %5100 = vadd.xlane.f32.xlu1 %v5099_v53 }
 0x6c2   : > { %v5101_v13 = vpop.xlane.xlu1 %5100 }
 0x6c3   : > { %v5102_v12 = vmax.f32 %v5101_v13, 1e-24 }
 0x6c5   : > { %6547 = vrsqrt.f32 %v5102_v12 }
 0x6cf   : > { %v6548_v40 = vpop.eup %6547 }
 0x6d0   : > { %v5104_v41 = vmul.f32 %v6548_v40, %v5095_v43 }
 0x6d2   : > { %v5111_v25 = vmul.f32 %v5109_v10, %v5104_v41  ;;  %v5108_v20 = vmul.f32 %v5106_v38, %v5104_v41 }
 0x6d4   : > { %v5113_v52 = vrot.slane %v5111_v25, 2 }
 0x6d6   : > { %v5115_v3 = vadd.f32 %v5113_v52, %v5108_v20 }
 0x6d8   : > { %v5117_v34 = vsel %vm5116_vm0, %v5115_v3, 0.0 }
 0x6d9   : > { %5118 = vadd.xlane.f32.xlu1 %v5117_v34 }
 0x766   : > { %v5119_v37 = vpop.xlane.xlu1 %5118 }
 0x767   : > { %v5120_v32 = vrot.slane %v5119_v37, 4 }
 0x769   : > { %v5121_v22 = vadd.f32 %v5120_v32, %v5119_v37 }
 0x76b   : > { %v5122_v29 = vrot.slane %v5121_v22, 2 }
 0x76d   : > { %v5123_v46 = vadd.f32 %v5122_v29, %v5121_v22 }
 0x76f   : > { %v5124_v8 = vrot.slane %v5123_v46, 1 }
 0x771   : > { %v5125_v33 = vadd.f32 %v5124_v8, %v5123_v46 }
 0x773   : > { %6436 = vpush %v5125_v33 }
 0x7a4   : > { %s6437_s30 = spop %6436 }
 0x7a5   : > { %s5127_s0 = smul.f32 -1.0, %s6437_s30 }
 0x7a7   : > { %5129 = sst [smem:[#allocation3]] %s5127_s0 }
 0x7a8 PF: > { %p6442_p6 = scmp.eq.s32.totalorder %s6671_s22, 3  ;;  %s6549_s19 = scalar_lea.hbm %s7983_s16, 16 }
 0x7a9   : > { %p6550_p7 = scmp.ne.s32.totalorder %s7983_s16, %s6549_s19  ;;  %p6555_p10 = scmp.lt.u32.totalorder %s6549_s19, %s7983_s16 }
 0x7ab   : > { %p6551_p8 = pnand %p6550_p7, %p6442_p6 }
 0x7ad   : > { %p6552_p9 = pneg %p6551_p8 }
 0x7af   : > { %p6557_p11 = pnand %p6555_p10, %p6552_p9 }
 0x7b1   : > { %6560 = shalt.err (!%p6557_p11)
}
 0x7b2   : > { %s6579_s25 = smov [#allocation3]  }
 0x7b3   : > { %6439 = dma.smem_to_hbm (%p6442_p6), %s6579_s25, 16, %s7983_s16, [#allocation4]  }
 0x7b4   : > { %6566 = dma.done.wait (%p6442_p6), [#allocation4], 16  }
 0x7b5   : > { %6568 = vsyncadd (%p6442_p6), [#allocation4], 4294967280 }
 0x7b6   : > { %5143 = sfence }
 0x7b7 PF: > { %s27_s21 = sadd.s32 1, %s6571_s21  }
 0x7b8   : > { %p24_p12 = scmp.ge.s32.totalorder %s27_s21, 6  }
 0x7ba   :  { %26 = sbr.rel (!%p24_p12) target bundleno = 3 (0x3), region = 128 }
 0x7c1   :  { %5149 = vsyncpa [#allocation4], 1 }
 0x7c2   :  { %5151 = vsyncpa [#allocation4 + $0x1], 1 }

</bundles_post_ra>
